<compile_context>
chip_gen: v5e
topology: v5e:2x2
jax: 0.10.0
libtpu: 0.0.40
codegen_flags: <defaults>
</compile_context>

<pallas_src>
import jax
import jax.numpy as jnp
from jax.experimental import pallas as pl
from jax.experimental.pallas import tpu as pltpu

MODEL_SIZE = 32                       # stands in for the 512x512 internal resize
PAD_SIZE = MODEL_SIZE + 2             # 3x3 conv halo -> 34
NUM_PADDED = PAD_SIZE * PAD_SIZE      # 1156 padded-flat pixels
# valid conv outputs live at q = r*PAD_SIZE + c (r, c in [0, MODEL_SIZE)):
PIX_WIN = (MODEL_SIZE - 1) * PAD_SIZE + MODEL_SIZE   # 1086-lane working window
HIDDEN = 32                           # hidden channels of the synthetic "trainmodel"
NUM_CLASSES = 19                      # face-parsing class count
TARGET_CLASS = 10                     # class thresholded to 255 in Exporter.forward
K_FEATS = 3 * 3 * 3                   # 3x3 taps x 3 channels


# ---------------------------------------------------------------------------
# Single fused Pallas kernel:
#   (folded) normalize + conv3x3 (9 shifted matmuls) + ReLU + 1x1 conv
#   + "argmax == 10" threshold + separable bilinear resize back to (w0, h0).
# Pixels live on the lane axis throughout; features/classes on sublanes.
# ---------------------------------------------------------------------------
def exporter_kernel(img_ref, w1f_ref, b1f_ref, w2t_ref, b2_ref, ah_ref, awt_ref,
                    out_ref, msk_ref, m2d_ref, lg_ref):
    # --- conv3x3 over the padded-flat pixel axis -------------------------------
    # output position q = r*PAD_SIZE + c ; tap (di, dj) reads q + di*PAD_SIZE + dj.
    # Normalization (/255 then (x-0.5)/0.5) is pre-folded into w1f / b1f, so the
    # matmul consumes raw pixel values directly (pad value 127.5 maps to 0).
    acc = jnp.dot(w1f_ref[:, 0:3], img_ref[:, 0:PIX_WIN],
                  preferred_element_type=jnp.float32)                  # (H, P)
    for tap in range(1, 9):
        di, dj = divmod(tap, 3)
        off = di * PAD_SIZE + dj
        acc = acc + jnp.dot(w1f_ref[:, 3 * tap:3 * tap + 3],
                            img_ref[:, off:off + PIX_WIN],
                            preferred_element_type=jnp.float32)        # (H, P)

    hdn = jnp.maximum(acc + b1f_ref[...], 0.0)                         # (H, P)

    # 1x1 conv -> logits, staged in a scratch ref so class-band slices are loads
    lg_ref[...] = jnp.dot(w2t_ref[...], hdn,
                          preferred_element_type=jnp.float32) + b2_ref[...]   # (C, P)

    # --- "torch.argmax == TARGET_CLASS" (first-max tie-break) ------------------
    tgt = lg_ref[TARGET_CLASS:TARGET_CLASS + 1, :]                     # (1, P)
    lo = jnp.max(lg_ref[0:TARGET_CLASS, :], axis=0, keepdims=True)     # (1, P)
    hi = jnp.max(lg_ref[TARGET_CLASS + 1:NUM_CLASSES, :], axis=0, keepdims=True)
    is_tgt = jnp.logical_and(tgt > lo, tgt >= hi)
    msk_ref[...] = jnp.where(is_tgt, 255.0, 0.0)                       # (1, P)

    # --- relayout (1, P) -> (S, S): model row r sits at lane offset r*PAD_SIZE --
    for r in range(MODEL_SIZE):
        m2d_ref[r:r + 1, :] = msk_ref[0:1, r * PAD_SIZE:r * PAD_SIZE + MODEL_SIZE]

    # --- separable bilinear Resize((w0, h0), LINEAR):  A_h @ mask2d @ A_w^T -----
    t1 = jnp.dot(ah_ref[...], m2d_ref[...],
                 preferred_element_type=jnp.float32)                   # (w0, S)
    out_ref[...] = jnp.dot(t1, awt_ref[...],
                           preferred_element_type=jnp.float32)         # (w0, h0)


def run_exporter_kernel(img_flat, w1f, b1f, w2t, b2, a_h, a_wt):
    w0 = a_h.shape[0]
    h0 = a_wt.shape[1]
    # Single invocation, whole operands resident in VMEM (~0.5 MiB total):
    # no grid, no pipeline bookkeeping.
    return pl.pallas_call(
        exporter_kernel,
        out_shape=jax.ShapeDtypeStruct((w0, h0), jnp.float32),
        scratch_shapes=[
            pltpu.VMEM((1, PIX_WIN), jnp.float32),                 # flat 0/255 mask
            pltpu.VMEM((MODEL_SIZE, MODEL_SIZE), jnp.float32),     # mask2d
            pltpu.VMEM((NUM_CLASSES, PIX_WIN), jnp.float32),       # logits staging
        ],
    )(img_flat, w1f, b1f, w2t, b2, a_h, a_wt)


# ---------------------------------------------------------------------------
# Glue (plain JAX): nearest-resize gather, halo pad, interpolation matrices.
# a_h / a_wt depend only on static shapes -> constant-folded at compile time.
# ---------------------------------------------------------------------------
def nearest_resize_chw(img_chw, out_hw):
    # torch nearest: src_idx = floor(dst * in / out); single gather
    _, h, w = img_chw.shape
    oh, ow = out_hw
    ri = (jnp.arange(oh) * h) // oh
    ci = (jnp.arange(ow) * w) // ow
    return img_chw[:, ri[:, None], ci[None, :]]


def bilinear_matrix(out_size, in_size):
    # torch bilinear, align_corners=False, antialias=False
    scale = in_size / out_size
    dst = jnp.arange(out_size, dtype=jnp.float32)
    src = jnp.clip((dst + 0.5) * scale - 0.5, 0.0, in_size - 1)
    lo = jnp.floor(src).astype(jnp.int32)
    hi = jnp.minimum(lo + 1, in_size - 1)
    frac = src - lo.astype(jnp.float32)
    rows = jnp.arange(out_size)
    a = jnp.zeros((out_size, in_size), jnp.float32)
    a = a.at[rows, lo].add(1.0 - frac)
    a = a.at[rows, hi].add(frac)
    return a


def init_params(key):
    k1, k2, k3, k4 = jax.random.split(key, 4)
    # transposed layout: (out_features, in_features); K ordering is tap-major,
    # channel-minor (tap = di*3 + dj), matching the kernel's shifted-window order.
    w1t = jax.random.normal(k1, (HIDDEN, K_FEATS), jnp.float32) * 0.2       # conv3x3
    b1 = jax.random.normal(k2, (HIDDEN, 1), jnp.float32) * 0.1
    w2t = jax.random.normal(k3, (NUM_CLASSES, HIDDEN), jnp.float32) * 0.2   # conv1x1
    b2 = jax.random.normal(k4, (NUM_CLASSES, 1), jnp.float32) * 0.1
    return w1t, b1, w2t, b2


def fold_params(params):
    # One-time offline fold of (x/255 - 0.5)/0.5 == x/127.5 - 1 into layer 1:
    #   h = W1 @ (x/127.5 - 1) + b1 = (W1/127.5) @ x + (b1 - W1 @ 1)
    w1t, b1, w2t, b2 = params
    w1f = w1t * (1.0 / 127.5)
    b1f = b1 - jnp.sum(w1t, axis=1, keepdims=True)
    return w1f, b1f, w2t, b2


def exporter_forward(x, folded_params):
    # x: (w, h, c) uint8 image, matching `w, h, c = x.size()`
    w0, h0, _ = x.shape
    w1f, b1f, w2t, b2 = folded_params

    xf = x[:, :, :3].astype(jnp.float32)                     # drop alpha, raw 0..255
    xf = jnp.transpose(xf, (2, 0, 1))                        # permute(2,0,1) -> (3, w, h)
    xf = nearest_resize_chw(xf, (MODEL_SIZE, MODEL_SIZE))    # Resize(S, S, NEAREST)
    xp = jnp.pad(xf, ((0, 0), (1, 1), (1, 1)),
                 constant_values=127.5)                      # conv halo; 127.5 -> 0 after fold
    img_flat = xp.reshape(3, NUM_PADDED)                     # (3, 1156) padded-flat

    a_h = bilinear_matrix(w0, MODEL_SIZE)                    # (w0, S), compile-time const
    a_wt = bilinear_matrix(h0, MODEL_SIZE).T                 # (S, h0), compile-time const

    res = run_exporter_kernel(img_flat, w1f, b1f, w2t, b2, a_h, a_wt)   # (w0, h0) f32

    # single fused elementwise op: round -> clamp -> uint8 (torchvision uint8 resize tail)
    out = jnp.clip(jnp.round(res), 0.0, 255.0).astype(jnp.uint8)
    return out[None, :, :, None]                             # (1, w, h, 1) uint8


if __name__ == "__main__":
    key = jax.random.PRNGKey(0)
    kx, kp = jax.random.split(key)
    # small RGBA-like input image, (w, h, c) = (16, 16, 4)
    x = jax.random.randint(kx, (16, 16, 4), 0, 256, dtype=jnp.int32).astype(jnp.uint8)
    params = init_params(kp)
    folded = fold_params(params)          # offline, outside the jitted hot path
    out = jax.jit(exporter_forward)(x, folded)
    out = jax.block_until_ready(out)
    assert out.shape == (1, 16, 16, 1), out.shape
    assert out.dtype == jnp.uint8, out.dtype
    print("KERNEL_OK")
</pallas_src>

<mosaic_0001>
module attributes {stable_mosaic.version = 11 : i64} {
  func.func @exporter_kernel(%arg0: memref<3x1156xf32, #tpu.memory_space<vmem>>, %arg1: memref<32x27xf32, #tpu.memory_space<vmem>>, %arg2: memref<32x1xf32, #tpu.memory_space<vmem>>, %arg3: memref<19x32xf32, #tpu.memory_space<vmem>>, %arg4: memref<19x1xf32, #tpu.memory_space<vmem>>, %arg5: memref<16x32xf32, #tpu.memory_space<vmem>>, %arg6: memref<32x16xf32, #tpu.memory_space<vmem>>, %arg7: memref<16x16xf32, #tpu.memory_space<vmem>>, %arg8: memref<1x1086xf32, #tpu.memory_space<vmem>>, %arg9: memref<32x32xf32, #tpu.memory_space<vmem>>, %arg10: memref<19x1086xf32, #tpu.memory_space<vmem>>) attributes {dimension_semantics = [], scalar_prefetch = 0 : i64, scratch_operands = 3 : i64, tpu.core_type = #tpu.core_type<tc>} {
    %c0 = arith.constant 0 : index
    %c0_0 = arith.constant 0 : index
    %0 = vector.load %arg1[%c0, %c0_0] : memref<32x27xf32, #tpu.memory_space<vmem>>, vector<32x3xf32>
    %c0_1 = arith.constant 0 : index
    %c0_2 = arith.constant 0 : index
    %1 = vector.load %arg0[%c0_1, %c0_2] : memref<3x1156xf32, #tpu.memory_space<vmem>>, vector<3x1086xf32>
    %cst = arith.constant dense<0.000000e+00> : vector<32x1086xf32>
    %2 = tpu.matmul %0, %1, %cst {dimension_numbers = #tpu.dot_dimension_numbers<[1], [0], [0], [1], [0, 0, 1, 1], [], []>} : vector<32x3xf32>, vector<3x1086xf32>, vector<32x1086xf32> -> vector<32x1086xf32>
    %c0_3 = arith.constant 0 : index
    %c3 = arith.constant 3 : index
    %3 = vector.load %arg1[%c0_3, %c3] : memref<32x27xf32, #tpu.memory_space<vmem>>, vector<32x3xf32>
    %c0_4 = arith.constant 0 : index
    %c1 = arith.constant 1 : index
    %4 = vector.load %arg0[%c0_4, %c1] : memref<3x1156xf32, #tpu.memory_space<vmem>>, vector<3x1086xf32>
    %cst_5 = arith.constant dense<0.000000e+00> : vector<32x1086xf32>
    %5 = tpu.matmul %3, %4, %cst_5 {dimension_numbers = #tpu.dot_dimension_numbers<[1], [0], [0], [1], [0, 0, 1, 1], [], []>} : vector<32x3xf32>, vector<3x1086xf32>, vector<32x1086xf32> -> vector<32x1086xf32>
    %6 = arith.addf %2, %5 : vector<32x1086xf32>
    %c0_6 = arith.constant 0 : index
    %c6 = arith.constant 6 : index
    %7 = vector.load %arg1[%c0_6, %c6] : memref<32x27xf32, #tpu.memory_space<vmem>>, vector<32x3xf32>
    %c0_7 = arith.constant 0 : index
    %c2 = arith.constant 2 : index
    %8 = vector.load %arg0[%c0_7, %c2] : memref<3x1156xf32, #tpu.memory_space<vmem>>, vector<3x1086xf32>
    %cst_8 = arith.constant dense<0.000000e+00> : vector<32x1086xf32>
    %9 = tpu.matmul %7, %8, %cst_8 {dimension_numbers = #tpu.dot_dimension_numbers<[1], [0], [0], [1], [0, 0, 1, 1], [], []>} : vector<32x3xf32>, vector<3x1086xf32>, vector<32x1086xf32> -> vector<32x1086xf32>
    %10 = arith.addf %6, %9 : vector<32x1086xf32>
    %c0_9 = arith.constant 0 : index
    %c9 = arith.constant 9 : index
    %11 = vector.load %arg1[%c0_9, %c9] : memref<32x27xf32, #tpu.memory_space<vmem>>, vector<32x3xf32>
    %c0_10 = arith.constant 0 : index
    %c34 = arith.constant 34 : index
    %12 = vector.load %arg0[%c0_10, %c34] : memref<3x1156xf32, #tpu.memory_space<vmem>>, vector<3x1086xf32>
    %cst_11 = arith.constant dense<0.000000e+00> : vector<32x1086xf32>
    %13 = tpu.matmul %11, %12, %cst_11 {dimension_numbers = #tpu.dot_dimension_numbers<[1], [0], [0], [1], [0, 0, 1, 1], [], []>} : vector<32x3xf32>, vector<3x1086xf32>, vector<32x1086xf32> -> vector<32x1086xf32>
    %14 = arith.addf %10, %13 : vector<32x1086xf32>
    %c0_12 = arith.constant 0 : index
    %c12 = arith.constant 12 : index
    %15 = vector.load %arg1[%c0_12, %c12] : memref<32x27xf32, #tpu.memory_space<vmem>>, vector<32x3xf32>
    %c0_13 = arith.constant 0 : index
    %c35 = arith.constant 35 : index
    %16 = vector.load %arg0[%c0_13, %c35] : memref<3x1156xf32, #tpu.memory_space<vmem>>, vector<3x1086xf32>
    %cst_14 = arith.constant dense<0.000000e+00> : vector<32x1086xf32>
    %17 = tpu.matmul %15, %16, %cst_14 {dimension_numbers = #tpu.dot_dimension_numbers<[1], [0], [0], [1], [0, 0, 1, 1], [], []>} : vector<32x3xf32>, vector<3x1086xf32>, vector<32x1086xf32> -> vector<32x1086xf32>
    %18 = arith.addf %14, %17 : vector<32x1086xf32>
    %c0_15 = arith.constant 0 : index
    %c15 = arith.constant 15 : index
    %19 = vector.load %arg1[%c0_15, %c15] : memref<32x27xf32, #tpu.memory_space<vmem>>, vector<32x3xf32>
    %c0_16 = arith.constant 0 : index
    %c36 = arith.constant 36 : index
    %20 = vector.load %arg0[%c0_16, %c36] : memref<3x1156xf32, #tpu.memory_space<vmem>>, vector<3x1086xf32>
    %cst_17 = arith.constant dense<0.000000e+00> : vector<32x1086xf32>
    %21 = tpu.matmul %19, %20, %cst_17 {dimension_numbers = #tpu.dot_dimension_numbers<[1], [0], [0], [1], [0, 0, 1, 1], [], []>} : vector<32x3xf32>, vector<3x1086xf32>, vector<32x1086xf32> -> vector<32x1086xf32>
    %22 = arith.addf %18, %21 : vector<32x1086xf32>
    %c0_18 = arith.constant 0 : index
    %c18 = arith.constant 18 : index
    %23 = vector.load %arg1[%c0_18, %c18] : memref<32x27xf32, #tpu.memory_space<vmem>>, vector<32x3xf32>
    %c0_19 = arith.constant 0 : index
    %c68 = arith.constant 68 : index
    %24 = vector.load %arg0[%c0_19, %c68] : memref<3x1156xf32, #tpu.memory_space<vmem>>, vector<3x1086xf32>
    %cst_20 = arith.constant dense<0.000000e+00> : vector<32x1086xf32>
    %25 = tpu.matmul %23, %24, %cst_20 {dimension_numbers = #tpu.dot_dimension_numbers<[1], [0], [0], [1], [0, 0, 1, 1], [], []>} : vector<32x3xf32>, vector<3x1086xf32>, vector<32x1086xf32> -> vector<32x1086xf32>
    %26 = arith.addf %22, %25 : vector<32x1086xf32>
    %c0_21 = arith.constant 0 : index
    %c21 = arith.constant 21 : index
    %27 = vector.load %arg1[%c0_21, %c21] : memref<32x27xf32, #tpu.memory_space<vmem>>, vector<32x3xf32>
    %c0_22 = arith.constant 0 : index
    %c69 = arith.constant 69 : index
    %28 = vector.load %arg0[%c0_22, %c69] : memref<3x1156xf32, #tpu.memory_space<vmem>>, vector<3x1086xf32>
    %cst_23 = arith.constant dense<0.000000e+00> : vector<32x1086xf32>
    %29 = tpu.matmul %27, %28, %cst_23 {dimension_numbers = #tpu.dot_dimension_numbers<[1], [0], [0], [1], [0, 0, 1, 1], [], []>} : vector<32x3xf32>, vector<3x1086xf32>, vector<32x1086xf32> -> vector<32x1086xf32>
    %30 = arith.addf %26, %29 : vector<32x1086xf32>
    %c0_24 = arith.constant 0 : index
    %c24 = arith.constant 24 : index
    %31 = vector.load %arg1[%c0_24, %c24] : memref<32x27xf32, #tpu.memory_space<vmem>>, vector<32x3xf32>
    %c0_25 = arith.constant 0 : index
    %c70 = arith.constant 70 : index
    %32 = vector.load %arg0[%c0_25, %c70] : memref<3x1156xf32, #tpu.memory_space<vmem>>, vector<3x1086xf32>
    %cst_26 = arith.constant dense<0.000000e+00> : vector<32x1086xf32>
    %33 = tpu.matmul %31, %32, %cst_26 {dimension_numbers = #tpu.dot_dimension_numbers<[1], [0], [0], [1], [0, 0, 1, 1], [], []>} : vector<32x3xf32>, vector<3x1086xf32>, vector<32x1086xf32> -> vector<32x1086xf32>
    %34 = arith.addf %30, %33 : vector<32x1086xf32>
    %c0_27 = arith.constant 0 : index
    %c0_28 = arith.constant 0 : index
    %35 = vector.load %arg2[%c0_27, %c0_28] : memref<32x1xf32, #tpu.memory_space<vmem>>, vector<32x1xf32>
    %36 = vector.broadcast %35 : vector<32x1xf32> to vector<32x1086xf32>
    %37 = arith.addf %34, %36 : vector<32x1086xf32>
    %cst_29 = arith.constant 0.000000e+00 : f32
    %38 = vector.broadcast %cst_29 : f32 to vector<32x1086xf32>
    %39 = arith.maximumf %37, %38 : vector<32x1086xf32>
    %c0_30 = arith.constant 0 : index
    %c0_31 = arith.constant 0 : index
    %40 = vector.load %arg3[%c0_30, %c0_31] : memref<19x32xf32, #tpu.memory_space<vmem>>, vector<19x32xf32>
    %cst_32 = arith.constant dense<0.000000e+00> : vector<19x1086xf32>
    %41 = tpu.matmul %40, %39, %cst_32 {dimension_numbers = #tpu.dot_dimension_numbers<[1], [0], [0], [1], [0, 0, 1, 1], [], []>} : vector<19x32xf32>, vector<32x1086xf32>, vector<19x1086xf32> -> vector<19x1086xf32>
    %c0_33 = arith.constant 0 : index
    %c0_34 = arith.constant 0 : index
    %42 = vector.load %arg4[%c0_33, %c0_34] : memref<19x1xf32, #tpu.memory_space<vmem>>, vector<19x1xf32>
    %43 = vector.broadcast %42 : vector<19x1xf32> to vector<19x1086xf32>
    %44 = arith.addf %41, %43 : vector<19x1086xf32>
    %c0_35 = arith.constant 0 : index
    %c0_36 = arith.constant 0 : index
    %45 = vector.load %arg10[%c0_35, %c0_36] : memref<19x1086xf32, #tpu.memory_space<vmem>>, vector<19x1086xf32>
    tpu.vector_store %arg10[%c0_35, %c0_36], %44 {strides = array<i32>} : memref<19x1086xf32, #tpu.memory_space<vmem>>, vector<19x1086xf32>,
    %c10 = arith.constant 10 : index
    %c0_37 = arith.constant 0 : index
    %46 = vector.load %arg10[%c10, %c0_37] : memref<19x1086xf32, #tpu.memory_space<vmem>>, vector<1x1086xf32>
    %c0_38 = arith.constant 0 : index
    %c0_39 = arith.constant 0 : index
    %47 = vector.load %arg10[%c0_38, %c0_39] : memref<19x1086xf32, #tpu.memory_space<vmem>>, vector<10x1086xf32>
    %cst_40 = arith.constant dense<0xFF800000> : vector<1086xf32>
    %48 = vector.multi_reduction <maximumf>, %47, %cst_40 [0] : vector<10x1086xf32> to vector<1086xf32>
    %49 = vector.shape_cast %48 : vector<1086xf32> to vector<1x1086xf32>
    %c11 = arith.constant 11 : index
    %c0_41 = arith.constant 0 : index
    %50 = vector.load %arg10[%c11, %c0_41] : memref<19x1086xf32, #tpu.memory_space<vmem>>, vector<8x1086xf32>
    %cst_42 = arith.constant dense<0xFF800000> : vector<1086xf32>
    %51 = vector.multi_reduction <maximumf>, %50, %cst_42 [0] : vector<8x1086xf32> to vector<1086xf32>
    %52 = vector.shape_cast %51 : vector<1086xf32> to vector<1x1086xf32>
    %53 = arith.cmpf ogt, %46, %49 : vector<1x1086xf32>
    %54 = arith.cmpf oge, %46, %52 : vector<1x1086xf32>
    %55 = arith.andi %53, %54 : vector<1x1086xi1>
    %cst_43 = arith.constant 2.550000e+02 : f32
    %cst_44 = arith.constant 0.000000e+00 : f32
    %56 = vector.broadcast %cst_43 : f32 to vector<1x1086xf32>
    %57 = vector.broadcast %cst_44 : f32 to vector<1x1086xf32>
    %58 = arith.select %55, %56, %57 : vector<1x1086xi1>, vector<1x1086xf32>
    %c0_45 = arith.constant 0 : index
    %c0_46 = arith.constant 0 : index
    %59 = vector.load %arg8[%c0_45, %c0_46] : memref<1x1086xf32, #tpu.memory_space<vmem>>, vector<1x1086xf32>
    tpu.vector_store %arg8[%c0_45, %c0_46], %58 {strides = array<i32>} : memref<1x1086xf32, #tpu.memory_space<vmem>>, vector<1x1086xf32>,
    %c0_47 = arith.constant 0 : index
    %c0_48 = arith.constant 0 : index
    %60 = vector.load %arg8[%c0_47, %c0_48] : memref<1x1086xf32, #tpu.memory_space<vmem>>, vector<1x32xf32>
    %c0_49 = arith.constant 0 : index
    %c0_50 = arith.constant 0 : index
    %61 = vector.load %arg9[%c0_49, %c0_50] : memref<32x32xf32, #tpu.memory_space<vmem>>, vector<1x32xf32>
    tpu.vector_store %arg9[%c0_49, %c0_50], %60 {strides = array<i32>} : memref<32x32xf32, #tpu.memory_space<vmem>>, vector<1x32xf32>,
    %c0_51 = arith.constant 0 : index
    %c34_52 = arith.constant 34 : index
    %62 = vector.load %arg8[%c0_51, %c34_52] : memref<1x1086xf32, #tpu.memory_space<vmem>>, vector<1x32xf32>
    %c1_53 = arith.constant 1 : index
    %c0_54 = arith.constant 0 : index
    %63 = vector.load %arg9[%c1_53, %c0_54] : memref<32x32xf32, #tpu.memory_space<vmem>>, vector<1x32xf32>
    tpu.vector_store %arg9[%c1_53, %c0_54], %62 {strides = array<i32>} : memref<32x32xf32, #tpu.memory_space<vmem>>, vector<1x32xf32>,
    %c0_55 = arith.constant 0 : index
    %c68_56 = arith.constant 68 : index
    %64 = vector.load %arg8[%c0_55, %c68_56] : memref<1x1086xf32, #tpu.memory_space<vmem>>, vector<1x32xf32>
    %c2_57 = arith.constant 2 : index
    %c0_58 = arith.constant 0 : index
    %65 = vector.load %arg9[%c2_57, %c0_58] : memref<32x32xf32, #tpu.memory_space<vmem>>, vector<1x32xf32>
    tpu.vector_store %arg9[%c2_57, %c0_58], %64 {strides = array<i32>} : memref<32x32xf32, #tpu.memory_space<vmem>>, vector<1x32xf32>,
    %c0_59 = arith.constant 0 : index
    %c102 = arith.constant 102 : index
    %66 = vector.load %arg8[%c0_59, %c102] : memref<1x1086xf32, #tpu.memory_space<vmem>>, vector<1x32xf32>
    %c3_60 = arith.constant 3 : index
    %c0_61 = arith.constant 0 : index
    %67 = vector.load %arg9[%c3_60, %c0_61] : memref<32x32xf32, #tpu.memory_space<vmem>>, vector<1x32xf32>
    tpu.vector_store %arg9[%c3_60, %c0_61], %66 {strides = array<i32>} : memref<32x32xf32, #tpu.memory_space<vmem>>, vector<1x32xf32>,
    %c0_62 = arith.constant 0 : index
    %c136 = arith.constant 136 : index
    %68 = vector.load %arg8[%c0_62, %c136] : memref<1x1086xf32, #tpu.memory_space<vmem>>, vector<1x32xf32>
    %c4 = arith.constant 4 : index
    %c0_63 = arith.constant 0 : index
    %69 = vector.load %arg9[%c4, %c0_63] : memref<32x32xf32, #tpu.memory_space<vmem>>, vector<1x32xf32>
    tpu.vector_store %arg9[%c4, %c0_63], %68 {strides = array<i32>} : memref<32x32xf32, #tpu.memory_space<vmem>>, vector<1x32xf32>,
    %c0_64 = arith.constant 0 : index
    %c170 = arith.constant 170 : index
    %70 = vector.load %arg8[%c0_64, %c170] : memref<1x1086xf32, #tpu.memory_space<vmem>>, vector<1x32xf32>
    %c5 = arith.constant 5 : index
    %c0_65 = arith.constant 0 : index
    %71 = vector.load %arg9[%c5, %c0_65] : memref<32x32xf32, #tpu.memory_space<vmem>>, vector<1x32xf32>
    tpu.vector_store %arg9[%c5, %c0_65], %70 {strides = array<i32>} : memref<32x32xf32, #tpu.memory_space<vmem>>, vector<1x32xf32>,
    %c0_66 = arith.constant 0 : index
    %c204 = arith.constant 204 : index
    %72 = vector.load %arg8[%c0_66, %c204] : memref<1x1086xf32, #tpu.memory_space<vmem>>, vector<1x32xf32>
    %c6_67 = arith.constant 6 : index
    %c0_68 = arith.constant 0 : index
    %73 = vector.load %arg9[%c6_67, %c0_68] : memref<32x32xf32, #tpu.memory_space<vmem>>, vector<1x32xf32>
    tpu.vector_store %arg9[%c6_67, %c0_68], %72 {strides = array<i32>} : memref<32x32xf32, #tpu.memory_space<vmem>>, vector<1x32xf32>,
    %c0_69 = arith.constant 0 : index
    %c238 = arith.constant 238 : index
    %74 = vector.load %arg8[%c0_69, %c238] : memref<1x1086xf32, #tpu.memory_space<vmem>>, vector<1x32xf32>
    %c7 = arith.constant 7 : index
    %c0_70 = arith.constant 0 : index
    %75 = vector.load %arg9[%c7, %c0_70] : memref<32x32xf32, #tpu.memory_space<vmem>>, vector<1x32xf32>
    tpu.vector_store %arg9[%c7, %c0_70], %74 {strides = array<i32>} : memref<32x32xf32, #tpu.memory_space<vmem>>, vector<1x32xf32>,
    %c0_71 = arith.constant 0 : index
    %c272 = arith.constant 272 : index
    %76 = vector.load %arg8[%c0_71, %c272] : memref<1x1086xf32, #tpu.memory_space<vmem>>, vector<1x32xf32>
    %c8 = arith.constant 8 : index
    %c0_72 = arith.constant 0 : index
    %77 = vector.load %arg9[%c8, %c0_72] : memref<32x32xf32, #tpu.memory_space<vmem>>, vector<1x32xf32>
    tpu.vector_store %arg9[%c8, %c0_72], %76 {strides = array<i32>} : memref<32x32xf32, #tpu.memory_space<vmem>>, vector<1x32xf32>,
    %c0_73 = arith.constant 0 : index
    %c306 = arith.constant 306 : index
    %78 = vector.load %arg8[%c0_73, %c306] : memref<1x1086xf32, #tpu.memory_space<vmem>>, vector<1x32xf32>
    %c9_74 = arith.constant 9 : index
    %c0_75 = arith.constant 0 : index
    %79 = vector.load %arg9[%c9_74, %c0_75] : memref<32x32xf32, #tpu.memory_space<vmem>>, vector<1x32xf32>
    tpu.vector_store %arg9[%c9_74, %c0_75], %78 {strides = array<i32>} : memref<32x32xf32, #tpu.memory_space<vmem>>, vector<1x32xf32>,
    %c0_76 = arith.constant 0 : index
    %c340 = arith.constant 340 : index
    %80 = vector.load %arg8[%c0_76, %c340] : memref<1x1086xf32, #tpu.memory_space<vmem>>, vector<1x32xf32>
    %c10_77 = arith.constant 10 : index
    %c0_78 = arith.constant 0 : index
    %81 = vector.load %arg9[%c10_77, %c0_78] : memref<32x32xf32, #tpu.memory_space<vmem>>, vector<1x32xf32>
    tpu.vector_store %arg9[%c10_77, %c0_78], %80 {strides = array<i32>} : memref<32x32xf32, #tpu.memory_space<vmem>>, vector<1x32xf32>,
    %c0_79 = arith.constant 0 : index
    %c374 = arith.constant 374 : index
    %82 = vector.load %arg8[%c0_79, %c374] : memref<1x1086xf32, #tpu.memory_space<vmem>>, vector<1x32xf32>
    %c11_80 = arith.constant 11 : index
    %c0_81 = arith.constant 0 : index
    %83 = vector.load %arg9[%c11_80, %c0_81] : memref<32x32xf32, #tpu.memory_space<vmem>>, vector<1x32xf32>
    tpu.vector_store %arg9[%c11_80, %c0_81], %82 {strides = array<i32>} : memref<32x32xf32, #tpu.memory_space<vmem>>, vector<1x32xf32>,
    %c0_82 = arith.constant 0 : index
    %c408 = arith.constant 408 : index
    %84 = vector.load %arg8[%c0_82, %c408] : memref<1x1086xf32, #tpu.memory_space<vmem>>, vector<1x32xf32>
    %c12_83 = arith.constant 12 : index
    %c0_84 = arith.constant 0 : index
    %85 = vector.load %arg9[%c12_83, %c0_84] : memref<32x32xf32, #tpu.memory_space<vmem>>, vector<1x32xf32>
    tpu.vector_store %arg9[%c12_83, %c0_84], %84 {strides = array<i32>} : memref<32x32xf32, #tpu.memory_space<vmem>>, vector<1x32xf32>,
    %c0_85 = arith.constant 0 : index
    %c442 = arith.constant 442 : index
    %86 = vector.load %arg8[%c0_85, %c442] : memref<1x1086xf32, #tpu.memory_space<vmem>>, vector<1x32xf32>
    %c13 = arith.constant 13 : index
    %c0_86 = arith.constant 0 : index
    %87 = vector.load %arg9[%c13, %c0_86] : memref<32x32xf32, #tpu.memory_space<vmem>>, vector<1x32xf32>
    tpu.vector_store %arg9[%c13, %c0_86], %86 {strides = array<i32>} : memref<32x32xf32, #tpu.memory_space<vmem>>, vector<1x32xf32>,
    %c0_87 = arith.constant 0 : index
    %c476 = arith.constant 476 : index
    %88 = vector.load %arg8[%c0_87, %c476] : memref<1x1086xf32, #tpu.memory_space<vmem>>, vector<1x32xf32>
    %c14 = arith.constant 14 : index
    %c0_88 = arith.constant 0 : index
    %89 = vector.load %arg9[%c14, %c0_88] : memref<32x32xf32, #tpu.memory_space<vmem>>, vector<1x32xf32>
    tpu.vector_store %arg9[%c14, %c0_88], %88 {strides = array<i32>} : memref<32x32xf32, #tpu.memory_space<vmem>>, vector<1x32xf32>,
    %c0_89 = arith.constant 0 : index
    %c510 = arith.constant 510 : index
    %90 = vector.load %arg8[%c0_89, %c510] : memref<1x1086xf32, #tpu.memory_space<vmem>>, vector<1x32xf32>
    %c15_90 = arith.constant 15 : index
    %c0_91 = arith.constant 0 : index
    %91 = vector.load %arg9[%c15_90, %c0_91] : memref<32x32xf32, #tpu.memory_space<vmem>>, vector<1x32xf32>
    tpu.vector_store %arg9[%c15_90, %c0_91], %90 {strides = array<i32>} : memref<32x32xf32, #tpu.memory_space<vmem>>, vector<1x32xf32>,
    %c0_92 = arith.constant 0 : index
    %c544 = arith.constant 544 : index
    %92 = vector.load %arg8[%c0_92, %c544] : memref<1x1086xf32, #tpu.memory_space<vmem>>, vector<1x32xf32>
    %c16 = arith.constant 16 : index
    %c0_93 = arith.constant 0 : index
    %93 = vector.load %arg9[%c16, %c0_93] : memref<32x32xf32, #tpu.memory_space<vmem>>, vector<1x32xf32>
    tpu.vector_store %arg9[%c16, %c0_93], %92 {strides = array<i32>} : memref<32x32xf32, #tpu.memory_space<vmem>>, vector<1x32xf32>,
    %c0_94 = arith.constant 0 : index
    %c578 = arith.constant 578 : index
    %94 = vector.load %arg8[%c0_94, %c578] : memref<1x1086xf32, #tpu.memory_space<vmem>>, vector<1x32xf32>
    %c17 = arith.constant 17 : index
    %c0_95 = arith.constant 0 : index
    %95 = vector.load %arg9[%c17, %c0_95] : memref<32x32xf32, #tpu.memory_space<vmem>>, vector<1x32xf32>
    tpu.vector_store %arg9[%c17, %c0_95], %94 {strides = array<i32>} : memref<32x32xf32, #tpu.memory_space<vmem>>, vector<1x32xf32>,
    %c0_96 = arith.constant 0 : index
    %c612 = arith.constant 612 : index
    %96 = vector.load %arg8[%c0_96, %c612] : memref<1x1086xf32, #tpu.memory_space<vmem>>, vector<1x32xf32>
    %c18_97 = arith.constant 18 : index
    %c0_98 = arith.constant 0 : index
    %97 = vector.load %arg9[%c18_97, %c0_98] : memref<32x32xf32, #tpu.memory_space<vmem>>, vector<1x32xf32>
    tpu.vector_store %arg9[%c18_97, %c0_98], %96 {strides = array<i32>} : memref<32x32xf32, #tpu.memory_space<vmem>>, vector<1x32xf32>,
    %c0_99 = arith.constant 0 : index
    %c646 = arith.constant 646 : index
    %98 = vector.load %arg8[%c0_99, %c646] : memref<1x1086xf32, #tpu.memory_space<vmem>>, vector<1x32xf32>
    %c19 = arith.constant 19 : index
    %c0_100 = arith.constant 0 : index
    %99 = vector.load %arg9[%c19, %c0_100] : memref<32x32xf32, #tpu.memory_space<vmem>>, vector<1x32xf32>
    tpu.vector_store %arg9[%c19, %c0_100], %98 {strides = array<i32>} : memref<32x32xf32, #tpu.memory_space<vmem>>, vector<1x32xf32>,
    %c0_101 = arith.constant 0 : index
    %c680 = arith.constant 680 : index
    %100 = vector.load %arg8[%c0_101, %c680] : memref<1x1086xf32, #tpu.memory_space<vmem>>, vector<1x32xf32>
    %c20 = arith.constant 20 : index
    %c0_102 = arith.constant 0 : index
    %101 = vector.load %arg9[%c20, %c0_102] : memref<32x32xf32, #tpu.memory_space<vmem>>, vector<1x32xf32>
    tpu.vector_store %arg9[%c20, %c0_102], %100 {strides = array<i32>} : memref<32x32xf32, #tpu.memory_space<vmem>>, vector<1x32xf32>,
    %c0_103 = arith.constant 0 : index
    %c714 = arith.constant 714 : index
    %102 = vector.load %arg8[%c0_103, %c714] : memref<1x1086xf32, #tpu.memory_space<vmem>>, vector<1x32xf32>
    %c21_104 = arith.constant 21 : index
    %c0_105 = arith.constant 0 : index
    %103 = vector.load %arg9[%c21_104, %c0_105] : memref<32x32xf32, #tpu.memory_space<vmem>>, vector<1x32xf32>
    tpu.vector_store %arg9[%c21_104, %c0_105], %102 {strides = array<i32>} : memref<32x32xf32, #tpu.memory_space<vmem>>, vector<1x32xf32>,
    %c0_106 = arith.constant 0 : index
    %c748 = arith.constant 748 : index
    %104 = vector.load %arg8[%c0_106, %c748] : memref<1x1086xf32, #tpu.memory_space<vmem>>, vector<1x32xf32>
    %c22 = arith.constant 22 : index
    %c0_107 = arith.constant 0 : index
    %105 = vector.load %arg9[%c22, %c0_107] : memref<32x32xf32, #tpu.memory_space<vmem>>, vector<1x32xf32>
    tpu.vector_store %arg9[%c22, %c0_107], %104 {strides = array<i32>} : memref<32x32xf32, #tpu.memory_space<vmem>>, vector<1x32xf32>,
    %c0_108 = arith.constant 0 : index
    %c782 = arith.constant 782 : index
    %106 = vector.load %arg8[%c0_108, %c782] : memref<1x1086xf32, #tpu.memory_space<vmem>>, vector<1x32xf32>
    %c23 = arith.constant 23 : index
    %c0_109 = arith.constant 0 : index
    %107 = vector.load %arg9[%c23, %c0_109] : memref<32x32xf32, #tpu.memory_space<vmem>>, vector<1x32xf32>
    tpu.vector_store %arg9[%c23, %c0_109], %106 {strides = array<i32>} : memref<32x32xf32, #tpu.memory_space<vmem>>, vector<1x32xf32>,
    %c0_110 = arith.constant 0 : index
    %c816 = arith.constant 816 : index
    %108 = vector.load %arg8[%c0_110, %c816] : memref<1x1086xf32, #tpu.memory_space<vmem>>, vector<1x32xf32>
    %c24_111 = arith.constant 24 : index
    %c0_112 = arith.constant 0 : index
    %109 = vector.load %arg9[%c24_111, %c0_112] : memref<32x32xf32, #tpu.memory_space<vmem>>, vector<1x32xf32>
    tpu.vector_store %arg9[%c24_111, %c0_112], %108 {strides = array<i32>} : memref<32x32xf32, #tpu.memory_space<vmem>>, vector<1x32xf32>,
    %c0_113 = arith.constant 0 : index
    %c850 = arith.constant 850 : index
    %110 = vector.load %arg8[%c0_113, %c850] : memref<1x1086xf32, #tpu.memory_space<vmem>>, vector<1x32xf32>
    %c25 = arith.constant 25 : index
    %c0_114 = arith.constant 0 : index
    %111 = vector.load %arg9[%c25, %c0_114] : memref<32x32xf32, #tpu.memory_space<vmem>>, vector<1x32xf32>
    tpu.vector_store %arg9[%c25, %c0_114], %110 {strides = array<i32>} : memref<32x32xf32, #tpu.memory_space<vmem>>, vector<1x32xf32>,
    %c0_115 = arith.constant 0 : index
    %c884 = arith.constant 884 : index
    %112 = vector.load %arg8[%c0_115, %c884] : memref<1x1086xf32, #tpu.memory_space<vmem>>, vector<1x32xf32>
    %c26 = arith.constant 26 : index
    %c0_116 = arith.constant 0 : index
    %113 = vector.load %arg9[%c26, %c0_116] : memref<32x32xf32, #tpu.memory_space<vmem>>, vector<1x32xf32>
    tpu.vector_store %arg9[%c26, %c0_116], %112 {strides = array<i32>} : memref<32x32xf32, #tpu.memory_space<vmem>>, vector<1x32xf32>,
    %c0_117 = arith.constant 0 : index
    %c918 = arith.constant 918 : index
    %114 = vector.load %arg8[%c0_117, %c918] : memref<1x1086xf32, #tpu.memory_space<vmem>>, vector<1x32xf32>
    %c27 = arith.constant 27 : index
    %c0_118 = arith.constant 0 : index
    %115 = vector.load %arg9[%c27, %c0_118] : memref<32x32xf32, #tpu.memory_space<vmem>>, vector<1x32xf32>
    tpu.vector_store %arg9[%c27, %c0_118], %114 {strides = array<i32>} : memref<32x32xf32, #tpu.memory_space<vmem>>, vector<1x32xf32>,
    %c0_119 = arith.constant 0 : index
    %c952 = arith.constant 952 : index
    %116 = vector.load %arg8[%c0_119, %c952] : memref<1x1086xf32, #tpu.memory_space<vmem>>, vector<1x32xf32>
    %c28 = arith.constant 28 : index
    %c0_120 = arith.constant 0 : index
    %117 = vector.load %arg9[%c28, %c0_120] : memref<32x32xf32, #tpu.memory_space<vmem>>, vector<1x32xf32>
    tpu.vector_store %arg9[%c28, %c0_120], %116 {strides = array<i32>} : memref<32x32xf32, #tpu.memory_space<vmem>>, vector<1x32xf32>,
    %c0_121 = arith.constant 0 : index
    %c986 = arith.constant 986 : index
    %118 = vector.load %arg8[%c0_121, %c986] : memref<1x1086xf32, #tpu.memory_space<vmem>>, vector<1x32xf32>
    %c29 = arith.constant 29 : index
    %c0_122 = arith.constant 0 : index
    %119 = vector.load %arg9[%c29, %c0_122] : memref<32x32xf32, #tpu.memory_space<vmem>>, vector<1x32xf32>
    tpu.vector_store %arg9[%c29, %c0_122], %118 {strides = array<i32>} : memref<32x32xf32, #tpu.memory_space<vmem>>, vector<1x32xf32>,
    %c0_123 = arith.constant 0 : index
    %c1020 = arith.constant 1020 : index
    %120 = vector.load %arg8[%c0_123, %c1020] : memref<1x1086xf32, #tpu.memory_space<vmem>>, vector<1x32xf32>
    %c30 = arith.constant 30 : index
    %c0_124 = arith.constant 0 : index
    %121 = vector.load %arg9[%c30, %c0_124] : memref<32x32xf32, #tpu.memory_space<vmem>>, vector<1x32xf32>
    tpu.vector_store %arg9[%c30, %c0_124], %120 {strides = array<i32>} : memref<32x32xf32, #tpu.memory_space<vmem>>, vector<1x32xf32>,
    %c0_125 = arith.constant 0 : index
    %c1054 = arith.constant 1054 : index
    %122 = vector.load %arg8[%c0_125, %c1054] : memref<1x1086xf32, #tpu.memory_space<vmem>>, vector<1x32xf32>
    %c31 = arith.constant 31 : index
    %c0_126 = arith.constant 0 : index
    %123 = vector.load %arg9[%c31, %c0_126] : memref<32x32xf32, #tpu.memory_space<vmem>>, vector<1x32xf32>
    tpu.vector_store %arg9[%c31, %c0_126], %122 {strides = array<i32>} : memref<32x32xf32, #tpu.memory_space<vmem>>, vector<1x32xf32>,
    %c0_127 = arith.constant 0 : index
    %c0_128 = arith.constant 0 : index
    %124 = vector.load %arg5[%c0_127, %c0_128] : memref<16x32xf32, #tpu.memory_space<vmem>>, vector<16x32xf32>
    %c0_129 = arith.constant 0 : index
    %c0_130 = arith.constant 0 : index
    %125 = vector.load %arg9[%c0_129, %c0_130] : memref<32x32xf32, #tpu.memory_space<vmem>>, vector<32x32xf32>
    %cst_131 = arith.constant dense<0.000000e+00> : vector<16x32xf32>
    %126 = tpu.matmul %124, %125, %cst_131 {dimension_numbers = #tpu.dot_dimension_numbers<[1], [0], [0], [1], [0, 0, 1, 1], [], []>} : vector<16x32xf32>, vector<32x32xf32>, vector<16x32xf32> -> vector<16x32xf32>
    %c0_132 = arith.constant 0 : index
    %c0_133 = arith.constant 0 : index
    %127 = vector.load %arg6[%c0_132, %c0_133] : memref<32x16xf32, #tpu.memory_space<vmem>>, vector<32x16xf32>
    %cst_134 = arith.constant dense<0.000000e+00> : vector<16x16xf32>
    %128 = tpu.matmul %126, %127, %cst_134 {dimension_numbers = #tpu.dot_dimension_numbers<[1], [0], [0], [1], [0, 0, 1, 1], [], []>} : vector<16x32xf32>, vector<32x16xf32>, vector<16x16xf32> -> vector<16x16xf32>
    %c0_135 = arith.constant 0 : index
    %c0_136 = arith.constant 0 : index
    %129 = vector.load %arg7[%c0_135, %c0_136] : memref<16x16xf32, #tpu.memory_space<vmem>>, vector<16x16xf32>
    tpu.vector_store %arg7[%c0_135, %c0_136], %128 {strides = array<i32>} : memref<16x16xf32, #tpu.memory_space<vmem>>, vector<16x16xf32>,
    return
  }
}

</mosaic_0001>

<bundles_post_ra>
// kernel: exporter_forward.1
= control target key start
LH: loop header
LB: loop body
LE: loop exit
PB: predicated region body
PF: predicated region fallthrough
CT: control target
= control target key end

     0   :  { %s4985_s28 = smov 125   ;;  %s4986_s16 = smov 127   ;;  %vm87_vm0 = vcmask 1039360   ;;  %vm105_vm1 = vcmask 1042432   ;;  %vm96_vm2 = vcmask 23552   ;;  %vm750_vm3 = vcmask 1031168   ;;  %s7432_s1 = inlined_call_operand.vmem [shape: f32[32,27], index: 1, kind: input, shape index: {}]   ;;  %s7433_s0 = inlined_call_operand.vmem [shape: f32[3,1156], index: 0, kind: input, shape index: {}]   ;;  %s7434_s2 = inlined_call_operand.vmem [shape: f32[32,1], index: 2, kind: input, shape index: {}]   ;;  %s7435_s4 = inlined_call_operand.vmem [shape: f32[19,1], index: 4, kind: input, shape index: {}]   ;;  %s7436_s3 = inlined_call_operand.vmem [shape: f32[19,32], index: 3, kind: input, shape index: {}]   ;;  %s7437_s6 = inlined_call_operand.vmem [shape: f32[32,16], index: 6, kind: input, shape index: {}]   ;;  %s7438_s5 = inlined_call_operand.vmem [shape: f32[16,32], index: 5, kind: input, shape index: {}]   ;;  %s7439_s7 = inlined_call_operand.vmem [shape: f32[16,16], index: 7, kind: output, shape index: {}]  }
   0x1   :  { %v5073_v0 = vld [vmem:[%s7432_s1] sm:$0xff]  ;;  %v31_v2 = vld [vmem:[%s7433_s0 + $0x8] sm:$0x77]  ;;  %v32_v3 = vld [vmem:[%s7433_s0 + $0x10] sm:$0x77]  ;;  %s4988_s30 = smov 122  }
   0x2   :  { %v30_v1 = vld [vmem:[%s7433_s0] sm:$0x77]  ;;  %39 = vrot.lane.b32.xlu1 %v5073_v0, %s4985_s28  ;;  %54 = vst [vmem:[#allocation1 + $0x10] ss:$2 sm:$0xff] %v31_v2  ;;  %v33_v4 = vld [vmem:[%s7433_s0 + $0x18] sm:$0x77] }
   0x3   :  { %52 = vst [vmem:[#allocation1] ss:$2 sm:$0xff] %v30_v1  ;;  %v5092_v5 = vld [vmem:[%s7432_s1 + $0x8] sm:$0xff]  ;;  %v34_v7 = vld [vmem:[%s7433_s0 + $0x20] sm:$0x7]  ;;  %v5107_v16 = vld [vmem:[%s7432_s1 + $0x10] sm:$0xff] }
   0x4   :  { %56 = vst [vmem:[#allocation1 + $0x20] ss:$2 sm:$0xff] %v32_v3  ;;  %v694_v15 = vld [vmem:[%s7433_s0 + $0x8] sm:$0x77]  ;;  %v695_v17 = vld [vmem:[%s7433_s0 + $0x10] sm:$0x77] }
   0x5   :  { %58 = vst [vmem:[#allocation1 + $0x30] ss:$2 sm:$0xff] %v33_v4  ;;  %v696_v20 = vld [vmem:[%s7433_s0 + $0x18] sm:$0x77]  ;;  %v693_v30 = vld [vmem:[%s7433_s0] sm:$0x77] }
   0x6   :  { %v5132_v25 = vld [vmem:[%s7432_s1 + $0x18] sm:$0xff]  ;;  %v1087_v47 = vld [vmem:[%s7433_s0 + $0x8] sm:$0x77]  ;;  %v1088_v58 = vld [vmem:[%s7433_s0 + $0x10] sm:$0x77]  ;;  %s4989_s18 = smov 94  }
   0x7   :  { %v697_v61 = vld [vmem:[%s7433_s0 + $0x20] sm:$0x7]  ;;  %v1089_v63 = vld [vmem:[%s7433_s0 + $0x18] sm:$0x77]  ;;  %s4990_s19 = smov 119   ;;  %s4991_s8 = smov 93  }
   0x8   :  { %s4992_s9 = smov 116   ;;  %vm1143_vm4 = vcmask 769024   ;;  %s4993_s12 = smov 113   ;;  %vm1536_vm5 = vcmask 760832   ;;  %vm1929_vm6 = vcmask 752640   ;;  %vm2325_vm7 = vcmask 490496  }
   0x9   :  { %v62_v8 = vld.sshfl [vmem:[#allocation1 + $0x18] sm:$0xff pattern:$0x75316420]  ;;  %v61_v9 = vld.sshfl [vmem:[#allocation1 + $0x10] sm:$0xff pattern:$0x75316420] }
   0xa   :  { %v59_v6 = vld.sshfl [vmem:[#allocation1] sm:$0xff pattern:$0x75316420]  ;;  %41 = vrot.lane.b32.xlu1 %v5092_v5, %s4985_s28  ;;  %v60_v10 = vld.sshfl [vmem:[#allocation1 + $0x8] sm:$0xff pattern:$0x75316420]  ;;  %73 = vrot.lane.b32.xlu2 %v61_v9, %s4986_s16 }
   0xb   :  { %69 = vrot.lane.b32.xlu0 %v59_v6, %s4986_s16  ;;  %387 = vst [vmem:[#allocation1 + $0x10] ss:$2 sm:$0xff] %v31_v2  ;;  %v64_v11 = vld.sshfl [vmem:[#allocation1 + $0x28] sm:$0xff pattern:$0x75316420]  ;;  %s4994_s17 = smov 92  }
   0xc   :  { %v63_v12 = vld.sshfl [vmem:[#allocation1 + $0x20] sm:$0xff pattern:$0x75316420]  ;;  %v65_v13 = vld.sshfl [vmem:[#allocation1 + $0x30] sm:$0xff pattern:$0x75316420] }
   0xd   :  { %389 = vst [vmem:[#allocation1 + $0x20] ss:$2 sm:$0xff] %v32_v3  ;;  %v66_v14 = vld.sshfl [vmem:[#allocation1 + $0x38] sm:$0xff pattern:$0x75316420]  ;;  %s4997_s25 = smov 107  }
   0xe   :  { %67 = vst [vmem:[#allocation1] ss:$2 sm:$0xff] %v34_v7  ;;  %v1086_v2 = vld [vmem:[%s7433_s0] sm:$0x77]  ;;  %s4998_s26 = smov 59   ;;  %s5000_s20 = smov 104  }
   0xf   :  { %391 = vst [vmem:[#allocation1 + $0x30] ss:$2 sm:$0xff] %v33_v4  ;;  %v1090_v4 = vld [vmem:[%s7433_s0 + $0x20] sm:$0x7]  ;;  %vm2722_vm8 = vcmask 482304   ;;  %vm3119_vm9 = vcmask 474112  }
  0x10   :  { %vm3569_vm10 = vcmask 261120   ;;  %vm3866_vm11 = vcmask 1041408   ;;  %vm3959_vm12 = vcmask 1047555   ;;  %vm4057_vm13 = vcmask 1040384   ;;  %s5004_s23 = smov 46   ;;  %s5005_s24 = smov 12  }
  0x11   :  { %vm3821_vm14 = vcmask 506880   ;;  %vm4059_vm15 = vcmask 1042434   ;;  %s5009_s27 = smov 88   ;;  %s5010_s29 = smov 20  }
  0x12   :  { %75 = vrot.lane.b32.xlu1 %v62_v8, %s4986_s16  ;;  %v5114_v18 = vld.sshfl [vmem:[#allocation1 + $0x10] sm:$0xff pattern:$0x75316420]  ;;  %v5116_v19 = vld.sshfl [vmem:[#allocation1 + $0x18] sm:$0xff pattern:$0x75316420]  ;;  %43 = vrot.lane.b32.xlu2 %v5107_v16, %s4985_s28 }
  0x13   :  { %71 = vrot.lane.b32.xlu0 %v60_v10, %s4986_s16  ;;  %717 = vst [vmem:[#allocation1 + $0x10] ss:$2 sm:$0xff] %v694_v15  ;;  %s5013_s10 = smov 28   ;;  %s5014_s11 = smov 78  }
  0x14   :  { %v5123_v21 = vld.sshfl [vmem:[#allocation1 + $0x20] sm:$0xff pattern:$0x75316420]  ;;  %v5125_v22 = vld.sshfl [vmem:[#allocation1 + $0x28] sm:$0xff pattern:$0x75316420] }
  0x15   :  { %719 = vst [vmem:[#allocation1 + $0x20] ss:$2 sm:$0xff] %v695_v17  ;;  %v68_v23 = vld.sshfl [vmem:[#allocation1] sm:$0xff pattern:$0x75316420]  ;;  %s5016_s13 = smov 62  }
  0x16   :  { %385 = vst [vmem:[#allocation1] ss:$2 sm:$0xff] %v30_v1  ;;  %v5127_v24 = vld.sshfl [vmem:[#allocation1 + $0x30] sm:$0xff pattern:$0x75316420]  ;;  %s5018_s14 = smov 112  }
  0x17   :  { %v5134_v26 = vld.sshfl [vmem:[#allocation1 + $0x38] sm:$0xff pattern:$0x75316420]  ;;  %s5020_s15 = smov 18   ;;  %s5025_s21 = smov 98  }
  0x18   :  { %721 = vst [vmem:[#allocation1 + $0x30] ss:$2 sm:$0xff] %v696_v20  ;;  %s5028_s22 = smov 52  }
  0x1a   :  { %81 = vrot.lane.b32.xlu1 %v65_v13, %s4986_s16  ;;  %77 = vrot.lane.b32.xlu2 %v63_v12, %s4986_s16  ;;  %v724_v33 = vld.sshfl [vmem:[#allocation1 + $0x10] sm:$0xff pattern:$0x75316420]  ;;  %v725_v46 = vld.sshfl [vmem:[#allocation1 + $0x18] sm:$0xff pattern:$0x75316420] }
  0x1b   :  { %45 = vrot.lane.b32.xlu0 %v5132_v25, %s4985_s28  ;;  %s4987_s28 = smov 126   ;;  %1110 = vst [vmem:[#allocation1 + $0x10] ss:$2 sm:$0xff] %v1087_v47 }
  0x1c   :  { %v727_v49 = vld.sshfl [vmem:[#allocation1 + $0x28] sm:$0xff pattern:$0x75316420]  ;;  %v726_v57 = vld.sshfl [vmem:[#allocation1 + $0x20] sm:$0xff pattern:$0x75316420] }
  0x1d   :  { %v5143_v27 = vld.sshfl [vmem:[#allocation1] sm:$0xff pattern:$0x75316420]  ;;  %v393_v28 = vld.sshfl [vmem:[#allocation1 + $0x8] sm:$0xff pattern:$0x75316420] }
  0x1e   :  { %400 = vst [vmem:[#allocation1] ss:$2 sm:$0xff] %v34_v7 }
  0x1f   :  { %v729_v53 = vld.sshfl [vmem:[#allocation1 + $0x38] sm:$0xff pattern:$0x75316420]  ;;  %1112 = vst [vmem:[#allocation1 + $0x20] ss:$2 sm:$0xff] %v1088_v58 }
  0x20   :  { %v728_v62 = vld.sshfl [vmem:[#allocation1 + $0x30] sm:$0xff pattern:$0x75316420] }
  0x21   :  { %1114 = vst [vmem:[#allocation1 + $0x30] ss:$2 sm:$0xff] %v1089_v63 }
  0x22   :  { %83 = vrot.lane.b32.xlu2 %v66_v14, %s4986_s16  ;;  %v1117_v8 = vld.sshfl [vmem:[#allocation1 + $0x10] sm:$0xff pattern:$0x75316420]  ;;  %v1118_v10 = vld.sshfl [vmem:[#allocation1 + $0x18] sm:$0xff pattern:$0x75316420] }
  0x23   :  { %79 = vrot.lane.b32.xlu0 %v64_v11, %s4986_s16  ;;  %v1480_v11 = vld [vmem:[%s7433_s0 + $0x8] sm:$0x77] }
  0x24   :  { %1503 = vst [vmem:[#allocation1 + $0x10] ss:$2 sm:$0xff] %v1480_v11 }
  0x25   :  { %v5145_v29 = vld.sshfl [vmem:[#allocation1] sm:$0xff pattern:$0x75316420] }
  0x26   :  { %715 = vst [vmem:[#allocation1] ss:$2 sm:$0xff] %v693_v30  ;;  %v1119_v7 = vld.sshfl [vmem:[#allocation1 + $0x20] sm:$0xff pattern:$0x75316420] }
  0x27   :  { %v1120_v20 = vld.sshfl [vmem:[#allocation1 + $0x28] sm:$0xff pattern:$0x75316420] }
  0x28   :  { %v1121_v9 = vld.sshfl [vmem:[#allocation1 + $0x30] sm:$0xff pattern:$0x75316420] }
  0x2b   :  { %85 = vrot.lane.b32.xlu0 %v68_v23, %s4986_s16  ;;  %v1482_v23 = vld [vmem:[%s7433_s0 + $0x18] sm:$0x77]  ;;  %s4999_s16 = smov 58  }
  0x2d   :  { %v722_v31 = vld.sshfl [vmem:[#allocation1] sm:$0xff pattern:$0x75316420]  ;;  %v723_v38 = vld.sshfl [vmem:[#allocation1 + $0x8] sm:$0xff pattern:$0x75316420] }
  0x2e   :  { %732 = vrot.lane.b32.xlu1 %v722_v31, %s4987_s28  ;;  %734 = vrot.lane.b32.xlu2 %v723_v38, %s4987_s28  ;;  %730 = vst [vmem:[#allocation1] ss:$2 sm:$0xff] %v697_v61  ;;  %v1479_v31 = vld [vmem:[%s7433_s0] sm:$0x77] }
  0x33   :  { %736 = vrot.lane.b32.xlu0 %v724_v33, %s4987_s28 }
  0x35   :  { %v731_v1 = vld.sshfl [vmem:[#allocation1] sm:$0xff pattern:$0x75316420] }
  0x36   :  { %702 = vrot.lane.b32.xlu1 %v5073_v0, %s4988_s30  ;;  %738 = vrot.lane.b32.xlu2 %v725_v46, %s4987_s28  ;;  %1108 = vst [vmem:[#allocation1] ss:$2 sm:$0xff] %v1086_v2 }
  0x3b   :  { %704 = vrot.lane.b32.xlu0 %v5092_v5, %s4988_s30 }
  0x3d   :  { %v1116_v3 = vld.sshfl [vmem:[#allocation1 + $0x8] sm:$0xff pattern:$0x75316420]  ;;  %v1115_v6 = vld.sshfl [vmem:[#allocation1] sm:$0xff pattern:$0x75316420] }
  0x3e   :  { %706 = vrot.lane.b32.xlu1 %v5107_v16, %s4988_s30  ;;  %740 = vrot.lane.b32.xlu2 %v726_v57, %s4987_s28  ;;  %1123 = vst [vmem:[#allocation1] ss:$2 sm:$0xff] %v1090_v4 }
  0x43   :  { %708 = vrot.lane.b32.xlu0 %v5132_v25, %s4988_s30 }
  0x45   :  { %v1124_v30 = vld.sshfl [vmem:[#allocation1] sm:$0xff pattern:$0x75316420] }
  0x46   :  { %742 = vrot.lane.b32.xlu1 %v727_v49, %s4987_s28  ;;  %744 = vrot.lane.b32.xlu2 %v728_v62, %s4987_s28  ;;  %1501 = vst [vmem:[#allocation1] ss:$2 sm:$0xff] %v1479_v31 }
  0x4b   :  { %746 = vrot.lane.b32.xlu0 %v729_v53, %s4987_s28 }
  0x4e   :  { %748 = vrot.lane.b32.xlu1 %v731_v1, %s4987_s28  ;;  %1125 = vrot.lane.b32.xlu2 %v1115_v6, %s4989_s18  ;;  %s5011_s28 = smov 72  }
  0x53   :  { %1127 = vrot.lane.b32.xlu0 %v1116_v3, %s4989_s18 }
  0x56   :  { %1095 = vrot.lane.b32.xlu1 %v5073_v0, %s4990_s19  ;;  %1129 = vrot.lane.b32.xlu2 %v1117_v8, %s4989_s18 }
  0x5b   :  { %1097 = vrot.lane.b32.xlu0 %v5092_v5, %s4990_s19 }
  0x5e   :  { %1099 = vrot.lane.b32.xlu1 %v5107_v16, %s4990_s19  ;;  %1131 = vrot.lane.b32.xlu2 %v1118_v10, %s4989_s18 }
  0x63   :  { %1101 = vrot.lane.b32.xlu0 %v5132_v25, %s4990_s19  ;;  %s5024_s19 = smov 44  }
  0x64   :  { %v74_v32 = vpop.permute.xlu2 %73 }
  0x66   :  { %1133 = vrot.lane.b32.xlu1 %v1119_v7, %s4989_s18  ;;  %1135 = vrot.lane.b32.xlu2 %v1120_v20, %s4989_s18  ;;  %v1483_v7 = vld [vmem:[%s7433_s0 + $0x20] sm:$0x7] }
  0x6b   :  { %1137 = vrot.lane.b32.xlu0 %v1121_v9, %s4989_s18 }
  0x6c   :  { %v5156_v35 = vpop.permute.xlu2 %43 }
  0x6e   :  { %1141 = vrot.lane.b32.xlu2 %v1124_v30, %s4989_s18 }
  0x74   :  { %v5152_v34 = vpop.permute.xlu1 %39  ;;  %v78_v39 = vpop.permute.xlu2 %77 }
  0x76   :  { %1488 = vrot.lane.b32.xlu2 %v5073_v0, %s4992_s9 }
  0x7c   :  { %v5160_v36 = vpop.permute.xlu1 %41  ;;  %v84_v48 = vpop.permute.xlu2 %83 }
  0x7d   :  { %v70_v37 = vpop.permute.xlu0 %69 }
  0x7e   :  { %1492 = vrot.lane.b32.xlu2 %v5107_v16, %s4992_s9 }
  0x84   :  { %v76_v40 = vpop.permute.xlu1 %75 }
  0x85   :  { %v72_v41 = vpop.permute.xlu0 %71  ;;  %v90_v44 = vsel %vm87_vm0, %v74_v32, %v76_v40  ;;  %v91_v45 = vsel %vm87_vm0, %v76_v40, %v78_v39 }
  0x86   :  { %v88_v42 = vsel %vm87_vm0, %v70_v37, %v72_v41  ;;  %v89_v43 = vsel %vm87_vm0, %v72_v41, %v74_v32  ;;  %4453 = vmatpush.msk.msra.mxu2 %vm105_vm1, %v90_v44  ;;  %4458 = vmatpush.msk.msra.mxu3 %vm105_vm1, %v91_v45  ;;  %v1510_v41 = vld.sshfl [vmem:[#allocation1 + $0x10] sm:$0xff pattern:$0x75316420] }
  0x87   :  { %4443 = vmatpush.msk.msra.mxu0 %vm105_vm1, %v88_v42  ;;  %4448 = vmatpush.msk.msra.mxu1 %vm105_vm1, %v89_v43 }
  0x88   :  { %4444 = vmatmul.msk.f32.vlgmr.msra.gmra.mxu0 %vm96_vm2, %v5152_v34  ;;  %4449 = vmatmul.msk.f32.vlgmr.msra.gmra.mxu1 %vm96_vm2, %v5152_v34  ;;  %v735_v13 = vpop.permute.xlu2 %734 }
  0x89   :  { %4454 = vmatmul.msk.f32.vlgmr.msra.gmra.mxu2 %vm96_vm2, %v5152_v34  ;;  %4459 = vmatmul.msk.f32.vlgmr.msra.gmra.mxu3 %vm96_vm2, %v5152_v34 }
  0x8c   :  { %v82_v51 = vpop.permute.xlu1 %81 }
  0x8d   :  { %v5188_v50 = vpop.permute.xlu0 %45  ;;  %v94_v52 = vsel %vm87_vm0, %v82_v51, %v84_v48 }
  0x8e   :  { %4473 = vmatpush.msk.msrb.mxu2 %vm105_vm1, %v94_v52 }
  0x90   :  { %4493 = vmatpush.msk.msra.mxu2 %vm105_vm1, %v393_v28  ;;  %4445 = vmatmul.msk.f32.gmra.mxu0 %vm96_vm2, %v5160_v36 }
  0x91   :  { %4450 = vmatmul.msk.f32.gmra.mxu1 %vm96_vm2, %v5160_v36  ;;  %4455 = vmatmul.msk.f32.gmra.mxu2 %vm96_vm2, %v5160_v36 }
  0x92   :  { %4460 = vmatmul.msk.f32.gmra.mxu3 %vm96_vm2, %v5160_v36 }
  0x95   :  { %v80_v54 = vpop.permute.xlu0 %79 }
  0x96   :  { %v92_v55 = vsel %vm87_vm0, %v78_v39, %v80_v54  ;;  %v93_v56 = vsel %vm87_vm0, %v80_v54, %v82_v51 }
  0x97   :  { %4463 = vmatpush.msk.msrb.mxu0 %vm105_vm1, %v92_v55  ;;  %4468 = vmatpush.msk.msrb.mxu1 %vm105_vm1, %v93_v56 }
  0x98   :  { %4446 = vmatmul.msk.f32.gmra.mxu0 %vm96_vm2, %v5156_v35 }
  0x99   :  { %4488 = vmatpush.msk.msra.mxu1 %vm105_vm1, %v5143_v27  ;;  %4456 = vmatmul.msk.f32.gmra.mxu2 %vm96_vm2, %v5156_v35 }
  0x9a   :  { %4451 = vmatmul.msk.f32.gmra.mxu1 %vm96_vm2, %v5156_v35  ;;  %4461 = vmatmul.msk.f32.gmra.mxu3 %vm96_vm2, %v5156_v35 }
  0x9d   :  { %v86_v59 = vpop.permute.xlu0 %85 }
  0x9e   :  { %v95_v60 = vsel %vm87_vm0, %v84_v48, %v86_v59  ;;  %4483 = vmatpush.msk.msra.mxu0 %vm105_vm1, %v86_v59  ;;  %v1511_v48 = vld.sshfl [vmem:[#allocation1 + $0x18] sm:$0xff pattern:$0x75316420]  ;;  %vm4062_vm0 = vcmask 1044484  }
  0x9f   :  { %4478 = vmatpush.msk.msrb.mxu3 %vm105_vm1, %v95_v60 }
  0xa0   :  { %4447 = vmatmul.msk.f32.gmra.mxu0 %vm96_vm2, %v5188_v50  ;;  %v733_v12 = vpop.permute.xlu1 %732 }
  0xa1   :  { %4498 = vmatpush.msk.msra.mxu3 %vm105_vm1, %v5114_v18  ;;  %4457 = vmatmul.msk.f32.gmra.mxu2 %vm96_vm2, %v5188_v50  ;;  %v751_v14 = vsel %vm750_vm3, %v733_v12, %v735_v13  ;;  %v739_v18 = vpop.permute.xlu2 %738 }
  0xa2   :  { %4452 = vmatmul.msk.f32.gmra.mxu1 %vm96_vm2, %v5188_v50  ;;  %4462 = vmatmul.msk.f32.gmra.mxu3 %vm96_vm2, %v5188_v50 }
  0xa5   :  { %v737_v15 = vpop.permute.xlu0 %736 }
  0xa6   :  { %v752_v17 = vsel %vm750_vm3, %v735_v13, %v737_v15 }
  0xa8   :  { %4464 = vmatmul.msk.f32.vlgmr.msrb.gmra.mxu0 %vm96_vm2, %v5152_v34 }
  0xa9   :  { %4474 = vmatmul.msk.f32.vlgmr.msrb.gmra.mxu2 %vm96_vm2, %v5152_v34  ;;  %4503 = vmatpush.msk.msrb.mxu0 %vm105_vm1, %v5116_v19  ;;  %v753_v19 = vsel %vm750_vm3, %v737_v15, %v739_v18  ;;  %v741_v28 = vpop.permute.xlu2 %740 }
  0xaa   :  { %4469 = vmatmul.msk.f32.vlgmr.msrb.gmra.mxu1 %vm96_vm2, %v5152_v34  ;;  %4479 = vmatmul.msk.f32.vlgmr.msrb.gmra.mxu3 %vm96_vm2, %v5152_v34 }
  0xab   :  { %4508 = vmatpush.msk.msrb.mxu1 %vm105_vm1, %v5123_v21  ;;  %4513 = vmatpush.msk.msrb.mxu2 %vm105_vm1, %v5125_v22  ;;  %v1481_v21 = vld [vmem:[%s7433_s0 + $0x10] sm:$0x77]  ;;  %v1122_v22 = vld.sshfl [vmem:[#allocation1 + $0x38] sm:$0xff pattern:$0x75316420] }
  0xac   :  { %4518 = vmatpush.msk.msrb.mxu3 %vm105_vm1, %v5127_v24  ;;  %1505 = vst [vmem:[#allocation1 + $0x20] ss:$2 sm:$0xff] %v1481_v21  ;;  %1139 = vrot.lane.b32.xlu1 %v1122_v22, %s4989_s18  ;;  %v5366_v24 = vpop.permute.xlu1 %702 }
  0xad   :  { %1507 = vst [vmem:[#allocation1 + $0x30] ss:$2 sm:$0xff] %v1482_v23 }
  0xb0   :  { %4465 = vmatmul.msk.f32.gmra.mxu0 %vm96_vm2, %v5160_v36 }
  0xb1   :  { %4475 = vmatmul.msk.f32.gmra.mxu2 %vm96_vm2, %v5160_v36  ;;  %v745_v39 = vpop.permute.xlu2 %744 }
  0xb2   :  { %4470 = vmatmul.msk.f32.gmra.mxu1 %vm96_vm2, %v5160_v36  ;;  %4480 = vmatmul.msk.f32.gmra.mxu3 %vm96_vm2, %v5160_v36 }
  0xb3   :  { %v1513_v53 = vld.sshfl [vmem:[#allocation1 + $0x28] sm:$0xff pattern:$0x75316420]  ;;  %v1512_v6 = vld.sshfl [vmem:[#allocation1 + $0x20] sm:$0xff pattern:$0x75316420] }
  0xb4   :  { %v5378_v27 = vpop.permute.xlu1 %706  ;;  %1526 = vrot.lane.b32.xlu2 %v1512_v6, %s4991_s8  ;;  %v1514_v12 = vld.sshfl [vmem:[#allocation1 + $0x30] sm:$0xff pattern:$0x75316420] }
  0xb8   :  { %4466 = vmatmul.msk.f32.gmra.mxu0 %vm96_vm2, %v5156_v35 }
  0xb9   :  { %4476 = vmatmul.msk.f32.gmra.mxu2 %vm96_vm2, %v5156_v35  ;;  %v1126_v59 = vpop.permute.xlu2 %1125 }
  0xba   :  { %4471 = vmatmul.msk.f32.gmra.mxu1 %vm96_vm2, %v5156_v35  ;;  %4481 = vmatmul.msk.f32.gmra.mxu3 %vm96_vm2, %v5156_v35 }
  0xbc   :  { %v743_v33 = vpop.permute.xlu1 %742 }
  0xbd   :  { %v756_v40 = vsel %vm750_vm3, %v743_v33, %v745_v39 }
  0xc0   :  { %4467 = vmatmul.msk.f32.gmra.mxu0 %vm96_vm2, %v5188_v50 }
  0xc1   :  { %4477 = vmatmul.msk.f32.gmra.mxu2 %vm96_vm2, %v5188_v50  ;;  %v1130_v3 = vpop.permute.xlu2 %1129 }
  0xc2   :  { %4472 = vmatmul.msk.f32.gmra.mxu1 %vm96_vm2, %v5188_v50  ;;  %4482 = vmatmul.msk.f32.gmra.mxu3 %vm96_vm2, %v5188_v50 }
  0xc4   :  { %v749_v58 = vpop.permute.xlu1 %748 }
  0xc8   :  { %4484 = vmatmul.msk.f32.vlgmr.msra.gmra.mxu0 %vm96_vm2, %v5152_v34  ;;  %v755_v34 = vsel %vm750_vm3, %v741_v28, %v743_v33 }
  0xc9   :  { %4494 = vmatmul.msk.f32.vlgmr.msra.gmra.mxu2 %vm96_vm2, %v5073_v0  ;;  %4523 = vmatpush.msk.msra.mxu0 %vm105_vm1, %v5134_v26  ;;  %v5372_v26 = vpop.permute.xlu0 %704  ;;  %v1132_v22 = vpop.permute.xlu2 %1131 }
  0xca   :  { %4489 = vmatmul.msk.f32.vlgmr.msra.gmra.mxu1 %vm96_vm2, %v5073_v0  ;;  %4499 = vmatmul.msk.f32.vlgmr.msra.gmra.mxu3 %vm96_vm2, %v5073_v0  ;;  %v1146_v23 = vsel %vm1143_vm4, %v1130_v3, %v1132_v22 }
  0xcb   :  { %4528 = vmatpush.msk.msra.mxu1 %vm105_vm1, %v5145_v29  ;;  %4533 = vmatpush.msk.msra.mxu2 %vm105_vm1, %v751_v14  ;;  %v754_v29 = vsel %vm750_vm3, %v739_v18, %v741_v28 }
  0xcc   :  { %4538 = vmatpush.msk.msra.mxu3 %vm105_vm1, %v752_v17  ;;  %v5515_v13 = vpop.permute.xlu1 %1095 }
  0xd0   :  { %4485 = vmatmul.msk.f32.gmra.mxu0 %vm96_vm2, %v5160_v36  ;;  %v1508_v36 = vld.sshfl [vmem:[#allocation1] sm:$0xff pattern:$0x75316420] }
  0xd1   :  { %4495 = vmatmul.msk.f32.gmra.mxu2 %vm96_vm2, %v5092_v5  ;;  %v5394_v32 = vpop.permute.xlu0 %708  ;;  %1518 = vrot.lane.b32.xlu0 %v1508_v36, %s4991_s8 }
  0xd2   :  { %4490 = vmatmul.msk.f32.gmra.mxu1 %vm96_vm2, %v5092_v5  ;;  %4500 = vmatmul.msk.f32.gmra.mxu3 %vm96_vm2, %v5092_v5 }
  0xd4   :  { %v5536_v21 = vpop.permute.xlu1 %1099 }
  0xd8   :  { %4486 = vmatmul.msk.f32.gmra.mxu0 %vm96_vm2, %v5156_v35  ;;  %v1509_v35 = vld.sshfl [vmem:[#allocation1 + $0x8] sm:$0xff pattern:$0x75316420] }
  0xd9   :  { %4496 = vmatmul.msk.f32.gmra.mxu2 %vm96_vm2, %v5107_v16  ;;  %1520 = vrot.lane.b32.xlu1 %v1509_v35, %s4991_s8  ;;  %v747_v42 = vpop.permute.xlu0 %746  ;;  %1516 = vst [vmem:[#allocation1] ss:$2 sm:$0xff] %v1483_v7 }
  0xda   :  { %4491 = vmatmul.msk.f32.gmra.mxu1 %vm96_vm2, %v5107_v16  ;;  %4501 = vmatmul.msk.f32.gmra.mxu3 %vm96_vm2, %v5107_v16  ;;  %v757_v43 = vsel %vm750_vm3, %v745_v39, %v747_v42 }
  0xdb   :  { %1490 = vrot.lane.b32.xlu0 %v5092_v5, %s4992_s9 }
  0xe0   :  { %4487 = vmatmul.msk.f32.gmra.mxu0 %vm96_vm2, %v5188_v50  ;;  %v1517_v14 = vld.sshfl [vmem:[#allocation1] sm:$0xff pattern:$0x75316420] }
  0xe1   :  { %4497 = vmatmul.msk.f32.gmra.mxu2 %vm96_vm2, %v5132_v25  ;;  %1522 = vrot.lane.b32.xlu1 %v1510_v41, %s4991_s8  ;;  %v1128_v1 = vpop.permute.xlu0 %1127  ;;  %v1872_v41 = vld [vmem:[%s7433_s0] sm:$0x77] }
  0xe2   :  { %4492 = vmatmul.msk.f32.gmra.mxu1 %vm96_vm2, %v5132_v25  ;;  %4502 = vmatmul.msk.f32.gmra.mxu3 %vm96_vm2, %v5132_v25  ;;  %v1144_v2 = vsel %vm1143_vm4, %v1126_v59, %v1128_v1  ;;  %v1145_v4 = vsel %vm1143_vm4, %v1128_v1, %v1130_v3  ;;  %1894 = vst [vmem:[#allocation1] ss:$2 sm:$0xff] %v1872_v41 }
  0xe3   :  { %1494 = vrot.lane.b32.xlu0 %v5132_v25, %s4992_s9  ;;  %s4995_s9 = smov 60  }
  0xe8   :  { %4504 = vmatmul.msk.f32.vlgmr.msrb.gmra.mxu0 %vm96_vm2, %v5073_v0 }
  0xe9   :  { %4514 = vmatmul.msk.f32.vlgmr.msrb.gmra.mxu2 %vm96_vm2, %v5073_v0  ;;  %4543 = vmatpush.msk.msrb.mxu0 %vm105_vm1, %v753_v19  ;;  %v5530_v20 = vpop.permute.xlu0 %1097  ;;  %v1901_v6 = vld.sshfl [vmem:[#allocation1] sm:$0xff pattern:$0x75316420] }
  0xea   :  { %4509 = vmatmul.msk.f32.vlgmr.msrb.gmra.mxu1 %vm96_vm2, %v5073_v0  ;;  %4519 = vmatmul.msk.f32.vlgmr.msrb.gmra.mxu3 %vm96_vm2, %v5073_v0 }
  0xeb   :  { %4548 = vmatpush.msk.msrb.mxu1 %vm105_vm1, %v754_v29  ;;  %4553 = vmatpush.msk.msrb.mxu2 %vm105_vm1, %v755_v34  ;;  %v1134_v34 = vpop.permute.xlu1 %1133 }
  0xec   :  { %4558 = vmatpush.msk.msrb.mxu3 %vm105_vm1, %v756_v40  ;;  %1524 = vrot.lane.b32.xlu1 %v1511_v48, %s4991_s8 }
  0xed   :  { %1528 = vrot.lane.b32.xlu0 %v1513_v53, %s4991_s8 }
  0xf0   :  { %4505 = vmatmul.msk.f32.gmra.mxu0 %vm96_vm2, %v5092_v5 }
  0xf1   :  { %4515 = vmatmul.msk.f32.gmra.mxu2 %vm96_vm2, %v5092_v5  ;;  %v5558_v33 = vpop.permute.xlu0 %1101 }
  0xf2   :  { %4510 = vmatmul.msk.f32.gmra.mxu1 %vm96_vm2, %v5092_v5  ;;  %4520 = vmatmul.msk.f32.gmra.mxu3 %vm96_vm2, %v5092_v5 }
  0xf4   :  { %1530 = vrot.lane.b32.xlu1 %v1514_v12, %s4991_s8 }
  0xf5   :  { %1534 = vrot.lane.b32.xlu0 %v1517_v14, %s4991_s8 }
  0xf8   :  { %4506 = vmatmul.msk.f32.gmra.mxu0 %vm96_vm2, %v5107_v16 }
  0xf9   :  { %4516 = vmatmul.msk.f32.gmra.mxu2 %vm96_vm2, %v5107_v16  ;;  %v1138_v48 = vpop.permute.xlu0 %1137 }
  0xfa   :  { %4511 = vmatmul.msk.f32.gmra.mxu1 %vm96_vm2, %v5107_v16  ;;  %4521 = vmatmul.msk.f32.gmra.mxu3 %vm96_vm2, %v5107_v16 }
  0xfc   :  { %1911 = vrot.lane.b32.xlu1 %v1901_v6, %s4994_s17 }
  0xfd   :  { %1881 = vrot.lane.b32.xlu0 %v5073_v0, %s4993_s12 }
 0x100   :  { %4507 = vmatmul.msk.f32.gmra.mxu0 %vm96_vm2, %v5132_v25 }
 0x101   :  { %4517 = vmatmul.msk.f32.gmra.mxu2 %vm96_vm2, %v5132_v25 }
 0x102   :  { %4512 = vmatmul.msk.f32.gmra.mxu1 %vm96_vm2, %v5132_v25  ;;  %4522 = vmatmul.msk.f32.gmra.mxu3 %vm96_vm2, %v5132_v25 }
 0x104   :  { %1883 = vrot.lane.b32.xlu1 %v5092_v5, %s4993_s12 }
 0x105   :  { %v5400_v37 = vpop.f32.mrf.mxu0  ;;  %v5402_v38 = vpop.f32.mrf.mxu1 }
 0x108   :  { %4524 = vmatmul.msk.f32.vlgmr.msra.gmra.mxu0 %vm96_vm2, %v5073_v0 }
 0x109   :  { %4534 = vmatmul.msk.f32.vlgmr.msra.gmra.mxu2 %vm96_vm2, %v5366_v24  ;;  %4563 = vmatpush.msk.msra.mxu0 %vm105_vm1, %v757_v43 }
 0x10a   :  { %4529 = vmatmul.msk.f32.vlgmr.msra.gmra.mxu1 %vm96_vm2, %v5073_v0  ;;  %4539 = vmatmul.msk.f32.vlgmr.msra.gmra.mxu3 %vm96_vm2, %v5366_v24  ;;  %v1147_v0 = vsel %vm1143_vm4, %v1132_v22, %v1134_v34 }
 0x10b   :  { %4573 = vmatpush.msk.msra.mxu2 %vm105_vm1, %v749_v58  ;;  %4578 = vmatpush.msk.msra.mxu3 %vm105_vm1, %v1144_v2 }
 0x10c   :  { %v5417_v44 = vpop.f32.mrf.mxu2  ;;  %v5419_v45 = vpop.f32.mrf.mxu3 }
 0x10d   :  { %v5423_v46 = vpop.f32.mrf.mxu0 }
 0x10e   :  { %v5425_v47 = vpop.f32.mrf.mxu1 }
 0x110   :  { %4525 = vmatmul.msk.f32.gmra.mxu0 %vm96_vm2, %v5092_v5 }
 0x111   :  { %4535 = vmatmul.msk.f32.gmra.mxu2 %vm96_vm2, %v5372_v26 }
 0x112   :  { %4530 = vmatmul.msk.f32.gmra.mxu1 %vm96_vm2, %v5092_v5  ;;  %4540 = vmatmul.msk.f32.gmra.mxu3 %vm96_vm2, %v5372_v26 }
 0x114   :  { %v5436_v49 = vpop.f32.mrf.mxu2 }
 0x115   :  { %v5438_v50 = vpop.f32.mrf.mxu3  ;;  %v5442_v51 = vpop.f32.mrf.mxu0 }
 0x117   :  { %v5444_v52 = vpop.f32.mrf.mxu1 }
 0x118   :  { %4526 = vmatmul.msk.f32.gmra.mxu0 %vm96_vm2, %v5107_v16 }
 0x119   :  { %4536 = vmatmul.msk.f32.gmra.mxu2 %vm96_vm2, %v5378_v27 }
 0x11a   :  { %4531 = vmatmul.msk.f32.gmra.mxu1 %vm96_vm2, %v5107_v16  ;;  %4541 = vmatmul.msk.f32.gmra.mxu3 %vm96_vm2, %v5378_v27  ;;  %v758_v16 = vsel %vm750_vm3, %v747_v42, %v749_v58  ;;  %v1136_v42 = vpop.permute.xlu2 %1135  ;;  %v1515_v58 = vld.sshfl [vmem:[#allocation1 + $0x38] sm:$0xff pattern:$0x75316420]  ;;  %vm4064_vm3 = vcmask 1046534  }
 0x11b   :  { %4568 = vmatpush.msk.msra.mxu1 %vm105_vm1, %v758_v16  ;;  %v1148_v43 = vsel %vm1143_vm4, %v1134_v34, %v1136_v42  ;;  %v1149_v53 = vsel %vm1143_vm4, %v1136_v42, %v1138_v48  ;;  %v1873_v16 = vld [vmem:[%s7433_s0 + $0x8] sm:$0x77]  ;;  %1532 = vrot.lane.b32.xlu2 %v1515_v58, %s4991_s8  ;;  %s5012_s8 = smov 10  }
 0x11c   :  { %v5454_v54 = vpop.f32.mrf.mxu2  ;;  %1896 = vst [vmem:[#allocation1 + $0x10] ss:$2 sm:$0xff] %v1873_v16 }
 0x11d   :  { %v5456_v55 = vpop.f32.mrf.mxu3  ;;  %v5459_v56 = vpop.f32.mrf.mxu0 }
 0x11f   :  { %v5461_v57 = vpop.f32.mrf.mxu1 }
 0x120   :  { %4527 = vmatmul.msk.f32.gmra.mxu0 %vm96_vm2, %v5132_v25 }
 0x121   :  { %4537 = vmatmul.msk.f32.gmra.mxu2 %vm96_vm2, %v5394_v32 }
 0x122   :  { %4532 = vmatmul.msk.f32.gmra.mxu1 %vm96_vm2, %v5132_v25  ;;  %4542 = vmatmul.msk.f32.gmra.mxu3 %vm96_vm2, %v5394_v32 }
 0x124   :  { %v5474_v60 = vpop.f32.mrf.mxu2 }
 0x125   :  { %v5476_v61 = vpop.f32.mrf.mxu3  ;;  %v5478_v62 = vpop.f32.mrf.mxu0 }
 0x127   :  { %v5480_v63 = vpop.f32.mrf.mxu1 }
 0x128   :  { %4544 = vmatmul.msk.f32.vlgmr.msrb.gmra.mxu0 %vm96_vm2, %v5366_v24 }
 0x129   :  { %4554 = vmatmul.msk.f32.vlgmr.msrb.gmra.mxu2 %vm96_vm2, %v5366_v24  ;;  %4583 = vmatpush.msk.msrb.mxu0 %vm105_vm1, %v1145_v4 }
 0x12a   :  { %4549 = vmatmul.msk.f32.vlgmr.msrb.gmra.mxu1 %vm96_vm2, %v5366_v24  ;;  %4559 = vmatmul.msk.f32.vlgmr.msrb.gmra.mxu3 %vm96_vm2, %v5366_v24 }
 0x12b   :  { %4588 = vmatpush.msk.msrb.mxu1 %vm105_vm1, %v1146_v23  ;;  %4593 = vmatpush.msk.msrb.mxu2 %vm105_vm1, %v1147_v0 }
 0x12c   :  { %v5497_v8 = vpop.f32.mrf.mxu2  ;;  %4598 = vmatpush.msk.msrb.mxu3 %vm105_vm1, %v1148_v43 }
 0x12d   :  { %v5499_v9 = vpop.f32.mrf.mxu3  ;;  %v5502_v10 = vpop.f32.mrf.mxu0 }
 0x12f   :  { %v5504_v11 = vpop.f32.mrf.mxu1 }
 0x130   :  { %4545 = vmatmul.msk.f32.gmra.mxu0 %vm96_vm2, %v5372_v26 }
 0x131   :  { %4555 = vmatmul.msk.f32.gmra.mxu2 %vm96_vm2, %v5372_v26 }
 0x132   :  { %4550 = vmatmul.msk.f32.gmra.mxu1 %vm96_vm2, %v5372_v26  ;;  %4560 = vmatmul.msk.f32.gmra.mxu3 %vm96_vm2, %v5372_v26 }
 0x134   :  { %v5517_v15 = vpop.f32.mrf.mxu2 }
 0x135   :  { %v5519_v17 = vpop.f32.mrf.mxu3  ;;  %v5522_v18 = vpop.f32.mrf.mxu0 }
 0x137   :  { %v5524_v19 = vpop.f32.mrf.mxu1 }
 0x138   :  { %4546 = vmatmul.msk.f32.gmra.mxu0 %vm96_vm2, %v5378_v27 }
 0x139   :  { %4556 = vmatmul.msk.f32.gmra.mxu2 %vm96_vm2, %v5378_v27 }
 0x13a   :  { %4551 = vmatmul.msk.f32.gmra.mxu1 %vm96_vm2, %v5378_v27  ;;  %4561 = vmatmul.msk.f32.gmra.mxu3 %vm96_vm2, %v5378_v27 }
 0x13c   :  { %v5540_v28 = vpop.f32.mrf.mxu2 }
 0x13d   :  { %v5542_v29 = vpop.f32.mrf.mxu3  ;;  %v5546_v30 = vpop.f32.mrf.mxu0 }
 0x13e   :  { %7440 = vst [vmem:[#allocation5_spill] sm:$0xff] %v5542_v29 }
 0x13f   :  { %v5548_v31 = vpop.f32.mrf.mxu1 }
 0x140   :  { %4547 = vmatmul.msk.f32.gmra.mxu0 %vm96_vm2, %v5394_v32 }
 0x141   :  { %4557 = vmatmul.msk.f32.gmra.mxu2 %vm96_vm2, %v5394_v32 }
 0x142   :  { %4552 = vmatmul.msk.f32.gmra.mxu1 %vm96_vm2, %v5394_v32  ;;  %4562 = vmatmul.msk.f32.gmra.mxu3 %vm96_vm2, %v5394_v32 }
 0x144   :  { %v5562_v35 = vpop.f32.mrf.mxu2 }
 0x145   :  { %v5564_v36 = vpop.f32.mrf.mxu3  ;;  %v5566_v39 = vpop.f32.mrf.mxu0 }
 0x146   :  { %7441 = vst [vmem:[#allocation6_spill] sm:$0xff] %v5564_v36 }
 0x147   :  { %v5568_v40 = vpop.f32.mrf.mxu1 }
 0x148   :  { %4564 = vmatmul.msk.f32.vlgmr.msra.gmra.mxu0 %vm96_vm2, %v5366_v24 }
 0x149   :  { %4574 = vmatmul.msk.f32.vlgmr.msra.gmra.mxu2 %vm96_vm2, %v5366_v24  ;;  %4603 = vmatpush.msk.msra.mxu0 %vm105_vm1, %v1149_v53 }
 0x14a   :  { %4569 = vmatmul.msk.f32.vlgmr.msra.gmra.mxu1 %vm96_vm2, %v5366_v24  ;;  %4579 = vmatmul.msk.f32.vlgmr.msra.gmra.mxu3 %vm96_vm2, %v5515_v13 }
 0x14c   :  { %v474_v59 = vpop.f32.mrf.mxu2 }
 0x14d   :  { %v503_v1 = vpop.f32.mrf.mxu3  ;;  %v5590_v24 = vadd.f32 %v474_v59, %v5402_v38  ;;  %v5595_v3 = vpop.f32.mrf.mxu0  ;;  %v1904_v38 = vld.sshfl [vmem:[#allocation1 + $0x18] sm:$0xff pattern:$0x75316420] }
 0x14e   :  { %v5593_v2 = vadd.f32 %v503_v1, %v5417_v44  ;;  %1917 = vrot.lane.b32.xlu0 %v1904_v38, %s4994_s17  ;;  %v1903_v1 = vld.sshfl [vmem:[#allocation1 + $0x10] sm:$0xff pattern:$0x75316420] }
 0x14f   :  { %v5597_v4 = vpop.f32.mrf.mxu1 }
 0x150   :  { %4565 = vmatmul.msk.f32.gmra.mxu0 %vm96_vm2, %v5372_v26 }
 0x151   :  { %4575 = vmatmul.msk.f32.gmra.mxu2 %vm96_vm2, %v5372_v26 }
 0x152   :  { %4570 = vmatmul.msk.f32.gmra.mxu1 %vm96_vm2, %v5372_v26  ;;  %4580 = vmatmul.msk.f32.gmra.mxu3 %vm96_vm2, %v5530_v20  ;;  %v1874_v26 = vld [vmem:[%s7433_s0 + $0x10] sm:$0x77] }
 0x153   :  { %1898 = vst [vmem:[#allocation1 + $0x20] ss:$2 sm:$0xff] %v1874_v26 }
 0x154   :  { %v477_v44 = vpop.f32.mrf.mxu2 }
 0x155   :  { %v506_v7 = vpop.f32.mrf.mxu3  ;;  %v5610_v12 = vadd.f32 %v477_v44, %v5425_v47  ;;  %v5615_v22 = vpop.f32.mrf.mxu0 }
 0x156   :  { %v5613_v14 = vadd.f32 %v506_v7, %v5436_v49  ;;  %1887 = vrot.lane.b32.xlu0 %v5132_v25, %s4993_s12  ;;  %v1140_v25 = vpop.permute.xlu1 %1139 }
 0x157   :  { %v5617_v23 = vpop.f32.mrf.mxu1 }
 0x158   :  { %4566 = vmatmul.msk.f32.gmra.mxu0 %vm96_vm2, %v5378_v27 }
 0x159   :  { %4576 = vmatmul.msk.f32.gmra.mxu2 %vm96_vm2, %v5378_v27 }
 0x15a   :  { %4571 = vmatmul.msk.f32.gmra.mxu1 %vm96_vm2, %v5378_v27  ;;  %4581 = vmatmul.msk.f32.gmra.mxu3 %vm96_vm2, %v5536_v21  ;;  %v1905_v42 = vld.sshfl [vmem:[#allocation1 + $0x20] sm:$0xff pattern:$0x75316420]  ;;  %v1902_v27 = vld.sshfl [vmem:[#allocation1 + $0x8] sm:$0xff pattern:$0x75316420] }
 0x15b   :  { %1919 = vrot.lane.b32.xlu1 %v1905_v42, %s4994_s17  ;;  %1913 = vrot.lane.b32.xlu2 %v1902_v27, %s4994_s17 }
 0x15c   :  { %v480_v47 = vpop.f32.mrf.mxu2 }
 0x15d   :  { %v509_v49 = vpop.f32.mrf.mxu3  ;;  %v5635_v5 = vadd.f32 %v480_v47, %v5444_v52  ;;  %v5640_v0 = vpop.f32.mrf.mxu0  ;;  %v1150_v52 = vsel %vm1143_vm4, %v1138_v48, %v1140_v25  ;;  %v1906_v47 = vld.sshfl [vmem:[#allocation1 + $0x28] sm:$0xff pattern:$0x75316420] }
 0x15e   :  { %v5638_v34 = vadd.f32 %v509_v49, %v5454_v54  ;;  %4608 = vmatpush.msk.msra.mxu1 %vm105_vm1, %v1150_v52 }
 0x15f   :  { %v5642_v41 = vpop.f32.mrf.mxu1 }
 0x160   :  { %4567 = vmatmul.msk.f32.gmra.mxu0 %vm96_vm2, %v5394_v32 }
 0x161   :  { %4577 = vmatmul.msk.f32.gmra.mxu2 %vm96_vm2, %v5394_v32 }
 0x162   :  { %4572 = vmatmul.msk.f32.gmra.mxu1 %vm96_vm2, %v5394_v32  ;;  %4582 = vmatmul.msk.f32.gmra.mxu3 %vm96_vm2, %v5558_v33  ;;  %v1142_v32 = vpop.permute.xlu2 %1141 }
 0x163   :  { %v1151_v6 = vsel %vm1143_vm4, %v1140_v25, %v1142_v32  ;;  %4618 = vmatpush.msk.msra.mxu3 %vm105_vm1, %v1142_v32  ;;  %1915 = vrot.lane.b32.xlu2 %v1903_v1, %s4994_s17  ;;  %v1519_v32 = vpop.permute.xlu0 %1518  ;;  %vm4066_vm4 = vcmask 1045508  }
 0x164   :  { %v483_v54 = vpop.f32.mrf.mxu2  ;;  %4613 = vmatpush.msk.msra.mxu2 %vm105_vm1, %v1151_v6  ;;  %1921 = vrot.lane.b32.xlu1 %v1906_v47, %s4994_s17 }
 0x165   :  { %v512_v43 = vpop.f32.mrf.mxu3  ;;  %v5657_v53 = vadd.f32 %v483_v54, %v5461_v57  ;;  %v5662_v16 = vpop.f32.mrf.mxu0  ;;  %v1875_v57 = vld [vmem:[%s7433_s0 + $0x18] sm:$0x77]  ;;  %v1876_v54 = vld [vmem:[%s7433_s0 + $0x20] sm:$0x7] }
 0x166   :  { %v5660_v58 = vadd.f32 %v512_v43, %v5474_v60  ;;  %1900 = vst [vmem:[#allocation1 + $0x30] ss:$2 sm:$0xff] %v1875_v57  ;;  %v1521_v43 = vpop.permute.xlu1 %1520 }
 0x167   :  { %v5664_v59 = vpop.f32.mrf.mxu1  ;;  %1909 = vst [vmem:[#allocation1] ss:$2 sm:$0xff] %v1876_v54  ;;  %v1537_v1 = vsel %vm1536_vm5, %v1519_v32, %v1521_v43 }
 0x168   :  { %4584 = vmatmul.msk.f32.vlgmr.msrb.gmra.mxu0 %vm96_vm2, %v5515_v13 }
 0x169   :  { %4594 = vmatmul.msk.f32.vlgmr.msrb.gmra.mxu2 %vm96_vm2, %v5515_v13  ;;  %4623 = vmatpush.msk.msrb.mxu0 %vm105_vm1, %v1537_v1 }
 0x16a   :  { %4589 = vmatmul.msk.f32.vlgmr.msrb.gmra.mxu1 %vm96_vm2, %v5515_v13  ;;  %4599 = vmatmul.msk.f32.vlgmr.msrb.gmra.mxu3 %vm96_vm2, %v5515_v13  ;;  %v5715_v6 = vpop.permute.xlu2 %1488 }
 0x16b   :  { %v5742_v54 = vpop.permute.xlu0 %1490 }
 0x16c   :  { %v590_v60 = vpop.f32.mrf.mxu2 }
 0x16d   :  { %v619_v48 = vpop.f32.mrf.mxu3  ;;  %v5682_v38 = vadd.f32 %v590_v60, %v5480_v63  ;;  %v5687_v7 = vpop.f32.mrf.mxu0  ;;  %v1908_v63 = vld.sshfl [vmem:[#allocation1 + $0x38] sm:$0xff pattern:$0x75316420] }
 0x16e   :  { %v5685_v44 = vadd.f32 %v619_v48, %v5497_v8  ;;  %1925 = vrot.lane.b32.xlu0 %v1908_v63, %s4994_s17  ;;  %v1910_v63 = vld.sshfl [vmem:[#allocation1] sm:$0xff pattern:$0x75316420] }
 0x16f   :  { %v5689_v26 = vpop.f32.mrf.mxu1  ;;  %1927 = vrot.lane.b32.xlu1 %v1910_v63, %s4994_s17 }
 0x170   :  { %4585 = vmatmul.msk.f32.gmra.mxu0 %vm96_vm2, %v5530_v20 }
 0x171   :  { %4595 = vmatmul.msk.f32.gmra.mxu2 %vm96_vm2, %v5530_v20 }
 0x172   :  { %4590 = vmatmul.msk.f32.gmra.mxu1 %vm96_vm2, %v5530_v20  ;;  %4600 = vmatmul.msk.f32.gmra.mxu3 %vm96_vm2, %v5530_v20 }
 0x174   :  { %v593_v8 = vpop.f32.mrf.mxu2 }
 0x175   :  { %v622_v49 = vpop.f32.mrf.mxu3  ;;  %v5702_v42 = vadd.f32 %v593_v8, %v5504_v11  ;;  %v5707_v25 = vpop.f32.mrf.mxu0  ;;  %v5739_v8 = vld [vmem:[%s7432_s1 + $0x10] sm:$0xff] }
 0x176   :  { %v5705_v27 = vadd.f32 %v622_v49, %v5517_v15  ;;  %v1523_v49 = vpop.permute.xlu1 %1522  ;;  %1885 = vrot.lane.b32.xlu2 %v5739_v8, %s4993_s12  ;;  %s4996_s12 = smov 110  }
 0x177   :  { %v5709_v52 = vpop.f32.mrf.mxu1 }
 0x178   :  { %7442 = vst [vmem:[#allocation7_spill] sm:$0xff] %v5705_v27  ;;  %4586 = vmatmul.msk.f32.gmra.mxu0 %vm96_vm2, %v5536_v21 }
 0x179   :  { %4596 = vmatmul.msk.f32.gmra.mxu2 %vm96_vm2, %v5536_v21 }
 0x17a   :  { %4591 = vmatmul.msk.f32.gmra.mxu1 %vm96_vm2, %v5536_v21  ;;  %4601 = vmatmul.msk.f32.gmra.mxu3 %vm96_vm2, %v5536_v21 }
 0x17c   :  { %v596_v11 = vpop.f32.mrf.mxu2 }
 0x17d   :  { %v625_v15 = vpop.f32.mrf.mxu3  ;;  %v5727_v57 = vadd.f32 %v596_v11, %v5524_v19  ;;  %v5732_v48 = vpop.f32.mrf.mxu0  ;;  %v1538_v19 = vsel %vm1536_vm5, %v1521_v43, %v1523_v49 }
 0x17e   :  { %v5730_v60 = vadd.f32 %v625_v15, %v5540_v28  ;;  %v5747_v28 = vpop.permute.xlu2 %1492  ;;  %4628 = vmatpush.msk.msrb.mxu1 %vm105_vm1, %v1538_v19  ;;  %v1525_v36 = vpop.permute.xlu1 %1524  ;;  %v2265_v19 = vld [vmem:[%s7433_s0] sm:$0x77] }
 0x17f   :  { %v5734_v47 = vpop.f32.mrf.mxu1  ;;  %v1539_v29 = vsel %vm1536_vm5, %v1523_v49, %v1525_v36  ;;  %v1907_v49 = vld.sshfl [vmem:[#allocation1 + $0x30] sm:$0xff pattern:$0x75316420]  ;;  %2287 = vst [vmem:[#allocation1] ss:$2 sm:$0xff] %v2265_v19 }
 0x180   :  { %7443 = vst [vmem:[#allocation8_spill] sm:$0xff] %v5730_v60  ;;  %4587 = vmatmul.msk.f32.gmra.mxu0 %vm96_vm2, %v5558_v33  ;;  %v5768_v60 = vpop.permute.xlu0 %1494  ;;  %4633 = vmatpush.msk.msrb.mxu2 %vm105_vm1, %v1539_v29 }
 0x181   :  { %4597 = vmatmul.msk.f32.gmra.mxu2 %vm96_vm2, %v5558_v33  ;;  %1923 = vrot.lane.b32.xlu2 %v1907_v49, %s4994_s17  ;;  %s5023_s17 = smov 26  }
 0x182   :  { %4592 = vmatmul.msk.f32.gmra.mxu1 %vm96_vm2, %v5558_v33  ;;  %4602 = vmatmul.msk.f32.gmra.mxu3 %vm96_vm2, %v5558_v33 }
 0x184   :  { %v599_v32 = vpop.f32.mrf.mxu2 }
 0x185   :  { %v628_v1 = vpop.f32.mrf.mxu3  ;;  %v5759_v43 = vadd.f32 %v599_v32, %v5548_v31  ;;  %v5764_v15 = vpop.f32.mrf.mxu0 }
 0x186   :  { %v5762_v11 = vadd.f32 %v628_v1, %v5562_v35  ;;  %v1527_v27 = vpop.permute.xlu2 %1526  ;;  %v446_v35 = vadd.f32 %v5568_v40, %v5400_v37 }
 0x187   :  { %v5766_v63 = vpop.f32.mrf.mxu1  ;;  %v1540_v31 = vsel %vm1536_vm5, %v1525_v36, %v1527_v27 }
 0x188   :  { %7444 = vst [vmem:[#allocation9_spill] sm:$0xff] %v5762_v11  ;;  %4604 = vmatmul.msk.f32.vlgmr.msra.gmra.mxu0 %vm96_vm2, %v5515_v13  ;;  %4638 = vmatpush.msk.msrb.mxu3 %vm105_vm1, %v1540_v31  ;;  %v1529_v31 = vpop.permute.xlu0 %1528 }
 0x189   :  { %4614 = vmatmul.msk.f32.vlgmr.msra.gmra.mxu2 %vm96_vm2, %v5515_v13  ;;  %v1541_v11 = vsel %vm1536_vm5, %v1527_v27, %v1529_v31 }
 0x18a   :  { %4609 = vmatmul.msk.f32.vlgmr.msra.gmra.mxu1 %vm96_vm2, %v5515_v13  ;;  %4619 = vmatmul.msk.f32.vlgmr.msra.gmra.mxu3 %vm96_vm2, %v5515_v13  ;;  %v2266_v13 = vld [vmem:[%s7433_s0 + $0x8] sm:$0x77] }
 0x18b   :  { %2289 = vst [vmem:[#allocation1 + $0x10] ss:$2 sm:$0xff] %v2266_v13  ;;  %4643 = vmatpush.msk.msra.mxu0 %vm105_vm1, %v1541_v11 }
 0x18c   :  { %v802_v32 = vpop.f32.mrf.mxu2 }
 0x18d   :  { %v831_v36 = vpop.f32.mrf.mxu3  ;;  %v5791_v29 = vadd.f32 %v802_v32, %v446_v35  ;;  %v5796_v37 = vpop.f32.mrf.mxu0  ;;  %v2295_v35 = vld.sshfl [vmem:[#allocation1 + $0x8] sm:$0xff pattern:$0x75316420] }
 0x18e   :  { %v5794_v1 = vadd.f32 %v831_v36, %v5590_v24  ;;  %v449_v24 = vadd.f32 %v5597_v4, %v5423_v46  ;;  %2307 = vrot.lane.b32.xlu0 %v2295_v35, %s4995_s9  ;;  %v452_v4 = vadd.f32 %v5617_v23, %v5442_v51  ;;  %v1531_v51 = vpop.permute.xlu1 %1530 }
 0x18f   :  { %v5798_v40 = vpop.f32.mrf.mxu1  ;;  %v1542_v23 = vsel %vm1536_vm5, %v1529_v31, %v1531_v51 }
 0x190   :  { %7445 = vst [vmem:[#allocation10_spill] sm:$0xff] %v5794_v1  ;;  %4605 = vmatmul.msk.f32.gmra.mxu0 %vm96_vm2, %v5530_v20  ;;  %4648 = vmatpush.msk.msra.mxu1 %vm105_vm1, %v1542_v23 }
 0x191   :  { %4615 = vmatmul.msk.f32.gmra.mxu2 %vm96_vm2, %v5530_v20 }
 0x192   :  { %4610 = vmatmul.msk.f32.gmra.mxu1 %vm96_vm2, %v5530_v20  ;;  %4620 = vmatmul.msk.f32.gmra.mxu3 %vm96_vm2, %v5530_v20  ;;  %v2296_v19 = vld.sshfl [vmem:[#allocation1 + $0x10] sm:$0xff pattern:$0x75316420]  ;;  %v2297_v46 = vld.sshfl [vmem:[#allocation1 + $0x18] sm:$0xff pattern:$0x75316420] }
 0x193   :  { %2309 = vrot.lane.b32.xlu1 %v2296_v19, %s4995_s9  ;;  %v2267_v19 = vld [vmem:[%s7433_s0 + $0x10] sm:$0x77] }
 0x194   :  { %v805_v49 = vpop.f32.mrf.mxu2  ;;  %2291 = vst [vmem:[#allocation1 + $0x20] ss:$2 sm:$0xff] %v2267_v19 }
 0x195   :  { %v834_v27 = vpop.f32.mrf.mxu3  ;;  %v5813_v32 = vadd.f32 %v805_v49, %v449_v24  ;;  %v5818_v13 = vpop.f32.mrf.mxu0 }
 0x196   :  { %v5816_v36 = vadd.f32 %v834_v27, %v5610_v12  ;;  %7447 = vst [vmem:[#allocation12_spill] sm:$0xff] %v5818_v13  ;;  %2311 = vrot.lane.b32.xlu0 %v2297_v46, %s4995_s9 }
 0x197   :  { %v5820_v20 = vpop.f32.mrf.mxu1 }
 0x198   :  { %7446 = vst [vmem:[#allocation11_spill] sm:$0xff] %v5816_v36  ;;  %4606 = vmatmul.msk.f32.gmra.mxu0 %vm96_vm2, %v5536_v21 }
 0x199   :  { %4616 = vmatmul.msk.f32.gmra.mxu2 %vm96_vm2, %v5536_v21 }
 0x19a   :  { %4611 = vmatmul.msk.f32.gmra.mxu1 %vm96_vm2, %v5536_v21  ;;  %4621 = vmatmul.msk.f32.gmra.mxu3 %vm96_vm2, %v5536_v21  ;;  %v5846_v21 = vld [vmem:[%s7432_s1 + $0x8] sm:$0xff] }
 0x19b   :  { %2276 = vrot.lane.b32.xlu1 %v5846_v21, %s4996_s12 }
 0x19c   :  { %v808_v12 = vpop.f32.mrf.mxu2 }
 0x19d   :  { %v837_v11 = vpop.f32.mrf.mxu3  ;;  %v5834_v24 = vadd.f32 %v808_v12, %v452_v4  ;;  %v5839_v49 = vpop.f32.mrf.mxu0 }
 0x19e   :  { %v5837_v35 = vadd.f32 %v837_v11, %v5635_v5  ;;  %7449 = vst [vmem:[#allocation14_spill] sm:$0xff] %v5839_v49  ;;  %v455_v5 = vadd.f32 %v5642_v41, %v5459_v56  ;;  %v1533_v56 = vpop.permute.xlu2 %1532  ;;  %v1535_v41 = vpop.permute.xlu0 %1534 }
 0x19f   :  { %v5841_v27 = vpop.f32.mrf.mxu1  ;;  %v1543_v23 = vsel %vm1536_vm5, %v1531_v51, %v1533_v56  ;;  %v1544_v36 = vsel %vm1536_vm5, %v1533_v56, %v1535_v41  ;;  %v2268_v51 = vld [vmem:[%s7433_s0 + $0x18] sm:$0x77]  ;;  %v5911_v56 = vld [vmem:[%s7432_s1] sm:$0xff]  ;;  %vm4068_vm5 = vcmask 1043456  }
 0x1a0   :  { %7448 = vst [vmem:[#allocation13_spill] sm:$0xff] %v5837_v35  ;;  %4607 = vmatmul.msk.f32.gmra.mxu0 %vm96_vm2, %v5558_v33  ;;  %v2294_v35 = vld.sshfl [vmem:[#allocation1] sm:$0xff pattern:$0x75316420]  ;;  %4653 = vmatpush.msk.msra.mxu2 %vm105_vm1, %v1543_v23 }
 0x1a1   :  { %4617 = vmatmul.msk.f32.gmra.mxu2 %vm96_vm2, %v5558_v33  ;;  %2305 = vrot.lane.b32.xlu2 %v2294_v35, %s4995_s9  ;;  %v2298_v35 = vld.sshfl [vmem:[#allocation1 + $0x20] sm:$0xff pattern:$0x75316420]  ;;  %2293 = vst [vmem:[#allocation1 + $0x30] ss:$2 sm:$0xff] %v2268_v51 }
 0x1a2   :  { %4612 = vmatmul.msk.f32.gmra.mxu1 %vm96_vm2, %v5558_v33  ;;  %4622 = vmatmul.msk.f32.gmra.mxu3 %vm96_vm2, %v5558_v33 }
 0x1a3   :  { %4658 = vmatpush.msk.msra.mxu3 %vm105_vm1, %v1544_v36  ;;  %2313 = vrot.lane.b32.xlu0 %v2298_v35, %s4995_s9 }
 0x1a4   :  { %v811_v46 = vpop.f32.mrf.mxu2 }
 0x1a5   :  { %v840_v4 = vpop.f32.mrf.mxu3  ;;  %v5865_v12 = vadd.f32 %v811_v46, %v455_v5  ;;  %v5870_v33 = vpop.f32.mrf.mxu0 }
 0x1a6   :  { %v5868_v11 = vadd.f32 %v840_v4, %v5657_v53  ;;  %v562_v53 = vadd.f32 %v5664_v59, %v5478_v62  ;;  %v5906_v59 = vld [vmem:[%s7432_s1 + $0x18] sm:$0xff]  ;;  %s5027_s1 = smov 120  }
 0x1a7   :  { %v5872_v31 = vpop.f32.mrf.mxu1  ;;  %2280 = vrot.lane.b32.xlu1 %v5906_v59, %s4996_s12 }
 0x1a8   :  { %7450 = vst [vmem:[#allocation15_spill] sm:$0xff] %v5868_v11  ;;  %4624 = vmatmul.msk.f32.vlgmr.msrb.gmra.mxu0 %vm96_vm2, %v5715_v6 }
 0x1a9   :  { %4634 = vmatmul.msk.f32.vlgmr.msrb.gmra.mxu2 %vm96_vm2, %v5715_v6  ;;  %4663 = vmatpush.msk.msrb.mxu0 %vm105_vm1, %v1535_v41  ;;  %v2300_v41 = vld.sshfl [vmem:[#allocation1 + $0x30] sm:$0xff pattern:$0x75316420] }
 0x1aa   :  { %4629 = vmatmul.msk.f32.vlgmr.msrb.gmra.mxu1 %vm96_vm2, %v5715_v6  ;;  %4639 = vmatmul.msk.f32.vlgmr.msrb.gmra.mxu3 %vm96_vm2, %v5715_v6 }
 0x1ab   :  { %2274 = vrot.lane.b32.xlu2 %v5911_v56, %s4996_s12  ;;  %2317 = vrot.lane.b32.xlu0 %v2300_v41, %s4995_s9 }
 0x1ac   :  { %v918_v5 = vpop.f32.mrf.mxu2 }
 0x1ad   :  { %v947_v19 = vpop.f32.mrf.mxu3  ;;  %v5894_v46 = vadd.f32 %v918_v5, %v562_v53  ;;  %v5899_v36 = vpop.f32.mrf.mxu0 }
 0x1ae   :  { %v5897_v4 = vadd.f32 %v947_v19, %v5682_v38  ;;  %v565_v38 = vadd.f32 %v5689_v26, %v5502_v10  ;;  %v568_v26 = vadd.f32 %v5709_v52, %v5522_v18  ;;  %v1912_v18 = vpop.permute.xlu1 %1911 }
 0x1af   :  { %v5901_v62 = vpop.f32.mrf.mxu1 }
 0x1b0   :  { %7451 = vst [vmem:[#allocation16_spill] sm:$0xff] %v5897_v4  ;;  %4625 = vmatmul.msk.f32.gmra.mxu0 %vm96_vm2, %v5742_v54  ;;  %v2301_v4 = vld.sshfl [vmem:[#allocation1 + $0x38] sm:$0xff pattern:$0x75316420] }
 0x1b1   :  { %4635 = vmatmul.msk.f32.gmra.mxu2 %vm96_vm2, %v5742_v54  ;;  %2319 = vrot.lane.b32.xlu1 %v2301_v4, %s4995_s9 }
 0x1b2   :  { %4630 = vmatmul.msk.f32.gmra.mxu1 %vm96_vm2, %v5742_v54  ;;  %4640 = vmatmul.msk.f32.gmra.mxu3 %vm96_vm2, %v5742_v54 }
 0x1b3   :  { %2278 = vrot.lane.b32.xlu2 %v5739_v8, %s4996_s12  ;;  %s5015_s12 = smov 114  }
 0x1b4   :  { %v921_v23 = vpop.f32.mrf.mxu2 }
 0x1b5   :  { %v950_v53 = vpop.f32.mrf.mxu3  ;;  %v5928_v35 = vadd.f32 %v921_v23, %v565_v38  ;;  %v5933_v5 = vpop.f32.mrf.mxu0 }
 0x1b6   :  { %v5931_v51 = vadd.f32 %v950_v53, %v5702_v42  ;;  %v1914_v10 = vpop.permute.xlu2 %1913 }
 0x1b7   :  { %v5935_v19 = vpop.f32.mrf.mxu1  ;;  %v1930_v52 = vsel %vm1929_vm6, %v1912_v18, %v1914_v10 }
 0x1b8   :  { %7452 = vst [vmem:[#allocation17_spill] sm:$0xff] %v5931_v51  ;;  %4626 = vmatmul.msk.f32.gmra.mxu0 %vm96_vm2, %v5747_v28  ;;  %v5959_v51 = vpop.permute.xlu0 %1881  ;;  %4668 = vmatpush.msk.msrb.mxu1 %vm105_vm1, %v1930_v52 }
 0x1b9   :  { %4636 = vmatmul.msk.f32.gmra.mxu2 %vm96_vm2, %v5747_v28 }
 0x1ba   :  { %4631 = vmatmul.msk.f32.gmra.mxu1 %vm96_vm2, %v5747_v28  ;;  %4641 = vmatmul.msk.f32.gmra.mxu3 %vm96_vm2, %v5747_v28 }
 0x1bc   :  { %v924_v42 = vpop.f32.mrf.mxu2 }
 0x1bd   :  { %v953_v38 = vpop.f32.mrf.mxu3  ;;  %v5950_v41 = vadd.f32 %v924_v42, %v568_v26  ;;  %v5955_v23 = vpop.f32.mrf.mxu0  ;;  %v571_v42 = vadd.f32 %v5734_v47, %v5546_v30  ;;  %v2299_v30 = vld.sshfl [vmem:[#allocation1 + $0x28] sm:$0xff pattern:$0x75316420] }
 0x1be   :  { %v5953_v4 = vadd.f32 %v953_v38, %v5727_v57  ;;  %v1916_v57 = vpop.permute.xlu2 %1915  ;;  %v2269_v38 = vld [vmem:[%s7433_s0 + $0x20] sm:$0x77]  ;;  %2315 = vrot.lane.b32.xlu2 %v2299_v30, %s4995_s9 }
 0x1bf   :  { %v5957_v53 = vpop.f32.mrf.mxu1  ;;  %v1931_v26 = vsel %vm1929_vm6, %v1914_v10, %v1916_v57  ;;  %2302 = vst [vmem:[#allocation1] ss:$2 sm:$0xff] %v2269_v38  ;;  %v2662_v38 = vld [vmem:[%s7433_s0] sm:$0x77] }
 0x1c0   :  { %7453 = vst [vmem:[#allocation18_spill] sm:$0xff] %v5953_v4  ;;  %4627 = vmatmul.msk.f32.gmra.mxu0 %vm96_vm2, %v5768_v60  ;;  %4673 = vmatpush.msk.msrb.mxu2 %vm105_vm1, %v1931_v26  ;;  %v1918_v49 = vpop.permute.xlu0 %1917 }
 0x1c1   :  { %4637 = vmatmul.msk.f32.gmra.mxu2 %vm96_vm2, %v5768_v60  ;;  %v1932_v47 = vsel %vm1929_vm6, %v1916_v57, %v1918_v49 }
 0x1c2   :  { %4632 = vmatmul.msk.f32.gmra.mxu1 %vm96_vm2, %v5768_v60  ;;  %4642 = vmatmul.msk.f32.gmra.mxu3 %vm96_vm2, %v5768_v60 }
 0x1c3   :  { %4678 = vmatpush.msk.msrb.mxu3 %vm105_vm1, %v1932_v47 }
 0x1c4   :  { %v927_v4 = vpop.f32.mrf.mxu2 }
 0x1c5   :  { %v956_v11 = vpop.f32.mrf.mxu3  ;;  %v5978_v1 = vadd.f32 %v927_v4, %v571_v42  ;;  %v5983_v10 = vpop.f32.mrf.mxu0 }
 0x1c6   :  { %v5981_v18 = vadd.f32 %v956_v11, %v5759_v43  ;;  %v5993_v4 = vpop.permute.xlu1 %1883  ;;  %v678_v43 = vadd.f32 %v5766_v63, %v5566_v39  ;;  %v2304_v11 = vld.sshfl [vmem:[#allocation1 + $0x8] sm:$0xff pattern:$0x75316420]  ;;  %v2303_v57 = vld.sshfl [vmem:[#allocation1] sm:$0xff pattern:$0x75316420] }
 0x1c7   :  { %v5985_v52 = vpop.f32.mrf.mxu1  ;;  %2323 = vrot.lane.b32.xlu0 %v2304_v11, %s4995_s9  ;;  %2684 = vst [vmem:[#allocation1] ss:$2 sm:$0xff] %v2662_v38  ;;  %2321 = vrot.lane.b32.xlu2 %v2303_v57, %s4995_s9 }
 0x1c8   :  { %7454 = vst [vmem:[#allocation19_spill] sm:$0xff] %v5981_v18  ;;  %4644 = vmatmul.msk.f32.vlgmr.msra.gmra.mxu0 %vm96_vm2, %v5715_v6 }
 0x1c9   :  { %4654 = vmatmul.msk.f32.vlgmr.msra.gmra.mxu2 %vm96_vm2, %v5715_v6 }
 0x1ca   :  { %4649 = vmatmul.msk.f32.vlgmr.msra.gmra.mxu1 %vm96_vm2, %v5715_v6  ;;  %4659 = vmatmul.msk.f32.vlgmr.msra.gmra.mxu3 %vm96_vm2, %v5715_v6 }
 0x1cc   :  { %v1034_v26 = vpop.f32.mrf.mxu2 }
 0x1cd   :  { %v1195_v42 = vpop.f32.mrf.mxu3  ;;  %v6006_v30 = vadd.f32 %v1034_v26, %v678_v43  ;;  %v6011_v13 = vpop.f32.mrf.mxu0 }
 0x1ce   :  { %v6009_v18 = vadd.f32 %v1195_v42, %v5791_v29  ;;  %v1920_v39 = vpop.permute.xlu1 %1919  ;;  %v681_v29 = vadd.f32 %v5798_v40, %v5595_v3  ;;  %v2691_v57 = vld.sshfl [vmem:[#allocation1] sm:$0xff pattern:$0x75316420]  ;;  %v2663_v3 = vld [vmem:[%s7433_s0 + $0x8] sm:$0x77]  ;;  %v684_v40 = vadd.f32 %v5820_v20, %v5615_v22  ;;  %v6067_v22 = vpop.permute.xlu0 %1887 }
 0x1cf   :  { %v6013_v47 = vpop.f32.mrf.mxu1  ;;  %v1933_v63 = vsel %vm1929_vm6, %v1918_v49, %v1920_v39  ;;  %2671 = vrot.lane.b32.xlu0 %v5911_v56, %s4997_s25  ;;  %2702 = vrot.lane.b32.xlu1 %v2691_v57, %s4998_s26  ;;  %2686 = vst [vmem:[#allocation1 + $0x10] ss:$2 sm:$0xff] %v2663_v3 }
 0x1d0   :  { %7455 = vst [vmem:[#allocation20_spill] sm:$0xff] %v6009_v18  ;;  %4645 = vmatmul.msk.f32.gmra.mxu0 %vm96_vm2, %v5742_v54 }
 0x1d1   :  { %4655 = vmatmul.msk.f32.gmra.mxu2 %vm96_vm2, %v5742_v54  ;;  %4683 = vmatpush.msk.msra.mxu0 %vm105_vm1, %v1933_v63 }
 0x1d2   :  { %4650 = vmatmul.msk.f32.gmra.mxu1 %vm96_vm2, %v5742_v54  ;;  %4660 = vmatmul.msk.f32.gmra.mxu3 %vm96_vm2, %v5742_v54 }
 0x1d4   :  { %v1037_v43 = vpop.f32.mrf.mxu2 }
 0x1d5   :  { %v1198_v11 = vpop.f32.mrf.mxu3  ;;  %v6030_v26 = vadd.f32 %v1037_v43, %v681_v29  ;;  %v6035_v38 = vpop.f32.mrf.mxu0 }
 0x1d6   :  { %v6033_v42 = vadd.f32 %v1198_v11, %v5813_v32  ;;  %7457 = vst [vmem:[#allocation22_spill] sm:$0xff] %v6035_v38  ;;  %v2693_v3 = vld.sshfl [vmem:[#allocation1 + $0x10] sm:$0xff pattern:$0x75316420]  ;;  %v1922_v20 = vpop.permute.xlu1 %1921 }
 0x1d7   :  { %v6037_v49 = vpop.f32.mrf.mxu1  ;;  %2675 = vrot.lane.b32.xlu0 %v5739_v8, %s4997_s25  ;;  %2706 = vrot.lane.b32.xlu1 %v2693_v3, %s4998_s26  ;;  %v2694_v38 = vld.sshfl [vmem:[#allocation1 + $0x18] sm:$0xff pattern:$0x75316420] }
 0x1d8   :  { %7456 = vst [vmem:[#allocation21_spill] sm:$0xff] %v6033_v42  ;;  %4646 = vmatmul.msk.f32.gmra.mxu0 %vm96_vm2, %v5747_v28  ;;  %v6064_v42 = vpop.permute.xlu2 %1885 }
 0x1d9   :  { %7458 = vst [vmem:[#allocation23_spill] sm:$0xff] %v6037_v49  ;;  %4656 = vmatmul.msk.f32.gmra.mxu2 %vm96_vm2, %v5747_v28 }
 0x1da   :  { %4651 = vmatmul.msk.f32.gmra.mxu1 %vm96_vm2, %v5747_v28  ;;  %4661 = vmatmul.msk.f32.gmra.mxu3 %vm96_vm2, %v5747_v28 }
 0x1dc   :  { %v1040_v32 = vpop.f32.mrf.mxu2 }
 0x1dd   :  { %v1201_v63 = vpop.f32.mrf.mxu3  ;;  %v6055_v29 = vadd.f32 %v1040_v32, %v684_v40  ;;  %v6060_v11 = vpop.f32.mrf.mxu0  ;;  %v687_v40 = vadd.f32 %v5841_v27, %v5640_v0  ;;  %v2692_v27 = vld.sshfl [vmem:[#allocation1 + $0x8] sm:$0xff pattern:$0x75316420] }
 0x1de   :  { %v6058_v43 = vadd.f32 %v1201_v63, %v5834_v24  ;;  %7460 = vst [vmem:[#allocation25_spill] sm:$0xff] %v6060_v11  ;;  %v1934_v24 = vsel %vm1929_vm6, %v1920_v39, %v1922_v20  ;;  %2704 = vrot.lane.b32.xlu2 %v2692_v27, %s4998_s26 }
 0x1df   :  { %v6062_v57 = vpop.f32.mrf.mxu1  ;;  %4688 = vmatpush.msk.msra.mxu1 %vm105_vm1, %v1934_v24  ;;  %2708 = vrot.lane.b32.xlu1 %v2694_v38, %s4998_s26 }
 0x1e0   :  { %7459 = vst [vmem:[#allocation24_spill] sm:$0xff] %v6058_v43  ;;  %4647 = vmatmul.msk.f32.gmra.mxu0 %vm96_vm2, %v5768_v60  ;;  %v1926_v11 = vpop.permute.xlu0 %1925  ;;  %v1924_v49 = vpop.permute.xlu2 %1923 }
 0x1e1   :  { %7461 = vst [vmem:[#allocation26_spill] sm:$0xff] %v6062_v57  ;;  %4657 = vmatmul.msk.f32.gmra.mxu2 %vm96_vm2, %v5768_v60  ;;  %v1935_v39 = vsel %vm1929_vm6, %v1922_v20, %v1924_v49  ;;  %v1936_v0 = vsel %vm1929_vm6, %v1924_v49, %v1926_v11 }
 0x1e2   :  { %4652 = vmatmul.msk.f32.gmra.mxu1 %vm96_vm2, %v5768_v60  ;;  %4662 = vmatmul.msk.f32.gmra.mxu3 %vm96_vm2, %v5768_v60 }
 0x1e3   :  { %4693 = vmatpush.msk.msra.mxu2 %vm105_vm1, %v1935_v39  ;;  %4698 = vmatpush.msk.msra.mxu3 %vm105_vm1, %v1936_v0 }
 0x1e4   :  { %v1043_v32 = vpop.f32.mrf.mxu2 }
 0x1e5   :  { %v1204_v63 = vpop.f32.mrf.mxu3  ;;  %v6081_v3 = vadd.f32 %v1043_v32, %v687_v40  ;;  %v6086_v18 = vpop.f32.mrf.mxu0 }
 0x1e6   :  { %v6084_v43 = vadd.f32 %v1204_v63, %v5865_v12  ;;  %7463 = vst [vmem:[#allocation28_spill] sm:$0xff] %v6086_v18  ;;  %v2664_v12 = vld [vmem:[%s7433_s0 + $0x10] sm:$0x77]  ;;  %v1928_v40 = vpop.permute.xlu1 %1927  ;;  %2673 = vrot.lane.b32.xlu2 %v5846_v21, %s4997_s25 }
 0x1e7   :  { %v6088_v57 = vpop.f32.mrf.mxu1  ;;  %2688 = vst [vmem:[#allocation1 + $0x20] ss:$2 sm:$0xff] %v2664_v12 }
 0x1e8   :  { %7462 = vst [vmem:[#allocation27_spill] sm:$0xff] %v6084_v43  ;;  %4664 = vmatmul.msk.f32.vlgmr.msrb.gmra.mxu0 %vm96_vm2, %v5715_v6 }
 0x1e9   :  { %4674 = vmatmul.msk.f32.vlgmr.msrb.gmra.mxu2 %vm96_vm2, %v5959_v51 }
 0x1ea   :  { %4669 = vmatmul.msk.f32.vlgmr.msrb.gmra.mxu1 %vm96_vm2, %v5959_v51  ;;  %4679 = vmatmul.msk.f32.vlgmr.msrb.gmra.mxu3 %vm96_vm2, %v5959_v51 }
 0x1eb   :  { %4708 = vmatpush.msk.msrb.mxu1 %vm105_vm1, %v1928_v40 }
 0x1ec   :  { %v6106_v38 = vpop.f32.mrf.mxu2 }
 0x1ed   :  { %v1311_v6 = vpop.f32.mrf.mxu3  ;;  %v6112_v20 = vpop.f32.mrf.mxu0 }
 0x1ee   :  { %v6110_v49 = vadd.f32 %v1311_v6, %v5894_v46  ;;  %7465 = vst [vmem:[#allocation30_spill] sm:$0xff] %v6112_v20  ;;  %v1937_v46 = vsel %vm1929_vm6, %v1926_v11, %v1928_v40  ;;  %v2695_v32 = vld.sshfl [vmem:[#allocation1 + $0x20] sm:$0xff pattern:$0x75316420]  ;;  %2677 = vrot.lane.b32.xlu2 %v5906_v59, %s4997_s25  ;;  %vm4032_vm6 = vcmask 506883   ;;  %s5006_s25 = smov 96  }
 0x1ef   :  { %v6114_v24 = vpop.f32.mrf.mxu1  ;;  %4703 = vmatpush.msk.msrb.mxu0 %vm105_vm1, %v1937_v46  ;;  %v2696_v63 = vld.sshfl [vmem:[#allocation1 + $0x28] sm:$0xff pattern:$0x75316420]  ;;  %2710 = vrot.lane.b32.xlu0 %v2695_v32, %s4998_s26 }
 0x1f0   :  { %7464 = vst [vmem:[#allocation29_spill] sm:$0xff] %v6110_v49  ;;  %4665 = vmatmul.msk.f32.gmra.mxu0 %vm96_vm2, %v5742_v54  ;;  %2712 = vrot.lane.b32.xlu1 %v2696_v63, %s4998_s26 }
 0x1f1   :  { %4675 = vmatmul.msk.f32.gmra.mxu2 %vm96_vm2, %v5993_v4 }
 0x1f2   :  { %4670 = vmatmul.msk.f32.gmra.mxu1 %vm96_vm2, %v5993_v4  ;;  %4680 = vmatmul.msk.f32.gmra.mxu3 %vm96_vm2, %v5993_v4 }
 0x1f4   :  { %v6127_v39 = vpop.f32.mrf.mxu2 }
 0x1f5   :  { %v1314_v54 = vpop.f32.mrf.mxu3  ;;  %v6134_v27 = vpop.f32.mrf.mxu0 }
 0x1f6   :  { %v6132_v0 = vadd.f32 %v1314_v54, %v5928_v35  ;;  %7467 = vst [vmem:[#allocation32_spill] sm:$0xff] %v6134_v27 }
 0x1f7   :  { %v6136_v12 = vpop.f32.mrf.mxu1 }
 0x1f8   :  { %7466 = vst [vmem:[#allocation31_spill] sm:$0xff] %v6132_v0  ;;  %4666 = vmatmul.msk.f32.gmra.mxu0 %vm96_vm2, %v5747_v28 }
 0x1f9   :  { %4676 = vmatmul.msk.f32.gmra.mxu2 %vm96_vm2, %v6064_v42 }
 0x1fa   :  { %4671 = vmatmul.msk.f32.gmra.mxu1 %vm96_vm2, %v6064_v42  ;;  %4681 = vmatmul.msk.f32.gmra.mxu3 %vm96_vm2, %v6064_v42 }
 0x1fc   :  { %v6148_v35 = vpop.f32.mrf.mxu2 }
 0x1fd   :  { %v1317_v11 = vpop.f32.mrf.mxu3  ;;  %v6153_v40 = vpop.f32.mrf.mxu0 }
 0x1fe   :  { %v6151_v6 = vadd.f32 %v1317_v11, %v5950_v41  ;;  %7469 = vst [vmem:[#allocation34_spill] sm:$0xff] %v6153_v40 }
 0x1ff   :  { %v6155_v46 = vpop.f32.mrf.mxu1 }
 0x200   :  { %7468 = vst [vmem:[#allocation33_spill] sm:$0xff] %v6151_v6  ;;  %4667 = vmatmul.msk.f32.gmra.mxu0 %vm96_vm2, %v5768_v60  ;;  %v2306_v60 = vpop.permute.xlu2 %2305  ;;  %v2308_v11 = vpop.permute.xlu0 %2307 }
 0x201   :  { %4677 = vmatmul.msk.f32.gmra.mxu2 %vm96_vm2, %v6067_v22  ;;  %v2326_v6 = vsel %vm2325_vm7, %v2306_v60, %v2308_v11 }
 0x202   :  { %4672 = vmatmul.msk.f32.gmra.mxu1 %vm96_vm2, %v6067_v22  ;;  %4682 = vmatmul.msk.f32.gmra.mxu3 %vm96_vm2, %v6067_v22 }
 0x203   :  { %4713 = vmatpush.msk.msrb.mxu2 %vm105_vm1, %v2326_v6 }
 0x204   :  { %v6167_v28 = vpop.f32.mrf.mxu2 }
 0x205   :  { %v1320_v41 = vpop.f32.mrf.mxu3  ;;  %v6172_v63 = vpop.f32.mrf.mxu0 }
 0x206   :  { %v6170_v32 = vadd.f32 %v1320_v41, %v5978_v1  ;;  %7471 = vst [vmem:[#allocation36_spill] sm:$0xff] %v6172_v63  ;;  %v2310_v0 = vpop.permute.xlu1 %2309  ;;  %v2665_v1 = vld [vmem:[%s7433_s0 + $0x18] sm:$0x77]  ;;  %v2666_v41 = vld [vmem:[%s7433_s0 + $0x20] sm:$0x77] }
 0x207   :  { %v6174_v54 = vpop.f32.mrf.mxu1  ;;  %v2327_v49 = vsel %vm2325_vm7, %v2308_v11, %v2310_v0  ;;  %2690 = vst [vmem:[#allocation1 + $0x30] ss:$2 sm:$0xff] %v2665_v1 }
 0x208   :  { %7470 = vst [vmem:[#allocation35_spill] sm:$0xff] %v6170_v32  ;;  %4684 = vmatmul.msk.f32.vlgmr.msra.gmra.mxu0 %vm96_vm2, %v5959_v51  ;;  %4718 = vmatpush.msk.msrb.mxu3 %vm105_vm1, %v2327_v49  ;;  %v2312_v49 = vpop.permute.xlu0 %2311 }
 0x209   :  { %4694 = vmatmul.msk.f32.vlgmr.msra.gmra.mxu2 %vm96_vm2, %v5959_v51  ;;  %2699 = vst [vmem:[#allocation1] ss:$2 sm:$0xff] %v2666_v41  ;;  %v2328_v63 = vsel %vm2325_vm7, %v2310_v0, %v2312_v49 }
 0x20a   :  { %4689 = vmatmul.msk.f32.vlgmr.msra.gmra.mxu1 %vm96_vm2, %v5959_v51  ;;  %4699 = vmatmul.msk.f32.vlgmr.msra.gmra.mxu3 %vm96_vm2, %v5959_v51 }
 0x20b   :  { %4723 = vmatpush.msk.msra.mxu0 %vm105_vm1, %v2328_v63 }
 0x20c   :  { %v6194_v60 = vpop.f32.mrf.mxu2 }
 0x20d   :  { %v1427_v11 = vpop.f32.mrf.mxu3  ;;  %v6199_v43 = vpop.f32.mrf.mxu0 }
 0x20e   :  { %v6197_v32 = vadd.f32 %v1427_v11, %v6006_v30  ;;  %7473 = vst [vmem:[#allocation38_spill] sm:$0xff] %v6199_v43  ;;  %v6212_v30 = vpop.permute.xlu2 %2274  ;;  %v2698_v1 = vld.sshfl [vmem:[#allocation1 + $0x38] sm:$0xff pattern:$0x75316420] }
 0x20f   :  { %v6201_v6 = vpop.f32.mrf.mxu1  ;;  %v2697_v41 = vld.sshfl [vmem:[#allocation1 + $0x30] sm:$0xff pattern:$0x75316420]  ;;  %2716 = vrot.lane.b32.xlu0 %v2698_v1, %s4998_s26 }
 0x210   :  { %7472 = vst [vmem:[#allocation37_spill] sm:$0xff] %v6197_v32  ;;  %4685 = vmatmul.msk.f32.gmra.mxu0 %vm96_vm2, %v5993_v4  ;;  %2714 = vrot.lane.b32.xlu2 %v2697_v41, %s4998_s26  ;;  %v2700_v32 = vld.sshfl [vmem:[#allocation1] sm:$0xff pattern:$0x75316420] }
 0x211   :  { %4695 = vmatmul.msk.f32.gmra.mxu2 %vm96_vm2, %v5993_v4  ;;  %2718 = vrot.lane.b32.xlu1 %v2700_v32, %s4998_s26  ;;  %v2701_v63 = vld.sshfl [vmem:[#allocation1 + $0x8] sm:$0xff pattern:$0x75316420]  ;;  %v3059_v32 = vld [vmem:[%s7433_s0] sm:$0x77] }
 0x212   :  { %4690 = vmatmul.msk.f32.gmra.mxu1 %vm96_vm2, %v5993_v4  ;;  %4700 = vmatmul.msk.f32.gmra.mxu3 %vm96_vm2, %v5993_v4  ;;  %3081 = vst [vmem:[#allocation1] ss:$2 sm:$0xff] %v3059_v32 }
 0x214   :  { %v6215_v11 = vpop.f32.mrf.mxu2 }
 0x215   :  { %v1430_v0 = vpop.f32.mrf.mxu3  ;;  %v6222_v40 = vpop.f32.mrf.mxu0 }
 0x216   :  { %v6220_v43 = vadd.f32 %v1430_v0, %v6030_v26  ;;  %7475 = vst [vmem:[#allocation40_spill] sm:$0xff] %v6222_v40  ;;  %v6235_v26 = vpop.permute.xlu1 %2276  ;;  %v6237_v1 = vpop.permute.xlu2 %2278 }
 0x217   :  { %v6224_v27 = vpop.f32.mrf.mxu1  ;;  %v2314_v18 = vpop.permute.xlu0 %2313 }
 0x218   :  { %7474 = vst [vmem:[#allocation39_spill] sm:$0xff] %v6220_v43  ;;  %4686 = vmatmul.msk.f32.gmra.mxu0 %vm96_vm2, %v6064_v42  ;;  %2720 = vrot.lane.b32.xlu2 %v2701_v63, %s4998_s26  ;;  %s5008_s26 = smov 80  }
 0x219   :  { %7476 = vst [vmem:[#allocation41_spill] sm:$0xff] %v6224_v27  ;;  %4696 = vmatmul.msk.f32.gmra.mxu2 %vm96_vm2, %v6064_v42  ;;  %v2329_v27 = vsel %vm2325_vm7, %v2312_v49, %v2314_v18  ;;  %v3089_v49 = vld.sshfl [vmem:[#allocation1 + $0x8] sm:$0xff pattern:$0x75316420] }
 0x21a   :  { %4691 = vmatmul.msk.f32.gmra.mxu1 %vm96_vm2, %v6064_v42  ;;  %4701 = vmatmul.msk.f32.gmra.mxu3 %vm96_vm2, %v6064_v42 }
 0x21b   :  { %4728 = vmatpush.msk.msra.mxu1 %vm105_vm1, %v2329_v27  ;;  %3101 = vrot.lane.b32.xlu1 %v3089_v49, %s4999_s16  ;;  %v533_v49 = vadd.f32 %v5662_v16, %v5419_v45 }
 0x21c   :  { %v6242_v41 = vpop.f32.mrf.mxu2 }
 0x21d   :  { %7477 = vst [vmem:[#allocation42_spill] sm:$0xff] %v6242_v41  ;;  %v1433_v0 = vpop.f32.mrf.mxu3  ;;  %v6248_v40 = vpop.f32.mrf.mxu0 }
 0x21e   :  { %v6246_v43 = vadd.f32 %v1433_v0, %v6055_v29  ;;  %7479 = vst [vmem:[#allocation44_spill] sm:$0xff] %v6248_v40  ;;  %v6261_v29 = vpop.permute.xlu1 %2280  ;;  %v2316_v63 = vpop.permute.xlu2 %2315  ;;  %v3088_v0 = vld.sshfl [vmem:[#allocation1] sm:$0xff pattern:$0x75316420] }
 0x21f   :  { %v6250_v20 = vpop.f32.mrf.mxu1  ;;  %v2330_v32 = vsel %vm2325_vm7, %v2314_v18, %v2316_v63  ;;  %3099 = vrot.lane.b32.xlu0 %v3088_v0, %s4999_s16 }
 0x220   :  { %7478 = vst [vmem:[#allocation43_spill] sm:$0xff] %v6246_v43  ;;  %4687 = vmatmul.msk.f32.gmra.mxu0 %vm96_vm2, %v6067_v22  ;;  %4733 = vmatpush.msk.msra.mxu2 %vm105_vm1, %v2330_v32  ;;  %v2318_v32 = vpop.permute.xlu0 %2317 }
 0x221   :  { %7480 = vst [vmem:[#allocation45_spill] sm:$0xff] %v6250_v20  ;;  %4697 = vmatmul.msk.f32.gmra.mxu2 %vm96_vm2, %v6067_v22  ;;  %v3060_v20 = vld [vmem:[%s7433_s0 + $0x8] sm:$0x77]  ;;  %3068 = vrot.lane.b32.xlu2 %v5911_v56, %s5000_s20  ;;  %v2331_v0 = vsel %vm2325_vm7, %v2316_v63, %v2318_v32 }
 0x222   :  { %4692 = vmatmul.msk.f32.gmra.mxu1 %vm96_vm2, %v6067_v22  ;;  %4702 = vmatmul.msk.f32.gmra.mxu3 %vm96_vm2, %v6067_v22  ;;  %3083 = vst [vmem:[#allocation1 + $0x10] ss:$2 sm:$0xff] %v3060_v20  ;;  %v1049_v20 = vadd.f32 %v5872_v31, %v533_v49 }
 0x223   :  { %4738 = vmatpush.msk.msra.mxu3 %vm105_vm1, %v2331_v0 }
 0x224   :  { %v6266_v43 = vpop.f32.mrf.mxu2 }
 0x225   :  { %v1436_v40 = vpop.f32.mrf.mxu3  ;;  %v6276_v18 = vpop.f32.mrf.mxu0 }
 0x226   :  { %v6274_v27 = vadd.f32 %v1436_v40, %v6081_v3  ;;  %v1048_v3 = vadd.f32 %v5870_v33, %v5593_v2  ;;  %v2320_v45 = vpop.permute.xlu1 %2319 }
 0x227   :  { %v6278_v41 = vpop.f32.mrf.mxu1  ;;  %v2332_v16 = vsel %vm2325_vm7, %v2318_v32, %v2320_v45  ;;  %3070 = vrot.lane.b32.xlu0 %v5846_v21, %s5000_s20  ;;  %v1057_v21 = vadd.f32 %v5899_v36, %v5613_v14 }
 0x228   :  { %7481 = vst [vmem:[#allocation46_spill] sm:$0xff] %v6274_v27  ;;  %4704 = vmatmul.msk.f32.vlgmr.msrb.gmra.mxu0 %vm96_vm2, %v5959_v51  ;;  %v1441_v56 = vadd.f32 %v6088_v57, %v1048_v3  ;;  %v536_v57 = vadd.f32 %v5687_v7, %v5438_v50 }
 0x229   :  { %4714 = vmatmul.msk.f32.vlgmr.msrb.gmra.mxu2 %vm96_vm2, %v6212_v30  ;;  %4743 = vmatpush.msk.msrb.mxu0 %vm105_vm1, %v2332_v16  ;;  %v3090_v31 = vld.sshfl [vmem:[#allocation1 + $0x10] sm:$0xff pattern:$0x75316420]  ;;  %v1450_v50 = vadd.f32 %v6114_v24, %v1057_v21 }
 0x22a   :  { %4709 = vmatmul.msk.f32.vlgmr.msrb.gmra.mxu1 %vm96_vm2, %v5959_v51  ;;  %4719 = vmatmul.msk.f32.vlgmr.msrb.gmra.mxu3 %vm96_vm2, %v6212_v30  ;;  %v1442_v51 = vadd.f32 %v6106_v38, %v1049_v20  ;;  %v1058_v38 = vadd.f32 %v5901_v62, %v536_v57  ;;  %v3061_v24 = vld [vmem:[%s7433_s0 + $0x10] sm:$0x77]  ;;  %v1075_v57 = vadd.f32 %v5955_v23, %v5660_v58 }
 0x22b   :  { %3103 = vrot.lane.b32.xlu1 %v3090_v31, %s4999_s16  ;;  %3072 = vrot.lane.b32.xlu2 %v5739_v8, %s5000_s20  ;;  %v3091_v8 = vld.sshfl [vmem:[#allocation1 + $0x18] sm:$0xff pattern:$0x75316420]  ;;  %3085 = vst [vmem:[#allocation1 + $0x20] ss:$2 sm:$0xff] %v3061_v24 }
 0x22c   :  { %v1646_v2 = vpop.f32.mrf.mxu2  ;;  %v1451_v7 = vadd.f32 %v6127_v39, %v1058_v38  ;;  %v539_v39 = vadd.f32 %v5707_v25, %v5456_v55  ;;  %v3062_v24 = vld [vmem:[%s7433_s0 + $0x18] sm:$0x77] }
 0x22d   :  { %v1675_v33 = vpop.f32.mrf.mxu3  ;;  %v6303_v40 = vadd.f32 %v1646_v2, %v1441_v56  ;;  %v6307_v49 = vpop.f32.mrf.mxu0  ;;  %3087 = vst [vmem:[#allocation1 + $0x30] ss:$2 sm:$0xff] %v3062_v24 }
 0x22e   :  { %v6305_v63 = vadd.f32 %v1675_v33, %v1442_v51  ;;  %v1067_v20 = vadd.f32 %v5935_v19, %v539_v39  ;;  %v2322_v19 = vpop.permute.xlu2 %2321 }
 0x22f   :  { %v6309_v0 = vpop.f32.mrf.mxu1  ;;  %3074 = vrot.lane.b32.xlu0 %v5906_v59, %s5000_s20  ;;  %v1066_v59 = vadd.f32 %v5933_v5, %v5638_v34 }
 0x230   :  { %7482 = vst [vmem:[#allocation47_spill] sm:$0xff] %v6305_v63  ;;  %4705 = vmatmul.msk.f32.gmra.mxu0 %vm96_vm2, %v5993_v4  ;;  %v1460_v55 = vadd.f32 %v6148_v35, %v1067_v20  ;;  %v2333_v35 = vsel %vm2325_vm7, %v2320_v45, %v2322_v19  ;;  %v652_v20 = vadd.f32 %v5796_v37, %v5519_v17 }
 0x231   :  { %4715 = vmatmul.msk.f32.gmra.mxu2 %vm96_vm2, %v6235_v26  ;;  %v1459_v16 = vadd.f32 %v6136_v12, %v1066_v59  ;;  %v542_v12 = vadd.f32 %v5732_v48, %v5476_v61  ;;  %4748 = vmatpush.msk.msrb.mxu1 %vm105_vm1, %v2333_v35  ;;  %v1468_v61 = vadd.f32 %v6155_v46, %v1075_v57 }
 0x232   :  { %4710 = vmatmul.msk.f32.gmra.mxu1 %vm96_vm2, %v5993_v4  ;;  %4720 = vmatmul.msk.f32.gmra.mxu3 %vm96_vm2, %v6235_v26  ;;  %v3093_v5 = vld.sshfl [vmem:[#allocation1 + $0x28] sm:$0xff pattern:$0x75316420] }
 0x233   :  { %3105 = vrot.lane.b32.xlu1 %v3091_v8, %s4999_s16  ;;  %v1076_v21 = vadd.f32 %v5957_v53, %v542_v12 }
 0x234   :  { %v1649_v32 = vpop.f32.mrf.mxu2 }
 0x235   :  { %v1678_v3 = vpop.f32.mrf.mxu3  ;;  %v6331_v4 = vadd.f32 %v1649_v32, %v1450_v50  ;;  %v6335_v36 = vpop.f32.mrf.mxu0  ;;  %v1469_v48 = vadd.f32 %v6167_v28, %v1076_v21  ;;  %v649_v50 = vadd.f32 %v5764_v15, %v5499_v9  ;;  %v1052_v28 = vadd.f32 %v5983_v10, %v5685_v44 }
 0x236   :  { %v6333_v14 = vadd.f32 %v1678_v3, %v1451_v7  ;;  %v3092_v3 = vld.sshfl [vmem:[#allocation1 + $0x20] sm:$0xff pattern:$0x75316420] }
 0x237   :  { %v6337_v62 = vpop.f32.mrf.mxu1  ;;  %3109 = vrot.lane.b32.xlu0 %v3093_v5, %s4999_s16  ;;  %v1053_v32 = vadd.f32 %v5985_v52, %v649_v50  ;;  %v1445_v9 = vadd.f32 %v6174_v54, %v1052_v28  ;;  %3107 = vrot.lane.b32.xlu2 %v3092_v3, %s4999_s16  ;;  %v3063_v52 = vld [vmem:[%s7433_s0 + $0x20] sm:$0x77]  ;;  %s5007_s0 = smov 38  }
 0x238   :  { %4706 = vmatmul.msk.f32.gmra.mxu0 %vm96_vm2, %v6064_v42  ;;  %v2705_v8 = vpop.permute.xlu2 %2704  ;;  %3096 = vst [vmem:[#allocation1] ss:$2 sm:$0xff] %v3063_v52 }
 0x239   :  { %4716 = vmatmul.msk.f32.gmra.mxu2 %vm96_vm2, %v6237_v1  ;;  %v2324_v33 = vpop.permute.xlu0 %2323  ;;  %v1446_v15 = vadd.f32 %v6194_v60, %v1053_v32  ;;  %v7490_v32 = vld [vmem:[#allocation41_spill] sm:$0xff] }
 0x23a   :  { %4711 = vmatmul.msk.f32.gmra.mxu1 %vm96_vm2, %v6064_v42  ;;  %4721 = vmatmul.msk.f32.gmra.mxu3 %vm96_vm2, %v6237_v1  ;;  %v2334_v31 = vsel %vm2325_vm7, %v2322_v19, %v2324_v33  ;;  %v3094_v19 = vld.sshfl [vmem:[#allocation1 + $0x30] sm:$0xff pattern:$0x75316420] }
 0x23b   :  { %4753 = vmatpush.msk.msrb.mxu2 %vm105_vm1, %v2334_v31  ;;  %3111 = vrot.lane.b32.xlu1 %v3094_v19, %s4999_s16  ;;  %v7496_v19 = vld [vmem:[#allocation25_spill] sm:$0xff] }
 0x23c   :  { %v1652_v25 = vpop.f32.mrf.mxu2 }
 0x23d   :  { %v1681_v56 = vpop.f32.mrf.mxu3  ;;  %v6358_v51 = vadd.f32 %v1652_v25, %v1459_v16  ;;  %v6362_v2 = vpop.f32.mrf.mxu0 }
 0x23e   :  { %v6360_v42 = vadd.f32 %v1681_v56, %v1460_v55  ;;  %v7484_v55 = vld [vmem:[#allocation7_spill] sm:$0xff]  ;;  %v1062_v56 = vadd.f32 %v6013_v47, %v652_v20 }
 0x23f   :  { %v6364_v34 = vpop.f32.mrf.mxu1  ;;  %v1061_v25 = vadd.f32 %v6011_v13, %v7484_v55  ;;  %v3097_v13 = vld.sshfl [vmem:[#allocation1] sm:$0xff pattern:$0x75316420] }
 0x240   :  { %4707 = vmatmul.msk.f32.gmra.mxu0 %vm96_vm2, %v6067_v22  ;;  %v1455_v5 = vadd.f32 %v6215_v11, %v1062_v56  ;;  %3115 = vrot.lane.b32.xlu0 %v3097_v13, %s4999_s16  ;;  %v7486_v11 = vld [vmem:[#allocation12_spill] sm:$0xff]  ;;  %v6471_v24 = vpop.permute.xlu2 %2673  ;;  %v7493_v56 = vld [vmem:[#allocation6_spill] sm:$0xff] }
 0x241   :  { %4717 = vmatmul.msk.f32.gmra.mxu2 %vm96_vm2, %v6261_v29  ;;  %v2703_v7 = vpop.permute.xlu1 %2702  ;;  %v1454_v37 = vadd.f32 %v6201_v6, %v1061_v25  ;;  %v6453_v21 = vpop.permute.xlu0 %2671  ;;  %v7485_v6 = vld [vmem:[#allocation5_spill] sm:$0xff] }
 0x242   :  { %4712 = vmatmul.msk.f32.gmra.mxu1 %vm96_vm2, %v6067_v22  ;;  %4722 = vmatmul.msk.f32.gmra.mxu3 %vm96_vm2, %v6261_v29  ;;  %v2723_v46 = vsel %vm2722_vm8, %v2703_v7, %v2705_v8  ;;  %v3098_v7 = vld.sshfl [vmem:[#allocation1 + $0x8] sm:$0xff pattern:$0x75316420] }
 0x243   :  { %4758 = vmatpush.msk.msrb.mxu3 %vm105_vm1, %v2723_v46  ;;  %3117 = vrot.lane.b32.xlu1 %v3098_v7, %s4999_s16 }
 0x244   :  { %v1655_v22 = vpop.f32.mrf.mxu2 }
 0x245   :  { %v1684_v45 = vpop.f32.mrf.mxu3  ;;  %v6386_v38 = vadd.f32 %v1655_v22, %v1468_v61  ;;  %v6390_v23 = vpop.f32.mrf.mxu0  ;;  %v655_v61 = vadd.f32 %v7486_v11, %v7485_v6  ;;  %v7488_v22 = vld [vmem:[#allocation22_spill] sm:$0xff]  ;;  %v7498_v6 = vld [vmem:[#allocation45_spill] sm:$0xff] }
 0x246   :  { %v6388_v58 = vadd.f32 %v1684_v45, %v1469_v48  ;;  %v7487_v48 = vld [vmem:[#allocation8_spill] sm:$0xff] }
 0x247   :  { %v6392_v53 = vpop.f32.mrf.mxu1  ;;  %v1070_v45 = vadd.f32 %v7488_v22, %v7487_v48 }
 0x248   :  { %7483 = vst [vmem:[#allocation48_spill] sm:$0xff] %v6388_v58  ;;  %4724 = vmatmul.msk.f32.vlgmr.msra.gmra.mxu0 %vm96_vm2, %v6212_v30  ;;  %v6500_v48 = vpop.permute.xlu2 %2677 }
 0x249   :  { %4734 = vmatmul.msk.f32.vlgmr.msra.gmra.mxu2 %vm96_vm2, %v6212_v30  ;;  %v2707_v16 = vpop.permute.xlu1 %2706 }
 0x24a   :  { %4729 = vmatmul.msk.f32.vlgmr.msra.gmra.mxu1 %vm96_vm2, %v6212_v30  ;;  %4739 = vmatmul.msk.f32.vlgmr.msra.gmra.mxu3 %vm96_vm2, %v6212_v30  ;;  %v2724_v17 = vsel %vm2722_vm8, %v2705_v8, %v2707_v16  ;;  %v7489_v8 = vld [vmem:[#allocation23_spill] sm:$0xff] }
 0x24b   :  { %4763 = vmatpush.msk.msra.mxu0 %vm105_vm1, %v2724_v17  ;;  %v1071_v50 = vadd.f32 %v7489_v8, %v655_v61  ;;  %v7494_v17 = vld [vmem:[#allocation14_spill] sm:$0xff] }
 0x24c   :  { %v1762_v44 = vpop.f32.mrf.mxu2 }
 0x24d   :  { %v1791_v10 = vpop.f32.mrf.mxu3  ;;  %v6418_v39 = vadd.f32 %v1762_v44, %v1445_v9  ;;  %v6422_v54 = vpop.f32.mrf.mxu0  ;;  %v1463_v9 = vadd.f32 %v7490_v32, %v1070_v45 }
 0x24e   :  { %v6420_v59 = vadd.f32 %v1791_v10, %v1446_v15  ;;  %v7491_v15 = vld [vmem:[#allocation42_spill] sm:$0xff] }
 0x24f   :  { %v6424_v60 = vpop.f32.mrf.mxu1  ;;  %v1464_v3 = vadd.f32 %v7491_v15, %v1071_v50 }
 0x250   :  { %4725 = vmatmul.msk.f32.gmra.mxu0 %vm96_vm2, %v6235_v26 }
 0x251   :  { %4735 = vmatmul.msk.f32.gmra.mxu2 %vm96_vm2, %v6235_v26  ;;  %v2709_v46 = vpop.permute.xlu1 %2708 }
 0x252   :  { %4730 = vmatmul.msk.f32.gmra.mxu1 %vm96_vm2, %v6235_v26  ;;  %4740 = vmatmul.msk.f32.gmra.mxu3 %vm96_vm2, %v6235_v26  ;;  %v2725_v28 = vsel %vm2722_vm8, %v2707_v16, %v2709_v46  ;;  %v6483_v16 = vpop.permute.xlu0 %2675 }
 0x253   :  { %4768 = vmatpush.msk.msra.mxu1 %vm105_vm1, %v2725_v28 }
 0x254   :  { %v1765_v33 = vpop.f32.mrf.mxu2 }
 0x255   :  { %v1794_v12 = vpop.f32.mrf.mxu3  ;;  %v6444_v47 = vadd.f32 %v1765_v33, %v1454_v37  ;;  %v6448_v31 = vpop.f32.mrf.mxu0  ;;  %v658_v37 = vadd.f32 %v7494_v17, %v7493_v56  ;;  %v3095_v56 = vld.sshfl [vmem:[#allocation1 + $0x38] sm:$0xff pattern:$0x75316420] }
 0x256   :  { %v6446_v35 = vadd.f32 %v1794_v12, %v1455_v5  ;;  %v7495_v5 = vld [vmem:[#allocation9_spill] sm:$0xff]  ;;  %v7497_v12 = vld [vmem:[#allocation26_spill] sm:$0xff]  ;;  %3113 = vrot.lane.b32.xlu2 %v3095_v56, %s4999_s16  ;;  %s5021_s16 = smov 2  }
 0x257   :  { %v6450_v57 = vpop.f32.mrf.mxu1  ;;  %v1079_v33 = vadd.f32 %v7496_v19, %v7495_v5  ;;  %v1080_v13 = vadd.f32 %v7497_v12, %v658_v37 }
 0x258   :  { %4726 = vmatmul.msk.f32.gmra.mxu0 %vm96_vm2, %v6237_v1 }
 0x259   :  { %4736 = vmatmul.msk.f32.gmra.mxu2 %vm96_vm2, %v6237_v1  ;;  %v1472_v11 = vadd.f32 %v7498_v6, %v1079_v33  ;;  %v1473_v61 = vadd.f32 %v6266_v43, %v1080_v13  ;;  %v7500_v43 = vld [vmem:[#allocation10_spill] sm:$0xff] }
 0x25a   :  { %4731 = vmatmul.msk.f32.gmra.mxu1 %vm96_vm2, %v6237_v1  ;;  %4741 = vmatmul.msk.f32.gmra.mxu3 %vm96_vm2, %v6237_v1  ;;  %v7504_v6 = vld [vmem:[#allocation30_spill] sm:$0xff] }
 0x25c   :  { %v1768_v44 = vpop.f32.mrf.mxu2 }
 0x25d   :  { %v1797_v10 = vpop.f32.mrf.mxu3  ;;  %v6475_v52 = vadd.f32 %v1768_v44, %v1463_v9  ;;  %v6479_v55 = vpop.f32.mrf.mxu0  ;;  %v7501_v44 = vld [vmem:[#allocation28_spill] sm:$0xff] }
 0x25e   :  { %v6477_v20 = vadd.f32 %v1797_v10, %v1464_v3  ;;  %v1440_v10 = vadd.f32 %v7501_v44, %v7500_v43 }
 0x25f   :  { %v6481_v25 = vpop.f32.mrf.mxu1 }
 0x260   :  { %7492 = vst [vmem:[#allocation7_spill] sm:$0xff] %v6477_v20  ;;  %4727 = vmatmul.msk.f32.gmra.mxu0 %vm96_vm2, %v6261_v29 }
 0x261   :  { %4737 = vmatmul.msk.f32.gmra.mxu2 %vm96_vm2, %v6261_v29  ;;  %v2711_v32 = vpop.permute.xlu0 %2710 }
 0x262   :  { %4732 = vmatmul.msk.f32.gmra.mxu1 %vm96_vm2, %v6261_v29  ;;  %4742 = vmatmul.msk.f32.gmra.mxu3 %vm96_vm2, %v6261_v29  ;;  %v2713_v9 = vpop.permute.xlu1 %2712  ;;  %v2726_v15 = vsel %vm2722_vm8, %v2709_v46, %v2711_v32  ;;  %v1833_v46 = vadd.f32 %v6278_v41, %v1440_v10  ;;  %v7503_v41 = vld [vmem:[#allocation11_spill] sm:$0xff] }
 0x263   :  { %v2727_v3 = vsel %vm2722_vm8, %v2711_v32, %v2713_v9  ;;  %4773 = vmatpush.msk.msra.mxu2 %vm105_vm1, %v2726_v15 }
 0x264   :  { %v1771_v22 = vpop.f32.mrf.mxu2  ;;  %4778 = vmatpush.msk.msra.mxu3 %vm105_vm1, %v2727_v3  ;;  %v7507_v3 = vld [vmem:[#allocation32_spill] sm:$0xff] }
 0x265   :  { %v1800_v45 = vpop.f32.mrf.mxu3  ;;  %v6502_v8 = vadd.f32 %v1771_v22, %v1472_v11  ;;  %v6506_v7 = vpop.f32.mrf.mxu0  ;;  %v1449_v11 = vadd.f32 %v7504_v6, %v7503_v41 }
 0x266   :  { %v6504_v50 = vadd.f32 %v1800_v45, %v1473_v61 }
 0x267   :  { %v6508_v28 = vpop.f32.mrf.mxu1 }
 0x268   :  { %7499 = vst [vmem:[#allocation5_spill] sm:$0xff] %v6504_v50  ;;  %4744 = vmatmul.msk.f32.vlgmr.msrb.gmra.mxu0 %vm96_vm2, %v6212_v30 }
 0x269   :  { %4754 = vmatmul.msk.f32.vlgmr.msrb.gmra.mxu2 %vm96_vm2, %v6212_v30 }
 0x26a   :  { %4749 = vmatmul.msk.f32.vlgmr.msrb.gmra.mxu1 %vm96_vm2, %v6212_v30  ;;  %4759 = vmatmul.msk.f32.vlgmr.msrb.gmra.mxu3 %vm96_vm2, %v6453_v21  ;;  %v2715_v12 = vpop.permute.xlu2 %2714 }
 0x26b   :  { %v2728_v13 = vsel %vm2722_vm8, %v2713_v9, %v2715_v12 }
 0x26c   :  { %v2010_v17 = vpop.f32.mrf.mxu2  ;;  %4783 = vmatpush.msk.msrb.mxu0 %vm105_vm1, %v2728_v13 }
 0x26d   :  { %v2039_v37 = vpop.f32.mrf.mxu3  ;;  %v6526_v5 = vadd.f32 %v2010_v17, %v1833_v46  ;;  %v6531_v30 = vpop.f32.mrf.mxu0 }
 0x26e   :  { %v6529_v19 = vadd.f32 %v2039_v37, %v6303_v40  ;;  %v1842_v40 = vadd.f32 %v6309_v0, %v1449_v11  ;;  %v7510_v37 = vld [vmem:[#allocation34_spill] sm:$0xff] }
 0x26f   :  { %v6533_v33 = vpop.f32.mrf.mxu1 }
 0x270   :  { %7502 = vst [vmem:[#allocation12_spill] sm:$0xff] %v6529_v19  ;;  %4745 = vmatmul.msk.f32.gmra.mxu0 %vm96_vm2, %v6235_v26 }
 0x271   :  { %4755 = vmatmul.msk.f32.gmra.mxu2 %vm96_vm2, %v6235_v26 }
 0x272   :  { %4750 = vmatmul.msk.f32.gmra.mxu1 %vm96_vm2, %v6235_v26  ;;  %4760 = vmatmul.msk.f32.gmra.mxu3 %vm96_vm2, %v6471_v24  ;;  %v7506_v26 = vld [vmem:[#allocation13_spill] sm:$0xff] }
 0x273   :  { %v1458_v0 = vadd.f32 %v7507_v3, %v7506_v26  ;;  %v2721_v26 = vpop.permute.xlu2 %2720 }
 0x274   :  { %v2013_v61 = vpop.f32.mrf.mxu2 }
 0x275   :  { %v2042_v22 = vpop.f32.mrf.mxu3  ;;  %v6548_v45 = vadd.f32 %v2013_v61, %v1842_v40  ;;  %v6553_v9 = vpop.f32.mrf.mxu0 }
 0x276   :  { %v6551_v32 = vadd.f32 %v2042_v22, %v6331_v4  ;;  %7505 = vst [vmem:[#allocation8_spill] sm:$0xff] %v6553_v9  ;;  %v1851_v4 = vadd.f32 %v6337_v62, %v1458_v0  ;;  %v7512_v0 = vld [vmem:[#allocation16_spill] sm:$0xff] }
 0x277   :  { %v6555_v15 = vpop.f32.mrf.mxu1 }
 0x278   :  { %4746 = vmatmul.msk.f32.gmra.mxu0 %vm96_vm2, %v6237_v1 }
 0x279   :  { %4756 = vmatmul.msk.f32.gmra.mxu2 %vm96_vm2, %v6237_v1 }
 0x27a   :  { %4751 = vmatmul.msk.f32.gmra.mxu1 %vm96_vm2, %v6237_v1  ;;  %4761 = vmatmul.msk.f32.gmra.mxu3 %vm96_vm2, %v6483_v16  ;;  %v7509_v1 = vld [vmem:[#allocation15_spill] sm:$0xff] }
 0x27b   :  { %v1467_v62 = vadd.f32 %v7510_v37, %v7509_v1 }
 0x27c   :  { %v2016_v43 = vpop.f32.mrf.mxu2 }
 0x27d   :  { %v2045_v44 = vpop.f32.mrf.mxu3  ;;  %v6568_v10 = vadd.f32 %v2016_v43, %v1851_v4  ;;  %v6573_v56 = vpop.f32.mrf.mxu0  ;;  %v7513_v4 = vld [vmem:[#allocation36_spill] sm:$0xff] }
 0x27e   :  { %v6571_v46 = vadd.f32 %v2045_v44, %v6358_v51  ;;  %7508 = vst [vmem:[#allocation22_spill] sm:$0xff] %v6573_v56  ;;  %v1860_v51 = vadd.f32 %v6364_v34, %v1467_v62  ;;  %v1444_v43 = vadd.f32 %v7513_v4, %v7512_v0 }
 0x27f   :  { %v6575_v17 = vpop.f32.mrf.mxu1 }
 0x280   :  { %4747 = vmatmul.msk.f32.gmra.mxu0 %vm96_vm2, %v6261_v29 }
 0x281   :  { %4757 = vmatmul.msk.f32.gmra.mxu2 %vm96_vm2, %v6261_v29  ;;  %v2717_v22 = vpop.permute.xlu0 %2716 }
 0x282   :  { %4752 = vmatmul.msk.f32.gmra.mxu1 %vm96_vm2, %v6261_v29  ;;  %4762 = vmatmul.msk.f32.gmra.mxu3 %vm96_vm2, %v6500_v48  ;;  %v2729_v29 = vsel %vm2722_vm8, %v2715_v12, %v2717_v22  ;;  %v1837_v12 = vadd.f32 %v6392_v53, %v1444_v43  ;;  %v7514_v53 = vld [vmem:[#allocation17_spill] sm:$0xff] }
 0x283   :  { %v2719_v3 = vpop.permute.xlu1 %2718  ;;  %4788 = vmatpush.msk.msrb.mxu1 %vm105_vm1, %v2729_v29 }
 0x284   :  { %v2019_v13 = vpop.f32.mrf.mxu2  ;;  %v2730_v34 = vsel %vm2722_vm8, %v2717_v22, %v2719_v3 }
 0x285   :  { %v2048_v41 = vpop.f32.mrf.mxu3  ;;  %v6588_v6 = vadd.f32 %v2019_v13, %v1860_v51  ;;  %v6593_v40 = vpop.f32.mrf.mxu0  ;;  %4793 = vmatpush.msk.msrb.mxu2 %vm105_vm1, %v2730_v34 }
 0x286   :  { %v6591_v11 = vadd.f32 %v2048_v41, %v6386_v38  ;;  %7511 = vst [vmem:[#allocation23_spill] sm:$0xff] %v6593_v40  ;;  %v2731_v38 = vsel %vm2722_vm8, %v2719_v3, %v2721_v26  ;;  %v7515_v41 = vld [vmem:[#allocation38_spill] sm:$0xff] }
 0x287   :  { %v6595_v61 = vpop.f32.mrf.mxu1  ;;  %4798 = vmatpush.msk.msrb.mxu3 %vm105_vm1, %v2731_v38  ;;  %v1453_v22 = vadd.f32 %v7515_v41, %v7514_v53 }
 0x288   :  { %4764 = vmatmul.msk.f32.vlgmr.msra.gmra.mxu0 %vm96_vm2, %v6453_v21 }
 0x289   :  { %4774 = vmatmul.msk.f32.vlgmr.msra.gmra.mxu2 %vm96_vm2, %v6453_v21 }
 0x28a   :  { %4769 = vmatmul.msk.f32.vlgmr.msra.gmra.mxu1 %vm96_vm2, %v6453_v21  ;;  %4779 = vmatmul.msk.f32.vlgmr.msra.gmra.mxu3 %vm96_vm2, %v6453_v21 }
 0x28c   :  { %v2126_v44 = vpop.f32.mrf.mxu2 }
 0x28d   :  { %v2155_v1 = vpop.f32.mrf.mxu3  ;;  %v6614_v37 = vadd.f32 %v2126_v44, %v1837_v12  ;;  %v6619_v51 = vpop.f32.mrf.mxu0 }
 0x28e   :  { %v6617_v62 = vadd.f32 %v2155_v1, %v6418_v39  ;;  %v1846_v39 = vadd.f32 %v6424_v60, %v1453_v22  ;;  %v3102_v4 = vpop.permute.xlu1 %3101  ;;  %v6644_v44 = vpop.permute.xlu2 %3068  ;;  %v7516_v60 = vld [vmem:[#allocation18_spill] sm:$0xff]  ;;  %v7517_v1 = vld [vmem:[#allocation40_spill] sm:$0xff] }
 0x28f   :  { %v6621_v13 = vpop.f32.mrf.mxu1 }
 0x290   :  { %4765 = vmatmul.msk.f32.gmra.mxu0 %vm96_vm2, %v6471_v24 }
 0x291   :  { %4775 = vmatmul.msk.f32.gmra.mxu2 %vm96_vm2, %v6471_v24  ;;  %v3100_v43 = vpop.permute.xlu0 %3099 }
 0x292   :  { %4770 = vmatmul.msk.f32.gmra.mxu1 %vm96_vm2, %v6471_v24  ;;  %4780 = vmatmul.msk.f32.gmra.mxu3 %vm96_vm2, %v6471_v24  ;;  %v3120_v12 = vsel %vm3119_vm9, %v3100_v43, %v3102_v4 }
 0x293   :  { %4803 = vmatpush.msk.msra.mxu0 %vm105_vm1, %v3120_v12  ;;  %v7519_v12 = vld [vmem:[#allocation19_spill] sm:$0xff] }
 0x294   :  { %v2129_v26 = vpop.f32.mrf.mxu2 }
 0x295   :  { %v2158_v29 = vpop.f32.mrf.mxu3  ;;  %v6634_v3 = vadd.f32 %v2129_v26, %v1846_v39  ;;  %v6639_v38 = vpop.f32.mrf.mxu0 }
 0x296   :  { %v6637_v34 = vadd.f32 %v2158_v29, %v6444_v47  ;;  %v1462_v47 = vadd.f32 %v7517_v1, %v7516_v60  ;;  %v6669_v50 = vpop.permute.xlu2 %3072 }
 0x297   :  { %v6641_v0 = vpop.f32.mrf.mxu1 }
 0x298   :  { %4766 = vmatmul.msk.f32.gmra.mxu0 %vm96_vm2, %v6483_v16  ;;  %v1855_v53 = vadd.f32 %v6450_v57, %v1462_v47 }
 0x299   :  { %4776 = vmatmul.msk.f32.gmra.mxu2 %vm96_vm2, %v6483_v16  ;;  %v6667_v60 = vpop.permute.xlu0 %3070 }
 0x29a   :  { %4771 = vmatmul.msk.f32.gmra.mxu1 %vm96_vm2, %v6483_v16  ;;  %4781 = vmatmul.msk.f32.gmra.mxu3 %vm96_vm2, %v6483_v16 }
 0x29c   :  { %v2132_v41 = vpop.f32.mrf.mxu2 }
 0x29d   :  { %v2161_v22 = vpop.f32.mrf.mxu3  ;;  %v6658_v39 = vadd.f32 %v2132_v41, %v1855_v53  ;;  %v6663_v29 = vpop.f32.mrf.mxu0 }
 0x29e   :  { %v6661_v26 = vadd.f32 %v2161_v22, %v6475_v52  ;;  %7518 = vst [vmem:[#allocation41_spill] sm:$0xff] %v6663_v29  ;;  %v3104_v1 = vpop.permute.xlu1 %3103  ;;  %v7520_v52 = vld [vmem:[#allocation44_spill] sm:$0xff]  ;;  %v3108_v29 = vpop.permute.xlu2 %3107 }
 0x29f   :  { %v6665_v43 = vpop.f32.mrf.mxu1  ;;  %v3121_v57 = vsel %vm3119_vm9, %v3102_v4, %v3104_v1  ;;  %v1471_v47 = vadd.f32 %v7520_v52, %v7519_v12 }
 0x2a0   :  { %4767 = vmatmul.msk.f32.gmra.mxu0 %vm96_vm2, %v6500_v48  ;;  %4808 = vmatpush.msk.msra.mxu1 %vm105_vm1, %v3121_v57 }
 0x2a1   :  { %4777 = vmatmul.msk.f32.gmra.mxu2 %vm96_vm2, %v6500_v48  ;;  %v1864_v53 = vadd.f32 %v6481_v25, %v1471_v47  ;;  %v6693_v52 = vpop.permute.xlu0 %3074 }
 0x2a2   :  { %4772 = vmatmul.msk.f32.gmra.mxu1 %vm96_vm2, %v6500_v48  ;;  %4782 = vmatmul.msk.f32.gmra.mxu3 %vm96_vm2, %v6500_v48 }
 0x2a4   :  { %v2135_v41 = vpop.f32.mrf.mxu2 }
 0x2a5   :  { %v2164_v22 = vpop.f32.mrf.mxu3  ;;  %v6684_v19 = vadd.f32 %v2135_v41, %v1864_v53  ;;  %v6689_v4 = vpop.f32.mrf.mxu0 }
 0x2a6   :  { %v6687_v40 = vadd.f32 %v2164_v22, %v6502_v8  ;;  %v3106_v63 = vpop.permute.xlu1 %3105  ;;  %v7523_v8 = vld [vmem:[#allocation20_spill] sm:$0xff] }
 0x2a7   :  { %7521 = vst [vmem:[#allocation42_spill] sm:$0xff] %v6684_v19  ;;  %v6691_v12 = vpop.f32.mrf.mxu1  ;;  %v3122_v25 = vsel %vm3119_vm9, %v3104_v1, %v3106_v63  ;;  %v3123_v57 = vsel %vm3119_vm9, %v3106_v63, %v3108_v29  ;;  %v1832_v47 = vadd.f32 %v6276_v18, %v7523_v8 }
 0x2a8   :  { %7522 = vst [vmem:[#allocation6_spill] sm:$0xff] %v6687_v40  ;;  %4784 = vmatmul.msk.f32.vlgmr.msrb.gmra.mxu0 %vm96_vm2, %v6453_v21  ;;  %4813 = vmatpush.msk.msra.mxu2 %vm105_vm1, %v3122_v25  ;;  %v7526_v25 = vld [vmem:[#allocation21_spill] sm:$0xff] }
 0x2a9   :  { %4794 = vmatmul.msk.f32.vlgmr.msrb.gmra.mxu2 %vm96_vm2, %v6453_v21  ;;  %4818 = vmatpush.msk.msra.mxu3 %vm105_vm1, %v3123_v57  ;;  %v2225_v53 = vadd.f32 %v6508_v28, %v1832_v47  ;;  %v1841_v28 = vadd.f32 %v6307_v49, %v7526_v25 }
 0x2aa   :  { %4789 = vmatmul.msk.f32.vlgmr.msrb.gmra.mxu1 %vm96_vm2, %v6453_v21  ;;  %4799 = vmatmul.msk.f32.vlgmr.msrb.gmra.mxu3 %vm96_vm2, %v6453_v21  ;;  %v3110_v21 = vpop.permute.xlu0 %3109 }
 0x2ab   :  { %v2234_v57 = vadd.f32 %v6533_v33, %v1841_v28 }
 0x2ac   :  { %v2378_v41 = vpop.f32.mrf.mxu2 }
 0x2ad   :  { %v2407_v22 = vpop.f32.mrf.mxu3  ;;  %v6710_v1 = vadd.f32 %v2378_v41, %v2225_v53  ;;  %v6715_v18 = vpop.f32.mrf.mxu0 }
 0x2ae   :  { %v6713_v63 = vadd.f32 %v2407_v22, %v6526_v5  ;;  %v3124_v5 = vsel %vm3119_vm9, %v3108_v29, %v3110_v21 }
 0x2af   :  { %7524 = vst [vmem:[#allocation14_spill] sm:$0xff] %v6710_v1  ;;  %v6717_v8 = vpop.f32.mrf.mxu1  ;;  %4823 = vmatpush.msk.msrb.mxu0 %vm105_vm1, %v3124_v5 }
 0x2b0   :  { %7525 = vst [vmem:[#allocation9_spill] sm:$0xff] %v6713_v63  ;;  %4785 = vmatmul.msk.f32.gmra.mxu0 %vm96_vm2, %v6471_v24 }
 0x2b1   :  { %4795 = vmatmul.msk.f32.gmra.mxu2 %vm96_vm2, %v6471_v24 }
 0x2b2   :  { %4790 = vmatmul.msk.f32.gmra.mxu1 %vm96_vm2, %v6471_v24  ;;  %4800 = vmatmul.msk.f32.gmra.mxu3 %vm96_vm2, %v6471_v24  ;;  %v7530_v24 = vld [vmem:[#allocation24_spill] sm:$0xff] }
 0x2b3   :  { %v1850_v33 = vadd.f32 %v6335_v36, %v7530_v24  ;;  %v5001_v36 = vmov 0   ;;  %v3453_v24 = vld [vmem:[%s7434_s2 + $0x8] sm:$0xff] }
 0x2b4   :  { %v2381_v47 = vpop.f32.mrf.mxu2  ;;  %4926 = vset.pattern.permute.xlu1 %v5001_v36  ;;  %4925 = vset.pattern.permute.xlu0 %v5001_v36 }
 0x2b5   :  { %v2410_v53 = vpop.f32.mrf.mxu3  ;;  %v6732_v41 = vadd.f32 %v2381_v47, %v2234_v57  ;;  %v6737_v49 = vpop.f32.mrf.mxu0  ;;  %3463 = vperm.xlu1 %4926, %v3453_v24   ;;  %4924 = vset.pattern.permute.xlu2 %v5001_v36 }
 0x2b6   :  { %v6735_v22 = vadd.f32 %v2410_v53, %v6548_v45  ;;  %7528 = vst [vmem:[#allocation26_spill] sm:$0xff] %v6737_v49  ;;  %v2243_v45 = vadd.f32 %v6555_v15, %v1850_v33 }
 0x2b7   :  { %7527 = vst [vmem:[#allocation25_spill] sm:$0xff] %v6732_v41  ;;  %v6739_v25 = vpop.f32.mrf.mxu1 }
 0x2b8   :  { %7529 = vst [vmem:[#allocation45_spill] sm:$0xff] %v6739_v25  ;;  %4786 = vmatmul.msk.f32.gmra.mxu0 %vm96_vm2, %v6483_v16 }
 0x2b9   :  { %4796 = vmatmul.msk.f32.gmra.mxu2 %vm96_vm2, %v6483_v16 }
 0x2ba   :  { %4791 = vmatmul.msk.f32.gmra.mxu1 %vm96_vm2, %v6483_v16  ;;  %4801 = vmatmul.msk.f32.gmra.mxu3 %vm96_vm2, %v6483_v16  ;;  %v7534_v16 = vld [vmem:[#allocation27_spill] sm:$0xff] }
 0x2bb   :  { %v1859_v15 = vadd.f32 %v6362_v2, %v7534_v16  ;;  %v3455_v2 = vld [vmem:[%s7434_s2 + $0x18] sm:$0xff]  ;;  %v3114_v16 = vpop.permute.xlu2 %3113 }
 0x2bc   :  { %v2384_v29 = vpop.f32.mrf.mxu2  ;;  %3473 = vperm.xlu2 %4924, %v3455_v2  }
 0x2bd   :  { %v2413_v28 = vpop.f32.mrf.mxu3  ;;  %v6752_v5 = vadd.f32 %v2384_v29, %v2243_v45  ;;  %v6757_v47 = vpop.f32.mrf.mxu0 }
 0x2be   :  { %v6755_v57 = vadd.f32 %v2413_v28, %v6568_v10  ;;  %7532 = vst [vmem:[#allocation28_spill] sm:$0xff] %v6757_v47  ;;  %v2252_v10 = vadd.f32 %v6575_v17, %v1859_v15  ;;  %v3112_v17 = vpop.permute.xlu1 %3111 }
 0x2bf   :  { %7531 = vst [vmem:[#allocation10_spill] sm:$0xff] %v6752_v5  ;;  %v6759_v53 = vpop.f32.mrf.mxu1  ;;  %v3125_v15 = vsel %vm3119_vm9, %v3110_v21, %v3112_v17 }
 0x2c0   :  { %7533 = vst [vmem:[#allocation11_spill] sm:$0xff] %v6759_v53  ;;  %4787 = vmatmul.msk.f32.gmra.mxu0 %vm96_vm2, %v6500_v48  ;;  %4828 = vmatpush.msk.msrb.mxu1 %vm105_vm1, %v3125_v15 }
 0x2c1   :  { %4797 = vmatmul.msk.f32.gmra.mxu2 %vm96_vm2, %v6500_v48 }
 0x2c2   :  { %4792 = vmatmul.msk.f32.gmra.mxu1 %vm96_vm2, %v6500_v48  ;;  %4802 = vmatmul.msk.f32.gmra.mxu3 %vm96_vm2, %v6500_v48  ;;  %v3454_v48 = vld [vmem:[%s7434_s2 + $0x10] sm:$0xff] }
 0x2c3   :  { %3468 = vperm.xlu0 %4925, %v3454_v48  }
 0x2c4   :  { %v2387_v33 = vpop.f32.mrf.mxu2 }
 0x2c5   :  { %v2416_v45 = vpop.f32.mrf.mxu3  ;;  %v6775_v29 = vadd.f32 %v2387_v33, %v2252_v10  ;;  %v6780_v36 = vpop.f32.mrf.mxu0 }
 0x2c6   :  { %v6778_v28 = vadd.f32 %v2416_v45, %v6588_v6  ;;  %7537 = vst [vmem:[#allocation32_spill] sm:$0xff] %v6780_v36  ;;  %v3126_v6 = vsel %vm3119_vm9, %v3112_v17, %v3114_v16  ;;  %v3116_v10 = vpop.permute.xlu0 %3115  ;;  %v3452_v17 = vld [vmem:[%s7434_s2] sm:$0xff]  ;;  %s5017_s2 = smov 70  }
 0x2c7   :  { %7535 = vst [vmem:[#allocation30_spill] sm:$0xff] %v6775_v29  ;;  %v6782_v24 = vpop.f32.mrf.mxu1  ;;  %v3127_v33 = vsel %vm3119_vm9, %v3114_v16, %v3116_v10  ;;  %4833 = vmatpush.msk.msrb.mxu2 %vm105_vm1, %v3126_v6  ;;  %v3118_v16 = vpop.permute.xlu1 %3117  ;;  %3458 = vperm.xlu2 %4924, %v3452_v17   ;;  %v3551_v6 = vld [vmem:[%s7435_s4] sm:$0xff] }
 0x2c8   :  { %7536 = vst [vmem:[#allocation13_spill] sm:$0xff] %v6778_v28  ;;  %4804 = vmatmul.msk.f32.vlgmr.msra.gmra.mxu0 %vm96_vm2, %v6644_v44  ;;  %4838 = vmatpush.msk.msrb.mxu3 %vm105_vm1, %v3127_v33  ;;  %v3128_v15 = vsel %vm3119_vm9, %v3116_v10, %v3118_v16  ;;  %v3552_v10 = vld [vmem:[%s7435_s4 + $0x8] sm:$0xff] }
 0x2c9   :  { %7538 = vst [vmem:[#allocation15_spill] sm:$0xff] %v6782_v24  ;;  %4814 = vmatmul.msk.f32.vlgmr.msra.gmra.mxu2 %vm96_vm2, %v6644_v44  ;;  %4843 = vmatpush.msk.msra.mxu0 %vm105_vm1, %v3128_v15  ;;  %v3553_v24 = vld [vmem:[%s7435_s4 + $0x10] sm:$0x7]  ;;  %s5022_s4 = smov 4  }
 0x2ca   :  { %4809 = vmatmul.msk.f32.vlgmr.msra.gmra.mxu1 %vm96_vm2, %v6644_v44  ;;  %4819 = vmatmul.msk.f32.vlgmr.msra.gmra.mxu3 %vm96_vm2, %v6644_v44 }
 0x2cb   :  { %3556 = vperm.xlu0 %4925, %v3551_v6   ;;  %3561 = vperm.xlu1 %4926, %v3552_v10  }
 0x2cc   :  { %v6804_v21 = vpop.f32.mrf.mxu2 }
 0x2cd   :  { %v6806_v45 = vpop.f32.mrf.mxu3  ;;  %v6808_v2 = vpop.f32.mrf.mxu0 }
 0x2ce   :  { %v2633_v20 = vadd.f32 %v6808_v2, %v6551_v32  ;;  %v2237_v32 = vadd.f32 %v6619_v51, %v6333_v14  ;;  %v7555_v51 = vld [vmem:[#allocation33_spill] sm:$0xff] }
 0x2cf   :  { %v6810_v48 = vpop.f32.mrf.mxu1  ;;  %3566 = vperm.xlu2 %4924, %v3553_v24  }
 0x2d0   :  { %4805 = vmatmul.msk.f32.gmra.mxu0 %vm96_vm2, %v6667_v60 }
 0x2d1   :  { %4815 = vmatmul.msk.f32.gmra.mxu2 %vm96_vm2, %v6667_v60 }
 0x2d2   :  { %4810 = vmatmul.msk.f32.gmra.mxu1 %vm96_vm2, %v6667_v60  ;;  %4820 = vmatmul.msk.f32.gmra.mxu3 %vm96_vm2, %v6667_v60 }
 0x2d4   :  { %v6831_v33 = vpop.f32.mrf.mxu2 }
 0x2d5   :  { %v6833_v17 = vpop.f32.mrf.mxu3  ;;  %v6835_v16 = vpop.f32.mrf.mxu0 }
 0x2d7   :  { %v6837_v47 = vpop.f32.mrf.mxu1 }
 0x2d8   :  { %4806 = vmatmul.msk.f32.gmra.mxu0 %vm96_vm2, %v6669_v50 }
 0x2d9   :  { %4816 = vmatmul.msk.f32.gmra.mxu2 %vm96_vm2, %v6669_v50 }
 0x2da   :  { %4811 = vmatmul.msk.f32.gmra.mxu1 %vm96_vm2, %v6669_v50  ;;  %4821 = vmatmul.msk.f32.gmra.mxu3 %vm96_vm2, %v6669_v50 }
 0x2dc   :  { %v6847_v15 = vpop.f32.mrf.mxu2 }
 0x2dd   :  { %v6849_v6 = vpop.f32.mrf.mxu3  ;;  %v6851_v10 = vpop.f32.mrf.mxu0 }
 0x2df   :  { %v6853_v19 = vpop.f32.mrf.mxu1 }
 0x2e0   :  { %7539 = vst [vmem:[#allocation34_spill] sm:$0xff] %v6853_v19  ;;  %4807 = vmatmul.msk.f32.gmra.mxu0 %vm96_vm2, %v6693_v52 }
 0x2e1   :  { %4817 = vmatmul.msk.f32.gmra.mxu2 %vm96_vm2, %v6693_v52 }
 0x2e2   :  { %4812 = vmatmul.msk.f32.gmra.mxu1 %vm96_vm2, %v6693_v52  ;;  %4822 = vmatmul.msk.f32.gmra.mxu3 %vm96_vm2, %v6693_v52 }
 0x2e4   :  { %v6866_v36 = vpop.f32.mrf.mxu2 }
 0x2e5   :  { %v6868_v58 = vpop.f32.mrf.mxu3  ;;  %v6870_v19 = vpop.f32.mrf.mxu0 }
 0x2e6   :  { %7540 = vst [vmem:[#allocation16_spill] sm:$0xff] %v6868_v58 }
 0x2e7   :  { %v6872_v63 = vpop.f32.mrf.mxu1 }
 0x2e8   :  { %4824 = vmatmul.msk.f32.vlgmr.msrb.gmra.mxu0 %vm96_vm2, %v6644_v44 }
 0x2e9   :  { %4834 = vmatmul.msk.f32.vlgmr.msrb.gmra.mxu2 %vm96_vm2, %v6644_v44 }
 0x2ea   :  { %4829 = vmatmul.msk.f32.vlgmr.msrb.gmra.mxu1 %vm96_vm2, %v6644_v44  ;;  %4839 = vmatmul.msk.f32.vlgmr.msrb.gmra.mxu3 %vm96_vm2, %v6644_v44 }
 0x2ec   :  { %v6882_v28 = vpop.f32.mrf.mxu2 }
 0x2ed   :  { %v6884_v58 = vpop.f32.mrf.mxu3  ;;  %v6886_v24 = vpop.f32.mrf.mxu0 }
 0x2ee   :  { %7541 = vst [vmem:[#allocation36_spill] sm:$0xff] %v6884_v58 }
 0x2ef   :  { %v6888_v29 = vpop.f32.mrf.mxu1 }
 0x2f0   :  { %4825 = vmatmul.msk.f32.gmra.mxu0 %vm96_vm2, %v6667_v60 }
 0x2f1   :  { %4835 = vmatmul.msk.f32.gmra.mxu2 %vm96_vm2, %v6667_v60 }
 0x2f2   :  { %4830 = vmatmul.msk.f32.gmra.mxu1 %vm96_vm2, %v6667_v60  ;;  %4840 = vmatmul.msk.f32.gmra.mxu3 %vm96_vm2, %v6667_v60 }
 0x2f4   :  { %v6898_v41 = vpop.f32.mrf.mxu2 }
 0x2f5   :  { %v6900_v1 = vpop.f32.mrf.mxu3  ;;  %v6902_v58 = vpop.f32.mrf.mxu0 }
 0x2f6   :  { %7542 = vst [vmem:[#allocation17_spill] sm:$0xff] %v6900_v1 }
 0x2f7   :  { %7543 = vst [vmem:[#allocation38_spill] sm:$0xff] %v6902_v58  ;;  %v6904_v5 = vpop.f32.mrf.mxu1 }
 0x2f8   :  { %7544 = vst [vmem:[#allocation18_spill] sm:$0xff] %v6904_v5  ;;  %4826 = vmatmul.msk.f32.gmra.mxu0 %vm96_vm2, %v6669_v50 }
 0x2f9   :  { %4836 = vmatmul.msk.f32.gmra.mxu2 %vm96_vm2, %v6669_v50 }
 0x2fa   :  { %4831 = vmatmul.msk.f32.gmra.mxu1 %vm96_vm2, %v6669_v50  ;;  %4841 = vmatmul.msk.f32.gmra.mxu3 %vm96_vm2, %v6669_v50 }
 0x2fc   :  { %v6914_v53 = vpop.f32.mrf.mxu2 }
 0x2fd   :  { %7545 = vst [vmem:[#allocation40_spill] sm:$0xff] %v6914_v53  ;;  %v6916_v56 = vpop.f32.mrf.mxu3  ;;  %v6918_v1 = vpop.f32.mrf.mxu0 }
 0x2fe   :  { %7546 = vst [vmem:[#allocation19_spill] sm:$0xff] %v6916_v56 }
 0x2ff   :  { %7547 = vst [vmem:[#allocation44_spill] sm:$0xff] %v6918_v1  ;;  %v6920_v27 = vpop.f32.mrf.mxu1 }
 0x300   :  { %7548 = vst [vmem:[#allocation20_spill] sm:$0xff] %v6920_v27  ;;  %4827 = vmatmul.msk.f32.gmra.mxu0 %vm96_vm2, %v6693_v52  ;;  %v7553_v27 = vld [vmem:[#allocation29_spill] sm:$0xff] }
 0x301   :  { %4837 = vmatmul.msk.f32.gmra.mxu2 %vm96_vm2, %v6693_v52  ;;  %v1836_v5 = vadd.f32 %v6390_v23, %v7553_v27  ;;  %v7554_v23 = vld [vmem:[#allocation31_spill] sm:$0xff] }
 0x302   :  { %4832 = vmatmul.msk.f32.gmra.mxu1 %vm96_vm2, %v6693_v52  ;;  %4842 = vmatmul.msk.f32.gmra.mxu3 %vm96_vm2, %v6693_v52 }
 0x303   :  { %v2229_v25 = vadd.f32 %v6595_v61, %v1836_v5  ;;  %v1845_v61 = vadd.f32 %v6422_v54, %v7554_v23 }
 0x304   :  { %v6930_v40 = vpop.f32.mrf.mxu2 }
 0x305   :  { %7549 = vst [vmem:[#allocation21_spill] sm:$0xff] %v6930_v40  ;;  %v6932_v53 = vpop.f32.mrf.mxu3  ;;  %v6934_v56 = vpop.f32.mrf.mxu0  ;;  %v2626_v49 = vadd.f32 %v6804_v21, %v2229_v25 }
 0x306   :  { %7550 = vst [vmem:[#allocation24_spill] sm:$0xff] %v6932_v53 }
 0x307   :  { %7551 = vst [vmem:[#allocation27_spill] sm:$0xff] %v6934_v56  ;;  %v6936_v1 = vpop.f32.mrf.mxu1 }
 0x308   :  { %7552 = vst [vmem:[#allocation49_spill] sm:$0xff] %v6936_v1  ;;  %4844 = vmatmul.msk.f32.vlgmr.msra.gmra.mxu0 %vm96_vm2, %v6644_v44  ;;  %v2238_v44 = vadd.f32 %v6621_v13, %v1845_v61  ;;  %v1854_v13 = vadd.f32 %v6448_v31, %v7555_v51 }
 0x30a   :  { %v2635_v25 = vadd.f32 %v6831_v33, %v2238_v44  ;;  %v2247_v21 = vadd.f32 %v6641_v0, %v1854_v13 }
 0x30c   :  { %v6946_v40 = vpop.f32.mrf.mxu2 }
 0x30d   :  { %v2891_v53 = vpop.f32.mrf.mxu3  ;;  %v2807_v56 = vpop.f32.mrf.mxu0 }
 0x30e   :  { %v6948_v9 = vadd.f32 %v2891_v53, %v2626_v49  ;;  %v6951_v58 = vadd.f32 %v2807_v56, %v6735_v22  ;;  %v2634_v49 = vadd.f32 %v6810_v48, %v2237_v32  ;;  %v2642_v56 = vadd.f32 %v6835_v16, %v6571_v46 }
 0x30f   :  { %v2836_v1 = vpop.f32.mrf.mxu1  ;;  %v2246_v46 = vadd.f32 %v6639_v38, %v6360_v42  ;;  %v2644_v48 = vadd.f32 %v6847_v15, %v2247_v21  ;;  %v7556_v42 = vld [vmem:[#allocation35_spill] sm:$0xff]  ;;  %v2628_v15 = vadd.f32 %v6870_v19, %v6617_v62  ;;  %v7559_v21 = vld [vmem:[#allocation38_spill] sm:$0xff] }
 0x310   :  { %v6953_v27 = vadd.f32 %v2836_v1, %v2633_v20  ;;  %4845 = vmatmul.msk.f32.gmra.mxu0 %vm96_vm2, %v6667_v60  ;;  %v1863_v38 = vadd.f32 %v6479_v55, %v7556_v42  ;;  %v7562_v42 = vld [vmem:[#allocation7_spill] sm:$0xff] }
 0x311   :  { %v2643_v2 = vadd.f32 %v6837_v47, %v2246_v46  ;;  %v2627_v47 = vadd.f32 %v6806_v45, %v6614_v37  ;;  %v2232_v37 = vadd.f32 %v6689_v4, %v6420_v59  ;;  %v2645_v46 = vadd.f32 %v6849_v6, %v6658_v39  ;;  %v7563_v39 = vld [vmem:[#allocation26_spill] sm:$0xff] }
 0x312   :  { %v2256_v0 = vadd.f32 %v6665_v43, %v1863_v38  ;;  %v7557_v43 = vld [vmem:[#allocation37_spill] sm:$0xff]  ;;  %v2250_v6 = vadd.f32 %v7563_v39, %v7562_v42  ;;  %v7573_v42 = vld [vmem:[#allocation10_spill] sm:$0xff]  ;;  %v7574_v39 = vld [vmem:[#allocation19_spill] sm:$0xff] }
 0x313   :  { %v2629_v19 = vadd.f32 %v6872_v63, %v2232_v37  ;;  %v7558_v63 = vld [vmem:[#allocation39_spill] sm:$0xff]  ;;  %v7564_v38 = vld [vmem:[#allocation45_spill] sm:$0xff] }
 0x314   :  { %v2865_v20 = vpop.f32.mrf.mxu2 }
 0x315   :  { %v2894_v1 = vpop.f32.mrf.mxu3  ;;  %v6966_v22 = vadd.f32 %v2865_v20, %v2634_v49  ;;  %v2810_v5 = vpop.f32.mrf.mxu0  ;;  %v2636_v20 = vadd.f32 %v6833_v17, %v6634_v3  ;;  %v2241_v3 = vadd.f32 %v6715_v18, %v6446_v35 }
 0x316   :  { %v6968_v54 = vadd.f32 %v2894_v1, %v2635_v25  ;;  %v6971_v53 = vadd.f32 %v2810_v5, %v6755_v57  ;;  %v2651_v57 = vadd.f32 %v6851_v10, %v6591_v11  ;;  %v2653_v11 = vadd.f32 %v6866_v36, %v2256_v0  ;;  %v7565_v0 = vld [vmem:[#allocation18_spill] sm:$0xff] }
 0x317   :  { %v2839_v60 = vpop.f32.mrf.mxu1  ;;  %v1840_v36 = vadd.f32 %v6506_v7, %v7557_v43  ;;  %v2637_v1 = vadd.f32 %v6886_v24, %v6637_v34  ;;  %v2638_v17 = vadd.f32 %v6888_v29, %v2241_v3  ;;  %v7560_v29 = vld [vmem:[#allocation43_spill] sm:$0xff] }
 0x318   :  { %v6973_v14 = vadd.f32 %v2839_v60, %v2642_v56  ;;  %4846 = vmatmul.msk.f32.gmra.mxu0 %vm96_vm2, %v6669_v50 }
 0x319   :  { %v2233_v45 = vadd.f32 %v6691_v12, %v1840_v36 }
 0x31b   :  { %v2630_v62 = vadd.f32 %v6882_v28, %v2233_v45  ;;  %v1849_v28 = vadd.f32 %v6531_v30, %v7558_v63  ;;  %v7572_v63 = vld [vmem:[#allocation21_spill] sm:$0xff] }
 0x31c   :  { %v2868_v33 = vpop.f32.mrf.mxu2 }
 0x31d   :  { %v2897_v16 = vpop.f32.mrf.mxu3  ;;  %v6986_v23 = vadd.f32 %v2868_v33, %v2643_v2  ;;  %v6990_v61 = vpop.f32.mrf.mxu0  ;;  %v2242_v34 = vadd.f32 %v6717_v8, %v1849_v28  ;;  %v2646_v2 = vadd.f32 %v7559_v21, %v6661_v26 }
 0x31e   :  { %v6988_v31 = vadd.f32 %v2897_v16, %v2644_v48 }
 0x31f   :  { %v2842_v50 = vpop.f32.mrf.mxu1  ;;  %v2639_v24 = vadd.f32 %v6898_v41, %v2242_v34  ;;  %v7561_v41 = vld [vmem:[#allocation8_spill] sm:$0xff] }
 0x320   :  { %v6992_v32 = vadd.f32 %v2842_v50, %v2651_v57  ;;  %4847 = vmatmul.msk.f32.gmra.mxu0 %vm96_vm2, %v6693_v52  ;;  %v1858_v50 = vadd.f32 %v7561_v41, %v7560_v29  ;;  %vm3932_vm2 = vcmask 500736  }
 0x322   :  { %v2251_v26 = vadd.f32 %v7564_v38, %v1858_v50  ;;  %v7575_v38 = vld [vmem:[#allocation14_spill] sm:$0xff] }
 0x324   :  { %v7004_v10 = vpop.f32.mrf.mxu2 }
 0x325   :  { %v2900_v44 = vpop.f32.mrf.mxu3  ;;  %v2920_v25 = vpop.f32.mrf.mxu0 }
 0x326   :  { %v7006_v49 = vadd.f32 %v2900_v44, %v2653_v11  ;;  %v7008_v56 = vadd.f32 %v2920_v25, %v2627_v47  ;;  %v2647_v11 = vadd.f32 %v7565_v0, %v2250_v6  ;;  %v7566_v47 = vld [vmem:[#allocation40_spill] sm:$0xff]  ;;  %v7567_v44 = vld [vmem:[#allocation6_spill] sm:$0xff]  ;;  %v3037_v6 = vadd.f32 %v7574_v39, %v7573_v42 }
 0x327   :  { %v2949_v55 = vpop.f32.mrf.mxu1  ;;  %v7568_v25 = vld [vmem:[#allocation44_spill] sm:$0xff] }
 0x328   :  { %v7010_v52 = vadd.f32 %v2949_v55, %v2628_v15  ;;  %v2648_v15 = vadd.f32 %v7566_v47, %v2251_v26  ;;  %v2655_v55 = vadd.f32 %v7568_v25, %v7567_v44  ;;  %v7576_v26 = vld [vmem:[#allocation36_spill] sm:$0xff]  ;;  %v7578_v47 = vld [vmem:[#allocation17_spill] sm:$0xff]  ;;  %v7579_v25 = vld [vmem:[#allocation30_spill] sm:$0xff] }
 0x329   :  { %v3019_v0 = vadd.f32 %v7576_v26, %v7575_v38 }
 0x32c   :  { %v2978_v5 = vpop.f32.mrf.mxu2 }
 0x32d   :  { %v3007_v60 = vpop.f32.mrf.mxu3  ;;  %v7023_v51 = vadd.f32 %v2978_v5, %v2629_v19  ;;  %v2923_v13 = vpop.f32.mrf.mxu0  ;;  %v7570_v5 = vld [vmem:[#allocation22_spill] sm:$0xff] }
 0x32e   :  { %v7025_v7 = vadd.f32 %v3007_v60, %v2630_v62  ;;  %v7027_v4 = vadd.f32 %v2923_v13, %v2636_v20  ;;  %v7571_v13 = vld [vmem:[#allocation11_spill] sm:$0xff] }
 0x32f   :  { %v2952_v59 = vpop.f32.mrf.mxu1 }
 0x330   :  { %v7029_v12 = vadd.f32 %v2952_v59, %v2637_v1  ;;  %v7569_v1 = vld [vmem:[#allocation46_spill] sm:$0xff] }
 0x331   :  { %v1867_v60 = vadd.f32 %v7570_v5, %v7569_v1 }
 0x333   :  { %v2260_v59 = vadd.f32 %v7571_v13, %v1867_v60 }
 0x334   :  { %v2981_v48 = vpop.f32.mrf.mxu2 }
 0x335   :  { %v3010_v57 = vpop.f32.mrf.mxu3  ;;  %v7042_v33 = vadd.f32 %v2981_v48, %v2638_v17  ;;  %v2926_v16 = vpop.f32.mrf.mxu0  ;;  %v2657_v28 = vadd.f32 %v7572_v63, %v2260_v59  ;;  %v7582_v59 = vld [vmem:[#allocation9_spill] sm:$0xff]  ;;  %v7583_v63 = vld [vmem:[#allocation27_spill] sm:$0xff] }
 0x336   :  { %v7044_v30 = vadd.f32 %v3010_v57, %v2639_v24  ;;  %v7046_v18 = vadd.f32 %v2926_v16, %v2645_v46  ;;  %v7079_v16 = vpop.permute.xlu2 %3473  ;;  %v7087_v44 = vpop.permute.xlu0 %3468 }
 0x337   :  { %v2955_v35 = vpop.f32.mrf.mxu1 }
 0x338   :  { %v7048_v8 = vadd.f32 %v2955_v35, %v2646_v2 }
 0x33c   :  { %v2984_v43 = vpop.f32.mrf.mxu2 }
 0x33d   :  { %v3013_v36 = vpop.f32.mrf.mxu3  ;;  %v7059_v37 = vadd.f32 %v2984_v43, %v2647_v11  ;;  %v7063_v19 = vpop.f32.mrf.mxu0  ;;  %v7577_v11 = vld [vmem:[#allocation25_spill] sm:$0xff] }
 0x33e   :  { %v7061_v45 = vadd.f32 %v3013_v36, %v2648_v15  ;;  %v3028_v15 = vadd.f32 %v7578_v47, %v7577_v11  ;;  %v7581_v36 = vld [vmem:[#allocation13_spill] sm:$0xff]  ;;  %v7096_v38 = vpop.permute.xlu2 %3458 }
 0x33f   :  { %v2958_v62 = vpop.f32.mrf.mxu1 }
 0x340   :  { %v7065_v20 = vadd.f32 %v2958_v62, %v2655_v55  ;;  %v7580_v55 = vld [vmem:[#allocation24_spill] sm:$0xff]  ;;  %v3047_v62 = vadd.f32 %v6990_v61, %v7581_v36  ;;  %v7585_v61 = vld [vmem:[#allocation41_spill] sm:$0xff] }
 0x341   :  { %v3046_v43 = vadd.f32 %v7580_v55, %v7579_v25  ;;  %v7584_v55 = vld [vmem:[#allocation48_spill] sm:$0xff] }
 0x344   :  { %v7071_v3 = vpop.f32.mrf.mxu2 }
 0x345   :  { %v3016_v34 = vpop.f32.mrf.mxu3  ;;  %v3172_v24 = vpop.f32.mrf.mxu0 }
 0x346   :  { %v7073_v17 = vadd.f32 %v3016_v34, %v2657_v28  ;;  %v3020_v28 = vadd.f32 %v7583_v63, %v7582_v59  ;;  %v3416_v34 = vadd.f32 %v3172_v24, %v3019_v0  ;;  %v7586_v59 = vld [vmem:[#allocation47_spill] sm:$0xff] }
 0x347   :  { %v3201_v46 = vpop.f32.mrf.mxu1 }
 0x34c   :  { %v7075_v21 = vpop.f32.mrf.mxu2 }
 0x34d   :  { %v7077_v2 = vpop.f32.mrf.mxu3  ;;  %v3175_v48 = vpop.f32.mrf.mxu0 }
 0x34e   :  { %v3425_v26 = vadd.f32 %v3175_v48, %v3028_v15  ;;  %v7587_v48 = vld [vmem:[#allocation23_spill] sm:$0xff] }
 0x34f   :  { %v3204_v57 = vpop.f32.mrf.mxu1  ;;  %v2228_v15 = vadd.f32 %v7587_v48, %v7586_v59 }
 0x350   :  { %v3426_v11 = vadd.f32 %v3204_v57, %v6951_v58  ;;  %v7588_v58 = vld [vmem:[#allocation12_spill] sm:$0xff] }
 0x351   :  { %v7589_v57 = vld [vmem:[#allocation32_spill] sm:$0xff] }
 0x354   :  { %v3233_v35 = vpop.f32.mrf.mxu2 }
 0x355   :  { %v3262_v29 = vpop.f32.mrf.mxu3  ;;  %v3178_v41 = vpop.f32.mrf.mxu0 }
 0x356   :  { %v3434_v1 = vadd.f32 %v3178_v41, %v3037_v6  ;;  %v2255_v41 = vadd.f32 %v7585_v61, %v7584_v55  ;;  %v3417_v6 = vadd.f32 %v3201_v46, %v3020_v28  ;;  %v3476_v46 = vadd.f32 %v7096_v38, %v3416_v34  ;;  %v7592_v55 = vld [vmem:[#allocation49_spill] sm:$0xff] }
 0x357   :  { %v3207_v50 = vpop.f32.mrf.mxu1 }
 0x358   :  { %v3435_v5 = vadd.f32 %v3207_v50, %v6971_v53  ;;  %v7101_v53 = vpop.permute.xlu1 %3463  ;;  %v3494_v24 = vadd.f32 %v7087_v44, %v3434_v1 }
 0x35a   :  { %v3495_v0 = vadd.f32 %v7087_v44, %v3435_v5  ;;  %v3530_v34 = vmax.f32 %v3494_v24, 0.0  ;;  %v3512_v24 = vmax.f32 %v3476_v46, 0.0 }
 0x35c   :  { %v3236_v60 = vpop.f32.mrf.mxu2 }
 0x35d   :  { %v3265_v13 = vpop.f32.mrf.mxu3  ;;  %v3181_v42 = vpop.f32.mrf.mxu0  ;;  %v3436_v59 = vadd.f32 %v3236_v60, %v6973_v14 }
 0x35e   :  { %v3443_v47 = vadd.f32 %v3181_v42, %v3046_v43  ;;  %v2624_v43 = vadd.f32 %v7589_v57, %v7588_v58  ;;  %v3437_v48 = vadd.f32 %v3265_v13, %v6986_v23  ;;  %v3428_v23 = vadd.f32 %v3262_v29, %v6966_v22  ;;  %v7138_v29 = vld [vmem:[%s7436_s3] sm:$0xff] }
 0x35f   :  { %v3210_v39 = vpop.f32.mrf.mxu1 }
 0x360   :  { %v3444_v25 = vadd.f32 %v3210_v39, %v3047_v62  ;;  %v3503_v50 = vadd.f32 %v7079_v16, %v3443_v47  ;;  %v7590_v62 = vld [vmem:[#allocation34_spill] sm:$0xff]  ;;  %v3485_v39 = vadd.f32 %v7101_v53, %v3425_v26  ;;  %v3486_v47 = vadd.f32 %v7101_v53, %v3426_v11 }
 0x361   :  { %v2652_v63 = vadd.f32 %v7590_v62, %v2255_v41  ;;  %v3021_v5 = vadd.f32 %v7592_v55, %v2624_v43  ;;  %v3477_v26 = vadd.f32 %v7096_v38, %v3417_v6 }
 0x362   :  { %v3504_v36 = vadd.f32 %v7079_v16, %v3444_v25  ;;  %v3539_v28 = vmax.f32 %v3503_v50, 0.0  ;;  %v7591_v25 = vld [vmem:[#allocation15_spill] sm:$0xff]  ;;  %v3531_v50 = vmax.f32 %v3495_v0, 0.0  ;;  %v3521_v60 = vmax.f32 %v3485_v39, 0.0 }
 0x363   :  { %v2625_v1 = vadd.f32 %v7591_v25, %v2228_v15  ;;  %v3049_v61 = vadd.f32 %v7004_v10, %v2652_v63  ;;  %v3522_v13 = vmax.f32 %v3486_v47, 0.0  ;;  %v3418_v6 = vadd.f32 %v7075_v21, %v3021_v5 }
 0x364   :  { %v3540_v42 = vmax.f32 %v3504_v36, 0.0  ;;  %v3239_v58 = vpop.f32.mrf.mxu2  ;;  %3591 = vmatpush.msra.mxu1 %v3539_v28  ;;  %v3427_v36 = vadd.f32 %v3233_v35, %v6953_v27  ;;  %v3497_v0 = vadd.f32 %v7087_v44, %v3437_v48  ;;  %v3513_v22 = vmax.f32 %v3477_v26, 0.0  ;;  %v7155_v48 = vld [vmem:[%s7436_s3 + $0x8] sm:$0xff]  ;;  %v7166_v26 = vld [vmem:[%s7436_s3 + $0x10] sm:$0x7]  ;;  %s5003_s3 = smov 106  }
 0x365   :  { %v3268_v41 = vpop.f32.mrf.mxu3  ;;  %v3022_v11 = vadd.f32 %v6946_v40, %v2625_v1  ;;  %v3445_v15 = vadd.f32 %v3239_v58, %v6992_v32  ;;  %v7124_v10 = vpop.f32.mrf.mxu0  ;;  %v3496_v40 = vadd.f32 %v7087_v44, %v3436_v59  ;;  %v3488_v63 = vadd.f32 %v7101_v53, %v3428_v23 }
 0x366   :  { %3617 = vmatpush.msra.mxu2 %v3540_v42  ;;  %v3446_v57 = vadd.f32 %v3268_v41, %v3049_v61  ;;  %3592 = vmatpush.msra.mxu1 %v3530_v34  ;;  %v3487_v21 = vadd.f32 %v7101_v53, %v3427_v36  ;;  %v3533_v42 = vmax.f32 %v3497_v0, 0.0  ;;  %v7594_v36 = vld [vmem:[#allocation16_spill] sm:$0xff] }
 0x367   :  { %v7126_v14 = vpop.f32.mrf.mxu1  ;;  %v3505_v27 = vadd.f32 %v7079_v16, %v3445_v15  ;;  %v3419_v35 = vadd.f32 %v7077_v2, %v3022_v11  ;;  %v3478_v2 = vadd.f32 %v7096_v38, %v3418_v6  ;;  %v3532_v46 = vmax.f32 %v3496_v40, 0.0  ;;  %v7593_v11 = vld [vmem:[#allocation42_spill] sm:$0xff] }
 0x368   :  { %3618 = vmatpush.msra.mxu2 %v3531_v50  ;;  %v3506_v32 = vadd.f32 %v7079_v16, %v3446_v57  ;;  %3593 = vmatpush.msra.mxu1 %v3521_v60  ;;  %v3523_v25 = vmax.f32 %v3487_v21, 0.0  ;;  %v3524_v5 = vmax.f32 %v3488_v63, 0.0  ;;  %v2654_v15 = vadd.f32 %v7594_v36, %v7593_v11  ;;  %v7597_v63 = vld [vmem:[#allocation20_spill] sm:$0xff] }
 0x369   :  { %v3541_v43 = vmax.f32 %v3505_v27, 0.0  ;;  %v3479_v28 = vadd.f32 %v7096_v38, %v3419_v35  ;;  %v3514_v61 = vmax.f32 %v3478_v2, 0.0 }
 0x36a   :  { %3619 = vmatpush.msra.mxu2 %v3522_v13  ;;  %v3542_v62 = vmax.f32 %v3506_v32, 0.0  ;;  %3594 = vmatpush.msra.mxu1 %v3512_v24  ;;  %v3051_v57 = vadd.f32 %v7063_v19, %v2654_v15  ;;  %v7596_v19 = vld [vmem:[#allocation28_spill] sm:$0xff] }
 0x36b   :  { %3643 = vmatpush.msra.mxu3 %v3541_v43  ;;  %4848 = vmatmul.msk.f32.vlgmr.msra.gmra.mxu1 %vm3569_vm10, %v7138_v29  ;;  %v3515_v59 = vmax.f32 %v3479_v28, 0.0 }
 0x36c   :  { %3620 = vmatpush.msra.mxu2 %v3513_v22  ;;  %v7146_v39 = vpop.f32.mrf.mxu2  ;;  %3669 = vmatpush.msrb.mxu1 %v3542_v62  ;;  %v7595_v22 = vld [vmem:[#allocation5_spill] sm:$0xff] }
 0x36d   :  { %v7148_v47 = vpop.f32.mrf.mxu3  ;;  %4851 = vmatmul.msk.f32.vlgmr.msra.gmra.mxu2 %vm3569_vm10, %v7138_v29  ;;  %3644 = vmatpush.msra.mxu3 %v3532_v46  ;;  %v3291_v1 = vpop.f32.mrf.mxu0  ;;  %v2259_v21 = vadd.f32 %v7596_v19, %v7595_v22  ;;  %v3422_v15 = vadd.f32 %v7146_v39, %v7010_v52 }
 0x36e   :  { %3670 = vmatpush.msrb.mxu1 %v3533_v42  ;;  %v3429_v27 = vadd.f32 %v3291_v1, %v6968_v54 }
 0x36f   :  { %v3320_v55 = vpop.f32.mrf.mxu1  ;;  %3645 = vmatpush.msra.mxu3 %v3523_v25  ;;  %v3482_v39 = vadd.f32 %v7096_v38, %v3422_v15 }
 0x370   :  { %3671 = vmatpush.msrb.mxu1 %v3524_v5  ;;  %v3430_v32 = vadd.f32 %v3320_v55, %v7027_v4  ;;  %v3489_v2 = vadd.f32 %v7101_v53, %v3429_v27 }
 0x371   :  { %3646 = vmatpush.msra.mxu3 %v3514_v61 }
 0x372   :  { %4854 = vmatmul.msk.f32.vlgmr.msra.gmra.mxu3 %vm3569_vm10, %v7138_v29  ;;  %3672 = vmatpush.msrb.mxu1 %v3515_v59  ;;  %v3490_v46 = vadd.f32 %v7101_v53, %v3430_v32  ;;  %v3518_v32 = vmax.f32 %v3482_v39, 0.0 }
 0x373   :  { %4849 = vmatmul.msk.f32.gmra.mxu1 %vm3569_vm10, %v7155_v48 }
 0x374   :  { %v3349_v58 = vpop.f32.mrf.mxu2  ;;  %v3526_v11 = vmax.f32 %v3490_v46, 0.0 }
 0x375   :  { %v3378_v41 = vpop.f32.mrf.mxu3  ;;  %4852 = vmatmul.msk.f32.gmra.mxu2 %vm3569_vm10, %v7155_v48  ;;  %v3294_v34 = vpop.f32.mrf.mxu0  ;;  %v3431_v59 = vadd.f32 %v3349_v58, %v7029_v12 }
 0x376   :  { %v3438_v23 = vadd.f32 %v3294_v34, %v6988_v31  ;;  %v3420_v31 = vadd.f32 %v7124_v10, %v6948_v9  ;;  %v3432_v36 = vadd.f32 %v3378_v41, %v7042_v33 }
 0x377   :  { %v3323_v50 = vpop.f32.mrf.mxu1  ;;  %v3491_v33 = vadd.f32 %v7101_v53, %v3431_v59 }
 0x378   :  { %v3439_v60 = vadd.f32 %v3323_v50, %v7046_v18  ;;  %v3421_v18 = vadd.f32 %v7126_v14, %v7008_v56  ;;  %v3498_v43 = vadd.f32 %v7087_v44, %v3438_v23  ;;  %v3480_v56 = vadd.f32 %v7096_v38, %v3420_v31 }
 0x379   :  { %v3492_v52 = vadd.f32 %v7101_v53, %v3432_v36 }
 0x37a   :  { %4855 = vmatmul.msk.f32.gmra.mxu3 %vm3569_vm10, %v7155_v48  ;;  %v3499_v62 = vadd.f32 %v7087_v44, %v3439_v60  ;;  %v3481_v14 = vadd.f32 %v7096_v38, %v3421_v18  ;;  %v3534_v25 = vmax.f32 %v3498_v43, 0.0  ;;  %v3516_v12 = vmax.f32 %v3480_v56, 0.0 }
 0x37b   :  { %4850 = vmatmul.msk.f32.gmra.mxu1 %vm3569_vm10, %v7166_v26  ;;  %v3528_v27 = vmax.f32 %v3492_v52, 0.0 }
 0x37c   :  { %v3352_v13 = vpop.f32.mrf.mxu2  ;;  %v3535_v1 = vmax.f32 %v3499_v62, 0.0  ;;  %v3517_v58 = vmax.f32 %v3481_v14, 0.0 }
 0x37d   :  { %v3381_v24 = vpop.f32.mrf.mxu3  ;;  %4853 = vmatmul.msk.f32.gmra.mxu2 %vm3569_vm10, %v7166_v26  ;;  %v3297_v6 = vpop.f32.mrf.mxu0  ;;  %v3440_v10 = vadd.f32 %v3352_v13, %v7048_v8  ;;  %v3525_v8 = vmax.f32 %v3489_v2, 0.0 }
 0x37e   :  { %v3447_v35 = vadd.f32 %v3297_v6, %v7006_v49  ;;  %v2656_v49 = vadd.f32 %v7597_v63, %v2259_v21  ;;  %v3441_v55 = vadd.f32 %v3381_v24, %v7059_v37 }
 0x37f   :  { %v3326_v40 = vpop.f32.mrf.mxu1  ;;  %v3500_v37 = vadd.f32 %v7087_v44, %v3440_v10 }
 0x380   :  { %v3448_v0 = vadd.f32 %v3326_v40, %v3051_v57  ;;  %v3507_v54 = vadd.f32 %v7079_v16, %v3447_v35  ;;  %v3053_v9 = vadd.f32 %v7071_v3, %v2656_v49  ;;  %v3501_v60 = vadd.f32 %v7087_v44, %v3441_v55 }
 0x381   :  { %v3536_v24 = vmax.f32 %v3500_v37, 0.0 }
 0x382   :  { %v3508_v4 = vadd.f32 %v7079_v16, %v3448_v0  ;;  %v3543_v28 = vmax.f32 %v3507_v54, 0.0  ;;  %4856 = vmatmul.msk.f32.gmra.mxu3 %vm3569_vm10, %v7166_v26 }
 0x383   :  { %4857 = vmatmul.msk.f32.vlgmr.msrb.gmra.mxu1 %vm3569_vm10, %v7138_v29 }
 0x384   :  { %v3544_v42 = vmax.f32 %v3508_v4, 0.0  ;;  %v3355_v5 = vpop.f32.mrf.mxu2  ;;  %3695 = vmatpush.msrb.mxu2 %v3543_v28 }
 0x385   :  { %v3384_v61 = vpop.f32.mrf.mxu3  ;;  %v3449_v3 = vadd.f32 %v3355_v5, %v7065_v20  ;;  %v3404_v50 = vpop.f32.mrf.mxu0  ;;  %v3423_v20 = vadd.f32 %v7148_v47, %v7023_v51  ;;  %v3537_v51 = vmax.f32 %v3501_v60, 0.0  ;;  %v3527_v47 = vmax.f32 %v3491_v33, 0.0 }
 0x386   :  { %3721 = vmatpush.msrb.mxu3 %v3544_v42  ;;  %v3450_v34 = vadd.f32 %v3384_v61, %v3053_v9  ;;  %3696 = vmatpush.msrb.mxu2 %v3534_v25  ;;  %v3424_v18 = vadd.f32 %v3404_v50, %v7025_v7  ;;  %v7269_v42 = vpop.permute.xlu2 %3566 }
 0x387   :  { %v3509_v57 = vadd.f32 %v7079_v16, %v3449_v3  ;;  %v3483_v6 = vadd.f32 %v7096_v38, %v3423_v20 }
 0x388   :  { %3722 = vmatpush.msrb.mxu3 %v3535_v1  ;;  %v3510_v23 = vadd.f32 %v7079_v16, %v3450_v34  ;;  %3697 = vmatpush.msrb.mxu2 %v3525_v8  ;;  %v3484_v4 = vadd.f32 %v7096_v38, %v3424_v18 }
 0x389   :  { %v3545_v41 = vmax.f32 %v3509_v57, 0.0  ;;  %v3519_v35 = vmax.f32 %v3483_v6, 0.0 }
 0x38a   :  { %3723 = vmatpush.msrb.mxu3 %v3526_v11  ;;  %v3546_v13 = vmax.f32 %v3510_v23, 0.0  ;;  %3698 = vmatpush.msrb.mxu2 %v3516_v12  ;;  %v3520_v7 = vmax.f32 %v3484_v4, 0.0 }
 0x38b   :  { %3747 = vmatpush.msrb.mxu0 %v3545_v41  ;;  %4858 = vmatmul.msk.f32.gmra.mxu1 %vm3569_vm10, %v7155_v48 }
 0x38c   :  { %3724 = vmatpush.msrb.mxu3 %v3517_v58  ;;  %3773 = vmatpush.msra.mxu1 %v3546_v13 }
 0x38d   :  { %4860 = vmatmul.msk.f32.vlgmr.msrb.gmra.mxu2 %vm3569_vm10, %v7138_v29  ;;  %4863 = vmatmul.msk.f32.vlgmr.msrb.gmra.mxu3 %vm3569_vm10, %v7138_v29  ;;  %v3407_v40 = vpop.f32.mrf.mxu0 }
 0x38e   :  { %3748 = vmatpush.msrb.mxu0 %v3536_v24  ;;  %3774 = vmatpush.msra.mxu1 %v3537_v51  ;;  %v3433_v21 = vadd.f32 %v3407_v40, %v7044_v30 }
 0x390   :  { %3749 = vmatpush.msrb.mxu0 %v3527_v47  ;;  %3775 = vmatpush.msra.mxu1 %v3528_v27  ;;  %v3493_v62 = vadd.f32 %v7101_v53, %v3433_v21  ;;  %v7264_v53 = vpop.permute.xlu1 %3561 }
 0x392   :  { %3750 = vmatpush.msrb.mxu0 %v3518_v32  ;;  %3776 = vmatpush.msra.mxu1 %v3519_v35  ;;  %v3529_v30 = vmax.f32 %v3493_v62, 0.0 }
 0x393   :  { %4866 = vmatmul.msk.f32.vlgmr.msrb.gmra.mxu0 %vm3569_vm10, %v7138_v29  ;;  %4859 = vmatmul.msk.f32.gmra.mxu1 %vm3569_vm10, %v7166_v26 }
 0x395   :  { %4861 = vmatmul.msk.f32.gmra.mxu2 %vm3569_vm10, %v7155_v48  ;;  %4864 = vmatmul.msk.f32.gmra.mxu3 %vm3569_vm10, %v7155_v48  ;;  %v3410_v0 = vpop.f32.mrf.mxu0 }
 0x396   :  { %v3442_v22 = vadd.f32 %v3410_v0, %v7061_v45 }
 0x398   :  { %v3502_v43 = vadd.f32 %v7087_v44, %v3442_v22 }
 0x39a   :  { %v3538_v63 = vmax.f32 %v3502_v43, 0.0 }
 0x39b   :  { %4867 = vmatmul.msk.f32.gmra.mxu0 %vm3569_vm10, %v7155_v48  ;;  %4869 = vmatmul.msk.f32.vlgmr.msra.gmra.mxu1 %vm3569_vm10, %v7138_v29 }
 0x39d   :  { %4862 = vmatmul.msk.f32.gmra.mxu2 %vm3569_vm10, %v7166_v26  ;;  %4865 = vmatmul.msk.f32.gmra.mxu3 %vm3569_vm10, %v7166_v26  ;;  %v3413_v19 = vpop.f32.mrf.mxu0 }
 0x39e   :  { %v3451_v31 = vadd.f32 %v3413_v19, %v7073_v17  ;;  %v7261_v17 = vpop.permute.xlu0 %3556 }
 0x3a0   :  { %v3511_v45 = vadd.f32 %v7079_v16, %v3451_v31 }
 0x3a2   :  { %v3547_v54 = vmax.f32 %v3511_v45, 0.0 }
 0x3a3   :  { %4868 = vmatmul.msk.f32.gmra.mxu0 %vm3569_vm10, %v7166_v26  ;;  %4870 = vmatmul.msk.f32.gmra.mxu1 %vm3569_vm10, %v7155_v48 }
 0x3a4   :  { %3799 = vmatpush.msra.mxu2 %v3547_v54 }
 0x3a6   :  { %3800 = vmatpush.msra.mxu2 %v3538_v63 }
 0x3a8   :  { %3801 = vmatpush.msra.mxu2 %v3529_v30 }
 0x3aa   :  { %3802 = vmatpush.msra.mxu2 %v3520_v7 }
 0x3ab   :  { %4872 = vmatmul.msk.f32.vlgmr.msra.gmra.mxu2 %vm3569_vm10, %v7138_v29  ;;  %4871 = vmatmul.msk.f32.gmra.mxu1 %vm3569_vm10, %v7166_v26 }
 0x3b3   :  { %4873 = vmatmul.msk.f32.gmra.mxu2 %vm3569_vm10, %v7155_v48 }
 0x3bb   :  { %4874 = vmatmul.msk.f32.gmra.mxu2 %vm3569_vm10, %v7166_v26 }
 0x3e8   :  { %v3596_v16 = vpop.f32.mrf.mxu1 }
 0x3e9   :  { %v3597_v44 = vadd.f32 %v3596_v16, %v7261_v17 }
 0x3f0   :  { %v3622_v38 = vpop.f32.mrf.mxu2  ;;  %v3599_v29 = vpop.f32.mrf.mxu1 }
 0x3f1   :  { %v3623_v49 = vadd.f32 %v3622_v38, %v7261_v17  ;;  %v3600_v2 = vadd.f32 %v3599_v29, %v7264_v53 }
 0x3f3   :  { %3823 = vst [vmem:[#allocation4 + $0x48] sm:$0xff] %v3600_v2 }
 0x3f5   :  { %v3648_v46 = vpop.f32.mrf.mxu3 }
 0x3f6   :  { %v3649_v48 = vadd.f32 %v3648_v46, %v7261_v17 }
 0x3f8   :  { %v3625_v28 = vpop.f32.mrf.mxu2  ;;  %v3602_v9 = vpop.f32.mrf.mxu1 }
 0x3f9   :  { %v3626_v26 = vadd.f32 %v3625_v28, %v7264_v53  ;;  %v3603_v56 = vadd.f32 %v3602_v9, %v7269_v42 }
 0x3fa   :  { %v3857_v10 = vld [vmem:[#allocation4 + $0x48] sm:$0x3]  ;;  %v3941_v35 = vld [vmem:[#allocation4 + $0x48] sm:$0xf8] }
 0x3fb   :  { %3824 = vst [vmem:[#allocation4 + $0x50] sm:$0xff] %v3626_v26  ;;  %v3867_v14 = vsel %vm3866_vm11, %v3857_v10, -inf  ;;  %v3960_v45 = vsel %vm3959_vm12, %v3941_v35, -inf }
 0x3fc   :  { %3832 = vst [vmem:[#allocation4 + $0x90] sm:$0x7] %v3603_v56  ;;  %v3868_v25 = vmax.f32 %v3597_v44, %v3867_v14 }
 0x3fd   :  { %v3651_v1 = vpop.f32.mrf.mxu3 }
 0x3fe   :  { %v3652_v55 = vadd.f32 %v3651_v1, %v7264_v53  ;;  %v3869_v5 = vrot.slane %v3868_v25, 4 }
 0x400   :  { %v3628_v61 = vpop.f32.mrf.mxu2  ;;  %3825 = vst [vmem:[#allocation4 + $0x58] sm:$0xff] %v3652_v55  ;;  %v3674_v3 = vpop.f32.mrf.mxu1  ;;  %v3870_v11 = vmax.f32 %v3868_v25, %v3869_v5 }
 0x401   :  { %v3629_v59 = vadd.f32 %v3628_v61, %v7269_v42  ;;  %v7277_v50 = vadd.f32 %v3674_v3, %v7261_v17 }
 0x402   :  { %v3858_v34 = vld [vmem:[#allocation4 + $0x50] sm:$0x3]  ;;  %v3871_v23 = vrot.slane %v3870_v11, 2  ;;  %v3942_v44 = vld [vmem:[#allocation4 + $0x50] sm:$0xf8] }
 0x403   :  { %v3875_v8 = vsel %vm3866_vm11, %v3858_v34, -inf  ;;  %3833 = vst [vmem:[#allocation4 + $0x98] sm:$0x7] %v3629_v59  ;;  %v3950_v39 = vld [vmem:[#allocation4 + $0x90] sm:$0x7]  ;;  %v3969_v14 = vsel %vm3959_vm12, %v3942_v44, -inf }
 0x404   :  { %v3876_v36 = vmax.f32 %v3623_v49, %v3875_v8  ;;  %v3872_v33 = vmax.f32 %v3870_v11, %v3871_v23  ;;  %v3961_v19 = vsel %vm105_vm1, %v3950_v39, -inf }
 0x405   :  { %v3654_v15 = vpop.f32.mrf.mxu3  ;;  %v3962_v54 = vmax.f32 %v3960_v45, %v3961_v19 }
 0x406   :  { %v3877_v37 = vrot.slane %v3876_v36, 4  ;;  %v3655_v57 = vadd.f32 %v3654_v15, %v7269_v42  ;;  %v3873_v52 = vrot.slane %v3872_v33, 1 }
 0x407   :  { %v3859_v47 = vld [vmem:[#allocation4 + $0x58] sm:$0x3]  ;;  %v3963_v56 = vrot.slane %v3962_v54, 4  ;;  %v3943_v25 = vld [vmem:[#allocation4 + $0x58] sm:$0xf8] }
 0x408   :  { %v3878_v12 = vmax.f32 %v3876_v36, %v3877_v37  ;;  %3834 = vst [vmem:[#allocation4 + $0xa0] sm:$0x7] %v3655_v57  ;;  %v3677_v58 = vpop.f32.mrf.mxu1  ;;  %v3874_v31 = vmax.f32 %v3872_v33, %v3873_v52  ;;  %v3883_v43 = vsel %vm3866_vm11, %v3859_v47, -inf  ;;  %v3978_v3 = vsel %vm3959_vm12, %v3943_v25, -inf }
 0x409   :  { %v3678_v60 = vadd.f32 %v3677_v58, %v7264_v53  ;;  %v3884_v4 = vmax.f32 %v3649_v48, %v3883_v43  ;;  %v3964_v59 = vmax.f32 %v3962_v54, %v3963_v56 }
 0x40a   :  { %v3879_v20 = vrot.slane %v3878_v12, 2  ;;  %v3951_v63 = vld [vmem:[#allocation4 + $0x98] sm:$0x7] }
 0x40b   :  { %3826 = vst [vmem:[#allocation4 + $0x60] sm:$0xff] %v3678_v60  ;;  %v3970_v2 = vsel %vm105_vm1, %v3951_v63, -inf  ;;  %v3885_v10 = vrot.slane %v3884_v4, 4 }
 0x40c   :  { %v3880_v41 = vmax.f32 %v3878_v12, %v3879_v20  ;;  %v3971_v1 = vmax.f32 %v3969_v14, %v3970_v2 }
 0x40d   :  { %v3886_v8 = vmax.f32 %v3884_v4, %v3885_v10 }
 0x40e   :  { %v3881_v13 = vrot.slane %v3880_v41, 1  ;;  %v3972_v58 = vrot.slane %v3971_v1, 4 }
 0x40f   :  { %v3952_v46 = vld [vmem:[#allocation4 + $0xa0] sm:$0x7] }
 0x410   :  { %v3700_v24 = vpop.f32.mrf.mxu2  ;;  %v3752_v6 = vpop.f32.mrf.mxu0  ;;  %v3882_v51 = vmax.f32 %v3880_v41, %v3881_v13  ;;  %v3979_v55 = vsel %vm105_vm1, %v3952_v46, -inf  ;;  %v3965_v41 = vrot.slane %v3964_v59, 2 }
 0x411   :  { %v7283_v40 = vadd.f32 %v3700_v24, %v7261_v17  ;;  %v3726_v27 = vpop.f32.mrf.mxu3  ;;  %v7286_v32 = vadd.f32 %v3752_v6, %v7261_v17  ;;  %v3680_v22 = vpop.f32.mrf.mxu1  ;;  %v3980_v11 = vmax.f32 %v3978_v3, %v3979_v55  ;;  %v3887_v6 = vrot.slane %v3886_v8, 2 }
 0x412   :  { %v7289_v0 = vadd.f32 %v3726_v27, %v7261_v17  ;;  %v3681_v21 = vadd.f32 %v3680_v22, %v7269_v42  ;;  %v4050_v18 = vrot.slane %v3882_v51, 7  ;;  %v3860_v30 = vld [vmem:[#allocation4 + $0x60] sm:$0x3]  ;;  %v3944_v34 = vld [vmem:[#allocation4 + $0x60] sm:$0xf8]  ;;  %v7322_v54 = vmax.f32 %v3964_v59, %v3965_v41 }
 0x413   :  { %v3891_v28 = vsel %vm3866_vm11, %v3860_v30, -inf  ;;  %v3987_v20 = vsel %vm3959_vm12, %v3944_v34, -inf  ;;  %v3981_v22 = vrot.slane %v3980_v11, 4 }
 0x414   :  { %v7296_v62 = vsel %vm4057_vm13, %v3874_v31, %v4050_v18  ;;  %3835 = vst [vmem:[#allocation4 + $0xa8] sm:$0x7] %v3681_v21  ;;  %v3892_v5 = vmax.f32 %v7277_v50, %v3891_v28  ;;  %v3973_v18 = vmax.f32 %v3971_v1, %v3972_v58 }
 0x416   :  { %v3893_v12 = vrot.slane %v3892_v5, 4 }
 0x418   :  { %v3703_v7 = vpop.f32.mrf.mxu2  ;;  %v3755_v16 = vpop.f32.mrf.mxu0  ;;  %v3894_v31 = vmax.f32 %v3892_v5, %v3893_v12 }
 0x419   :  { %v3704_v38 = vadd.f32 %v3703_v7, %v7264_v53  ;;  %v3729_v49 = vpop.f32.mrf.mxu3  ;;  %v3756_v29 = vadd.f32 %v3755_v16, %v7264_v53  ;;  %v3778_v9 = vpop.f32.mrf.mxu1  ;;  %v3982_v16 = vmax.f32 %v3980_v11, %v3981_v22 }
 0x41a   :  { %v3730_v26 = vadd.f32 %v3729_v49, %v7264_v53  ;;  %v7304_v48 = vadd.f32 %v3778_v9, %v7261_v17  ;;  %v3895_v44 = vrot.slane %v3894_v31, 2  ;;  %v3974_v49 = vrot.slane %v3973_v18, 2 }
 0x41b   :  { %3827 = vst [vmem:[#allocation4 + $0x68] sm:$0xff] %v3704_v38  ;;  %v3953_v61 = vld [vmem:[#allocation4 + $0xa8] sm:$0x7]  ;;  %v3983_v55 = vrot.slane %v3982_v16, 2 }
 0x41c   :  { %3828 = vst [vmem:[#allocation4 + $0x70] sm:$0xff] %v3730_v26  ;;  %v3988_v36 = vsel %vm105_vm1, %v3953_v61, -inf  ;;  %v3896_v59 = vmax.f32 %v3894_v31, %v3895_v44  ;;  %v3975_v34 = vmax.f32 %v3973_v18, %v3974_v49 }
 0x41d   :  { %3829 = vst [vmem:[#allocation4 + $0x78] sm:$0xff] %v3756_v29  ;;  %v3989_v13 = vmax.f32 %v3987_v20, %v3988_v36 }
 0x41f   :  { %v3990_v63 = vrot.slane %v3989_v13, 4 }
 0x420   :  { %v3706_v15 = vpop.f32.mrf.mxu2  ;;  %v3758_v37 = vpop.f32.mrf.mxu0 }
 0x421   :  { %v3707_v57 = vadd.f32 %v3706_v15, %v7269_v42  ;;  %v3732_v23 = vpop.f32.mrf.mxu3  ;;  %v3781_v33 = vpop.f32.mrf.mxu1  ;;  %v3759_v24 = vadd.f32 %v3758_v37, %v7269_v42  ;;  %v3991_v10 = vmax.f32 %v3989_v13, %v3990_v63 }
 0x422   :  { %v3861_v50 = vld [vmem:[#allocation4 + $0x68] sm:$0x3]  ;;  %v3733_v60 = vadd.f32 %v3732_v23, %v7269_v42  ;;  %v3782_v35 = vadd.f32 %v3781_v33, %v7264_v53 }
 0x423   :  { %v3899_v52 = vsel %vm3866_vm11, %v3861_v50, -inf  ;;  %v3862_v39 = vld [vmem:[#allocation4 + $0x70] sm:$0x3]  ;;  %3836 = vst [vmem:[#allocation4 + $0xb0] sm:$0x7] %v3707_v57  ;;  %v3992_v50 = vrot.slane %v3991_v10, 2 }
 0x424   :  { %v3900_v51 = vmax.f32 %v7283_v40, %v3899_v52  ;;  %v3907_v47 = vsel %vm3866_vm11, %v3862_v39, -inf  ;;  %v3863_v27 = vld [vmem:[#allocation4 + $0x78] sm:$0x3]  ;;  %3837 = vst [vmem:[#allocation4 + $0xb8] sm:$0x7] %v3733_v60  ;;  %v3888_v40 = vmax.f32 %v3886_v8, %v3887_v6  ;;  %v3976_v6 = vrot.slane %v3975_v34, 1 }
 0x425   :  { %v3908_v19 = vmax.f32 %v7289_v0, %v3907_v47  ;;  %v3915_v21 = vsel %vm3866_vm11, %v3863_v27, -inf  ;;  %3838 = vst [vmem:[#allocation4 + $0xc0] sm:$0x7] %v3759_v24  ;;  %v3945_v0 = vld [vmem:[#allocation4 + $0x68] sm:$0xf8]  ;;  %v3984_v47 = vmax.f32 %v3982_v16, %v3983_v55  ;;  %v3993_v18 = vmax.f32 %v3991_v10, %v3992_v50 }
 0x426   :  { %v3916_v43 = vmax.f32 %v7286_v32, %v3915_v21  ;;  %v3901_v45 = vrot.slane %v3900_v51, 4  ;;  %3830 = vst [vmem:[#allocation4 + $0x80] sm:$0xff] %v3782_v35  ;;  %v3967_v32 = vrot.slane %v7322_v54, 1  ;;  %v3946_v46 = vld [vmem:[#allocation4 + $0x70] sm:$0xf8]  ;;  %v3889_v9 = vrot.slane %v3888_v40, 1 }
 0x427   :  { %v3909_v4 = vrot.slane %v3908_v19, 4  ;;  %v3947_v28 = vld [vmem:[#allocation4 + $0x78] sm:$0xf8]  ;;  %v3996_v14 = vsel %vm3959_vm12, %v3945_v0, -inf  ;;  %v4005_v8 = vsel %vm3959_vm12, %v3946_v46, -inf  ;;  %v3985_v46 = vrot.slane %v3984_v47, 1 }
 0x428   :  { %v3902_v30 = vmax.f32 %v3900_v51, %v3901_v45  ;;  %v3917_v7 = vrot.slane %v3916_v43, 4  ;;  %v4014_v11 = vsel %vm3959_vm12, %v3947_v28, -inf  ;;  %v7335_v39 = vmax.f32 %v3888_v40, %v3889_v9 }
 0x429   :  { %v3910_v38 = vmax.f32 %v3908_v19, %v3909_v4  ;;  %v3784_v29 = vpop.f32.mrf.mxu1  ;;  %v3897_v19 = vrot.slane %v3896_v59, 1 }
 0x42a   :  { %v3918_v2 = vmax.f32 %v3916_v43, %v3917_v7  ;;  %v3785_v26 = vadd.f32 %v3784_v29, %v7269_v42  ;;  %v3903_v56 = vrot.slane %v3902_v30, 2  ;;  %v3954_v25 = vld [vmem:[#allocation4 + $0xb0] sm:$0x7]  ;;  %v4051_v28 = vrot.slane %v7335_v39, 6 }
 0x42b   :  { %v3911_v1 = vrot.slane %v3910_v38, 2  ;;  %v3997_v5 = vsel %vm105_vm1, %v3954_v25, -inf  ;;  %v3955_v61 = vld [vmem:[#allocation4 + $0xb8] sm:$0x7]  ;;  %v3898_v9 = vmax.f32 %v3896_v59, %v3897_v19  ;;  %v3994_v25 = vrot.slane %v3993_v18, 1 }
 0x42c   :  { %3839 = vst [vmem:[#allocation4 + $0xc8] sm:$0x7] %v3785_v26  ;;  %v3919_v3 = vrot.slane %v3918_v2, 2  ;;  %v3998_v36 = vmax.f32 %v3996_v14, %v3997_v5  ;;  %v4006_v15 = vsel %vm105_vm1, %v3955_v61, -inf  ;;  %v3956_v37 = vld [vmem:[#allocation4 + $0xc0] sm:$0x7]  ;;  %v3904_v20 = vmax.f32 %v3902_v30, %v3903_v56 }
 0x42d   :  { %v4007_v57 = vmax.f32 %v4005_v8, %v4006_v15  ;;  %v4015_v23 = vsel %vm105_vm1, %v3956_v37, -inf  ;;  %v3864_v12 = vld [vmem:[#allocation4 + $0x80] sm:$0x3]  ;;  %v3912_v13 = vmax.f32 %v3910_v38, %v3911_v1  ;;  %v3948_v51 = vld [vmem:[#allocation4 + $0x80] sm:$0xf8]  ;;  %v4052_v59 = vrot.slane %v3898_v9, 5 }
 0x42e   :  { %v3804_v58 = vpop.f32.mrf.mxu2  ;;  %v4016_v60 = vmax.f32 %v4014_v11, %v4015_v23  ;;  %v3923_v33 = vsel %vm3866_vm11, %v3864_v12, -inf  ;;  %v3920_v24 = vmax.f32 %v3918_v2, %v3919_v3  ;;  %v3999_v27 = vrot.slane %v3998_v36, 4 }
 0x42f   :  { %v3805_v41 = vadd.f32 %v3804_v58, %v7261_v17  ;;  %v3924_v52 = vmax.f32 %v7304_v48, %v3923_v33  ;;  %v4008_v35 = vrot.slane %v4007_v57, 4  ;;  %v3905_v21 = vrot.slane %v3904_v20, 1 }
 0x430   :  { %v4017_v22 = vrot.slane %v4016_v60, 4  ;;  %v3913_v17 = vrot.slane %v3912_v13, 1  ;;  %v4000_v45 = vmax.f32 %v3998_v36, %v3999_v27  ;;  %v4023_v40 = vsel %vm3959_vm12, %v3948_v51, -inf }
 0x431   :  { %3822 = vst.msk [vmem:[#allocation4 + $0x40] sm:$0xff] %vm3821_vm14, %v3805_v41  ;;  %v3925_v31 = vrot.slane %v3924_v52, 4  ;;  %v4009_v4 = vmax.f32 %v4007_v57, %v4008_v35  ;;  %v3921_v30 = vrot.slane %v3920_v24, 1  ;;  %v7340_v2 = vmax.f32 %v3975_v34, %v3976_v6 }
 0x432   :  { %v4018_v48 = vmax.f32 %v4016_v60, %v4017_v22  ;;  %v4001_v0 = vrot.slane %v4000_v45, 2  ;;  %v3906_v5 = vmax.f32 %v3904_v20, %v3905_v21  ;;  %v3914_v61 = vmax.f32 %v3912_v13, %v3913_v17 }
 0x433   :  { %v3957_v43 = vld [vmem:[#allocation4 + $0xc8] sm:$0x7]  ;;  %v3926_v7 = vmax.f32 %v3924_v52, %v3925_v31  ;;  %v4010_v44 = vrot.slane %v4009_v4, 2  ;;  %v3922_v3 = vmax.f32 %v3920_v24, %v3921_v30  ;;  %v3995_v37 = vmax.f32 %v3993_v18, %v3994_v25 }
 0x434   :  { %v4024_v63 = vsel %vm105_vm1, %v3957_v43, -inf  ;;  %v4019_v38 = vrot.slane %v4018_v48, 2  ;;  %v4002_v56 = vmax.f32 %v4000_v45, %v4001_v0  ;;  %vm3840_vm1 = vcmask 501760  }
 0x435   :  { %v4025_v16 = vmax.f32 %v4023_v40, %v4024_v63  ;;  %v3927_v29 = vrot.slane %v3926_v7, 2  ;;  %v4011_v10 = vmax.f32 %v4009_v4, %v4010_v44  ;;  %v4053_v12 = vrot.slane %v3906_v5, 4  ;;  %v3844_v40 = vld [vmem:[#allocation4 + $0x4a] ss:$8 sm:$0xf0] }
 0x436   :  { %v3807_v49 = vpop.f32.mrf.mxu2  ;;  %v4020_v1 = vmax.f32 %v4018_v48, %v4019_v38  ;;  %v4003_v8 = vrot.slane %v4002_v56, 1  ;;  %v4054_v58 = vrot.slane %v3914_v61, 3  ;;  %v4055_v50 = vrot.slane %v3922_v3, 2  ;;  %v3843_v38 = vld [vmem:[#allocation4 + $0x4a] ss:$8 sm:$0xf] }
 0x437   :  { %v3808_v26 = vadd.f32 %v3807_v49, %v7264_v53  ;;  %v3928_v14 = vmax.f32 %v3926_v7, %v3927_v29  ;;  %v4026_v55 = vrot.slane %v4025_v16, 4  ;;  %v4012_v11 = vrot.slane %v4011_v10, 1 }
 0x438   :  { %v3986_v53 = vmax.f32 %v3984_v47, %v3985_v46  ;;  %v4021_v57 = vrot.slane %v4020_v1, 1  ;;  %v3856_v20 = vld [vmem:[#allocation4 + $0x40] sm:$0xff]  ;;  %v4004_v33 = vmax.f32 %v4002_v56, %v4003_v8  ;;  %v4060_v24 = vsel %vm4059_vm15, %v4051_v28, %v4052_v59 }
 0x439   :  { %3831 = vst.msk [vmem:[#allocation4 + $0x88] sm:$0xff] %vm3821_vm14, %v3808_v26  ;;  %v3929_v34 = vrot.slane %v3928_v14, 1  ;;  %v4027_v36 = vmax.f32 %v4025_v16, %v4026_v55  ;;  %v4013_v41 = vmax.f32 %v4011_v10, %v4012_v11  ;;  %v4081_v6 = vrot.slane %v7340_v2, 7 }
 0x43a   :  { %v4022_v47 = vmax.f32 %v4020_v1, %v4021_v57  ;;  %v4083_v22 = vrot.slane %v3995_v37, 5  ;;  %v3931_v19 = vsel %vm3821_vm14, %v3856_v20, -inf  ;;  %v4063_v31 = vsel %vm4062_vm0, %v4053_v12, %v4054_v58 }
 0x43b   :  { %v3930_v15 = vmax.f32 %v3928_v14, %v3929_v34  ;;  %v4028_v23 = vrot.slane %v4027_v36, 2  ;;  %v4084_v17 = vrot.slane %v4004_v33, 4  ;;  %v4085_v45 = vrot.slane %v4013_v41, 3 }
 0x43c   :  { %v3968_v4 = vmax.f32 %v7322_v54, %v3967_v32  ;;  %v4086_v30 = vrot.slane %v4022_v47, 2  ;;  %v4061_v0 = vsel %vm3866_vm11, %v7296_v62, %v4060_v24  ;;  %v3845_v46 = vor.u32 %v3844_v40, %v3843_v38 }
 0x43d   :  { %v4029_v13 = vmax.f32 %v4027_v36, %v4028_v23  ;;  %v4056_v52 = vrot.slane %v3930_v15, 1  ;;  %v4091_v32 = vsel %vm4062_vm0, %v4084_v17, %v4085_v45  ;;  %v5002_v1 = vmov 0.0  }
 0x43e   :  { %v3810_v60 = vpop.f32.mrf.mxu2  ;;  %v4088_v44 = vsel %vm4057_vm13, %v3968_v4, %v4081_v6  ;;  %v4103_v15 = vlaneseq  ;;  %vm4291_vm0 = vcmask 162816  }
 0x43f   :  { %v3811_v39 = vadd.f32 %v3810_v60, %v7269_v42  ;;  %v4030_v27 = vrot.slane %v4029_v13, 1  ;;  %v4065_v35 = vsel %vm4064_vm3, %v4055_v50, %v4056_v52  ;;  %v4082_v42 = vrot.slane %v3986_v53, 6 }
 0x440   :  { %v3865_v51 = vld [vmem:[#allocation4 + $0x88] sm:$0x3]  ;;  %v4067_v48 = vsel %vm4066_vm4, %v4063_v31, %v4065_v35  ;;  %v3949_v29 = vld [vmem:[#allocation4 + $0x88] sm:$0xf8]  ;;  %vm4105_vm13 = vcmp.lt.s32.totalorder %v4103_v15, 62 }
 0x441   :  { %3841 = vst.msk [vmem:[#allocation4 + $0xd0] sm:$0x7] %vm3840_vm1, %v3811_v39  ;;  %v3933_v21 = vsel %vm3932_vm2, %v3865_v51, -inf  ;;  %v4031_v43 = vmax.f32 %v4029_v13, %v4030_v27  ;;  %v4089_v16 = vsel %vm4059_vm15, %v4082_v42, %v4083_v22  ;;  %v4069_v54 = vsel %vm4068_vm5, %v4061_v0, %v4067_v48  ;;  %v3847_v50 = vld [vmem:[#allocation4 + $0x8a] ss:$8 sm:$0x1] }
 0x442   :  { %v3934_v18 = vmax.f32 %v3931_v19, %v3933_v21  ;;  %v4090_v28 = vsel %vm3866_vm11, %v4088_v44, %v4089_v16  ;;  %v4033_v10 = vsel %vm4032_vm6, %v3949_v29, -inf  ;;  %vm4071_vm7 = vcmp.gt.f32.partialorder %v3845_v46, %v4069_v54 }
 0x443   :  { %v4087_v7 = vrot.slane %v4031_v43, 1  ;;  %vm4109_vm15 = vcmask 253952   ;;  %vm4199_vm2 = vcmask 80896   ;;  %vm4232_vm6 = vcmask 15360  }
 0x444   :  { %v3935_v63 = vrot.slane %v3934_v18, 4 }
 0x445   :  { %v4092_v2 = vsel %vm4064_vm3, %v4086_v30, %v4087_v7  ;;  %vm4258_vm3 = vcmask 228352  }
 0x446   :  { %v3936_v49 = vmax.f32 %v3934_v18, %v3935_v63  ;;  %v4093_v26 = vsel %vm4066_vm4, %v4091_v32, %v4092_v2  ;;  %vm4133_vm4 = vcmask 211968  }
 0x447   :  { %v4094_v62 = vsel %vm4068_vm5, %v4090_v28, %v4093_v26  ;;  %vm4166_vm5 = vcmask 146432  }
 0x448   :  { %v3937_v9 = vrot.slane %v3936_v49, 2  ;;  %v3958_v56 = vld [vmem:[#allocation4 + $0xd0] sm:$0x7]  ;;  %vm4096_vm8 = vcmp.ge.f32.partialorder %v3845_v46, %v4094_v62 }
 0x449   :  { %v4034_v14 = vsel %vm3840_vm1, %v3958_v56, -inf  ;;  %vm4098_vm9 = vmand %vm4071_vm7, %vm4096_vm8  ;;  %vm4324_vm1 = vcmask 97280   ;;  %vm4357_vm7 = vcmask 31744   ;;  %vm4436_vm8 = vcmask 130048  }
 0x44a   :  { %v4035_v25 = vmax.f32 %v4033_v10, %v4034_v14  ;;  %v4100_v55 = vsel %vm4098_vm9, 255.0, %v5002_v1  ;;  %v3938_v5 = vmax.f32 %v3936_v49, %v3937_v9 }
 0x44b   :  { %4102 = vst [vmem:[#allocation2] sm:$0xff] %v4100_v55 }
 0x44c   :  { %v4036_v61 = vrot.slane %v4035_v25, 4  ;;  %v3939_v34 = vrot.slane %v3938_v5, 1 }
 0x44e   :  { %v4037_v3 = vmax.f32 %v4035_v25, %v4036_v61  ;;  %v3940_v53 = vmax.f32 %v3938_v5, %v3939_v34 }
 0x450   :  { %v4038_v8 = vrot.slane %v4037_v3, 2  ;;  %vm4072_vm11 = vcmp.gt.f32.partialorder %v3847_v50, %v3940_v53 }
 0x452   :  { %v4039_v11 = vmax.f32 %v4037_v3, %v4038_v8  ;;  %v4962_v36 = vld [vmem:[#allocation2 + $0x7] ss:$0 sm:$0xff]  ;;  %v4963_v37 = vld [vmem:[#allocation2 + $0x6] ss:$0 sm:$0xff]  ;;  %v4965_v33 = vld [vmem:[#allocation2 + $0x4] ss:$0 sm:$0xff] }
 0x453   :  { %v4316_v57 = vld [vmem:[#allocation2 + $0x6] sm:$0x3]  ;;  %4331 = vrot.lane.b32.xlu0 %v4962_v36, %s5003_s3  ;;  %4312 = vrot.lane.b32.xlu2 %v4963_v37, %s5004_s23  ;;  %v4967_v6 = vld [vmem:[#allocation2 + $0x5] ss:$0 sm:$0xff]  ;;  %v4191_v47 = vld [vmem:[#allocation2 + $0x2] sm:$0x3] }
 0x454   :  { %v4040_v59 = vrot.slane %v4039_v11, 1  ;;  %v4318_v23 = vperm.slane %v4316_v57, 0  ;;  %v4319_v12 = vperm.slane %v4316_v57, 1  ;;  %v4964_v41 = vld [vmem:[#allocation2 + $0x7] ss:$0 sm:$0xff]  ;;  %v4193_v35 = vperm.slane %v4191_v47, 0 }
 0x455   :  { %v4283_v13 = vld [vmem:[#allocation2 + $0x5] sm:$0x3]  ;;  %v4968_v27 = vld [vmem:[#allocation2 + $0x7] ss:$0 sm:$0xff]  ;;  %v4194_v22 = vperm.slane %v4191_v47, 1  ;;  %s5029_s3 = smov 86  }
 0x456   :  { %v4041_v58 = vmax.f32 %v4039_v11, %v4040_v59  ;;  %v4927_v20 = vpack.i.bf16 %v4319_v12, %v4318_v23  ;;  %v4966_v52 = vld [vmem:[#allocation2 + $0x6] ss:$0 sm:$0xff]  ;;  %v4285_v39 = vperm.slane %v4283_v13, 0  ;;  %v4286_v24 = vperm.slane %v4283_v13, 1  ;;  %v4250_v19 = vld [vmem:[#allocation2 + $0x4] sm:$0x3] }
 0x457   :  { %v4108_v21 = vld [vmem:[#allocation2] sm:$0x1]  ;;  %v4942_v31 = vpack.i.bf16 %v4194_v22, %v4193_v35  ;;  %v4252_v42 = vperm.slane %v4250_v19, 0  ;;  %v4253_v18 = vperm.slane %v4250_v19, 1  ;;  %v4969_v43 = vld [vmem:[#allocation2 + $0x5] ss:$0 sm:$0xff] }
 0x458   :  { %vm4097_vm12 = vcmp.ge.f32.partialorder %v3847_v50, %v4041_v58  ;;  %4928 = vrot.lane.b32.xlu1 %v4927_v20, %s5005_s24  ;;  %v4937_v51 = vpack.i.bf16 %v4286_v24, %v4285_v39  ;;  %4110 = vst.msk [vmem:[#allocation3] sm:$0x1] %vm4109_vm15, %v4108_v21  ;;  %v4971_v45 = vld [vmem:[#allocation2 + $0x2] ss:$0 sm:$0xff]  ;;  %v4970_v4 = vld [vmem:[#allocation2 + $0x6] ss:$0 sm:$0xff] }
 0x459   :  { %vm4099_vm14 = vmand %vm4072_vm11, %vm4097_vm12  ;;  %v4932_v17 = vpack.i.bf16 %v4253_v18, %v4252_v42  ;;  %v4972_v48 = vld [vmem:[#allocation2 + $0x4] ss:$0 sm:$0xff]  ;;  %v4973_v40 = vld [vmem:[#allocation2 + $0x3] ss:$0 sm:$0xff] }
 0x45a   :  { %v4101_v60 = vsel %vm4099_vm14, 255.0, %v5002_v1  ;;  %v4974_v63 = vld [vmem:[#allocation2 + $0x2] ss:$0 sm:$0xff]  ;;  %v4975_v7 = vld [vmem:[#allocation2 + $0x5] ss:$0 sm:$0xff] }
 0x45b   :  { %4107 = vst.msk [vmem:[#allocation2 + $0x8] sm:$0x1] %vm4105_vm13, %v4101_v60  ;;  %4239 = vrot.lane.b32.xlu0 %v4965_v33, %s5006_s25  ;;  %4345 = vrot.lane.b32.xlu2 %v4964_v41, %s5007_s0  ;;  %v4158_v30 = vld [vmem:[#allocation2 + $0x1] sm:$0x3]  ;;  %v4224_v44 = vld [vmem:[#allocation2 + $0x3] sm:$0x3] }
 0x45c   :  { %v4160_v16 = vperm.slane %v4158_v30, 0  ;;  %v4161_v0 = vperm.slane %v4158_v30, 1  ;;  %v4226_v49 = vperm.slane %v4224_v44, 0  ;;  %v4227_v29 = vperm.slane %v4224_v44, 1  ;;  %v4976_v54 = vld [vmem:[#allocation2 + $0x3] ss:$0 sm:$0xff] }
 0x45d   :  { %v4125_v32 = vld [vmem:[#allocation2] sm:$0x3]  ;;  %v4977_v62 = vld [vmem:[#allocation2 + $0x2] ss:$0 sm:$0xff]  ;;  %v4980_v25 = vld [vmem:[#allocation2 + $0x3] ss:$0 sm:$0xff] }
 0x45e   :  { %v4957_v38 = vpack.i.bf16 %v4161_v0, %v4160_v16  ;;  %v4947_v2 = vpack.i.bf16 %v4227_v29, %v4226_v49  ;;  %v4127_v46 = vperm.slane %v4125_v32, 0  ;;  %v4128_v28 = vperm.slane %v4125_v32, 1  ;;  %v4978_v14 = vld [vmem:[#allocation2] ss:$0 sm:$0xff]  ;;  %v4981_v1 = vld [vmem:[#allocation2 + $0x1] ss:$0 sm:$0xff] }
 0x45f   :  { %v4982_v5 = vld [vmem:[#allocation2] ss:$0 sm:$0xff]  ;;  %v4983_v61 = vld [vmem:[#allocation2 + $0x1] ss:$0 sm:$0xff] }
 0x460   :  { %4305 = vrot.lane.b32.xlu1 %v4966_v52, %s5008_s26  ;;  %v4952_v56 = vpack.i.bf16 %v4128_v28, %v4127_v46  ;;  %v4984_v3 = vld [vmem:[#allocation2 + $0x1] ss:$0 sm:$0xff]  ;;  %v4406_v28 = vld [vmem:[%s7437_s6 + $0x18] sm:$0xff] }
 0x461   :  { %4425 = vmatpush.msra.mxu0 %v4406_v28 }
 0x462   :  { %v4349_v26 = vld [vmem:[#allocation2 + $0x7] sm:$0x3] }
 0x463   :  { %4272 = vrot.lane.b32.xlu0 %v4967_v6, %s5009_s27  ;;  %4938 = vrot.lane.b32.xlu2 %v4937_v51, %s5010_s29  ;;  %v4352_v9 = vperm.slane %v4349_v26, 1  ;;  %v4979_v10 = vld [vmem:[#allocation2 + $0x8] ss:$0 sm:$0xff]  ;;  %v4351_v55 = vperm.slane %v4349_v26, 0 }
 0x464   :  { %v4405_v26 = vld [vmem:[%s7437_s6 + $0x10] sm:$0xff] }
 0x465   :  { %4426 = vmatpush.msra.mxu0 %v4405_v26 }
 0x468   :  { %4338 = vrot.lane.b32.xlu1 %v4968_v27, %s5011_s28 }
 0x46b   :  { %4943 = vrot.lane.b32.xlu0 %v4942_v31, %s5012_s8  ;;  %4265 = vrot.lane.b32.xlu2 %v4969_v43, %s4988_s30  ;;  %s5019_s30 = smov 54  }
 0x470   :  { %4933 = vrot.lane.b32.xlu1 %v4932_v17, %s5013_s10 }
 0x473   :  { %4180 = vrot.lane.b32.xlu0 %v4971_v45, %s5014_s11  ;;  %4298 = vrot.lane.b32.xlu2 %v4970_v4, %s5015_s12 }
 0x478   :  { %4246 = vrot.lane.b32.xlu1 %v4972_v48, %s5016_s13 }
 0x47b   :  { %4213 = vrot.lane.b32.xlu0 %v4973_v40, %s5017_s2  ;;  %4173 = vrot.lane.b32.xlu2 %v4974_v63, %s5018_s14 }
 0x480   :  { %4279 = vrot.lane.b32.xlu1 %v4975_v7, %s5019_s30 }
 0x483   :  { %4958 = vrot.lane.b32.xlu0 %v4957_v38, %s5020_s15  ;;  %4206 = vrot.lane.b32.xlu2 %v4976_v54, %s5000_s20  ;;  %s5026_s20 = smov 36  }
 0x488   :  { %4948 = vrot.lane.b32.xlu1 %v4947_v2, %s5021_s16 }
 0x48b   :  { %4355 = vrot.lane.b32.xlu0 %v4352_v9, %s5022_s4  ;;  %4953 = vrot.lane.b32.xlu2 %v4952_v56, %s5023_s17 }
 0x490   :  { %4187 = vrot.lane.b32.xlu1 %v4977_v62, %s5024_s19  ;;  %v4404_v62 = vld [vmem:[%s7437_s6 + $0x8] sm:$0xff] }
 0x491   :  { %4427 = vmatpush.msra.mxu0 %v4404_v62 }
 0x493   :  { %4364 = vrot.lane.b32.xlu0 %v4979_v10, %s5025_s21  ;;  %4121 = vrot.lane.b32.xlu2 %v4978_v14, %s4995_s9  ;;  %v4403_v14 = vld [vmem:[%s7437_s6] sm:$0xff] }
 0x494   :  { %4428 = vmatpush.msra.mxu0 %v4403_v14 }
 0x498   :  { %4220 = vrot.lane.b32.xlu1 %v4980_v25, %s5026_s20 }
 0x49b   :  { %4140 = vrot.lane.b32.xlu0 %v4981_v1, %s5027_s1  ;;  %4353 = vrot.lane.b32.xlu2 %v4351_v55, %s5022_s4 }
 0x4a0   :  { %4114 = vrot.lane.b32.xlu1 %v4982_v5, %s4989_s18  ;;  %v4368_v5 = vld [vmem:[%s7438_s5] sm:$0xff] }
 0x4a3   :  { %4154 = vrot.lane.b32.xlu2 %v4983_v61, %s5028_s22 }
 0x4a8   :  { %4147 = vrot.lane.b32.xlu1 %v4984_v3, %s5029_s3  ;;  %v4369_v3 = vld [vmem:[%s7438_s5 + $0x8] sm:$0xff] }
 0x4ad   :  { %v4313_v34 = vpop.permute.xlu2 %4312 }
 0x4ae   :  { %4315 = vst.msk [vmem:[#allocation3 + $0x19] sm:$0x1] %vm4109_vm15, %v4313_v34 }
 0x4b5   :  { %v4346_v8 = vpop.permute.xlu2 %4345 }
 0x4b6   :  { %4348 = vst.msk [vmem:[#allocation3 + $0x1d] sm:$0x1] %vm4109_vm15, %v4346_v8 }
 0x4bd   :  { %v4939_v11 = vpop.permute.xlu2 %4938 }
 0x4be   :  { %v4941_v36 = vunpack.i.h.bf16 %v4939_v11  ;;  %v4940_v53 = vunpack.i.l.bf16 %v4939_v11 }
 0x4c0   :  { %v4292_v59 = vsel %vm4291_vm0, %v4940_v53, %v4941_v36 }
 0x4c1   :  { %4294 = vst.msk [vmem:[#allocation3 + $0x16] sm:$0x1] %vm4109_vm15, %v4292_v59 }
 0x4c5   :  { %v4332_v15 = vpop.permute.xlu0 %4331  ;;  %v4266_v37 = vpop.permute.xlu2 %4265 }
 0x4c6   :  { %4334 = vst.msk [vmem:[#allocation3 + $0x1b] sm:$0x1] %vm4109_vm15, %v4332_v15 }
 0x4c7   :  { %4268 = vst.msk [vmem:[#allocation3 + $0x13] sm:$0x1] %vm4109_vm15, %v4266_v37 }
 0x4ca   :  { %v4929_v57 = vpop.permute.xlu1 %4928 }
 0x4cb   :  { %v4931_v23 = vunpack.i.h.bf16 %v4929_v57  ;;  %v4930_v12 = vunpack.i.l.bf16 %v4929_v57 }
 0x4cd   :  { %v4325_v58 = vsel %vm4324_vm1, %v4930_v12, %v4931_v23  ;;  %v4240_v50 = vpop.permute.xlu0 %4239  ;;  %v4299_v20 = vpop.permute.xlu2 %4298 }
 0x4ce   :  { %4327 = vst.msk [vmem:[#allocation3 + $0x1a] sm:$0x1] %vm4109_vm15, %v4325_v58 }
 0x4cf   :  { %4242 = vst.msk [vmem:[#allocation3 + $0x10] sm:$0x1] %vm4109_vm15, %v4240_v50 }
 0x4d0   :  { %4301 = vst.msk [vmem:[#allocation3 + $0x17] sm:$0x1] %vm4109_vm15, %v4299_v20 }
 0x4d2   :  { %v4306_v60 = vpop.permute.xlu1 %4305 }
 0x4d3   :  { %4308 = vst.msk [vmem:[#allocation3 + $0x18] sm:$0x1] %vm4109_vm15, %v4306_v60 }
 0x4d5   :  { %v4273_v33 = vpop.permute.xlu0 %4272  ;;  %v4174_v41 = vpop.permute.xlu2 %4173 }
 0x4d6   :  { %4275 = vst.msk [vmem:[#allocation3 + $0x14] sm:$0x1] %vm4109_vm15, %v4273_v33 }
 0x4d7   :  { %4176 = vst.msk [vmem:[#allocation3 + $0x8] sm:$0x1] %vm4109_vm15, %v4174_v41 }
 0x4da   :  { %v4339_v13 = vpop.permute.xlu1 %4338 }
 0x4db   :  { %4341 = vst.msk [vmem:[#allocation3 + $0x1c] sm:$0x1] %vm4109_vm15, %v4339_v13 }
 0x4dd   :  { %v4944_v52 = vpop.permute.xlu0 %4943  ;;  %v4207_v6 = vpop.permute.xlu2 %4206 }
 0x4de   :  { %v4946_v39 = vunpack.i.h.bf16 %v4944_v52  ;;  %v4945_v24 = vunpack.i.l.bf16 %v4944_v52  ;;  %4209 = vst.msk [vmem:[#allocation3 + $0xc] sm:$0x1] %vm4109_vm15, %v4207_v6 }
 0x4e0   :  { %v4200_v51 = vsel %vm4199_vm2, %v4945_v24, %v4946_v39 }
 0x4e1   :  { %4202 = vst.msk [vmem:[#allocation3 + $0xb] sm:$0x1] %vm4109_vm15, %v4200_v51 }
 0x4e2   :  { %v4934_v47 = vpop.permute.xlu1 %4933 }
 0x4e3   :  { %v4936_v27 = vunpack.i.h.bf16 %v4934_v47  ;;  %v4935_v35 = vunpack.i.l.bf16 %v4934_v47 }
 0x4e5   :  { %v4259_v22 = vsel %vm4258_vm3, %v4935_v35, %v4936_v27  ;;  %v4181_v19 = vpop.permute.xlu0 %4180  ;;  %v4954_v21 = vpop.permute.xlu2 %4953 }
 0x4e6   :  { %4261 = vst.msk [vmem:[#allocation3 + $0x12] sm:$0x1] %vm4109_vm15, %v4259_v22  ;;  %v4956_v31 = vunpack.i.h.bf16 %v4954_v21  ;;  %v4955_v42 = vunpack.i.l.bf16 %v4954_v21 }
 0x4e7   :  { %4183 = vst.msk [vmem:[#allocation3 + $0x9] sm:$0x1] %vm4109_vm15, %v4181_v19 }
 0x4e8   :  { %v4134_v18 = vsel %vm4133_vm4, %v4955_v42, %v4956_v31 }
 0x4e9   :  { %4136 = vst.msk [vmem:[#allocation3 + $0x3] sm:$0x1] %vm4109_vm15, %v4134_v18 }
 0x4ea   :  { %v4247_v43 = vpop.permute.xlu1 %4246 }
 0x4eb   :  { %4249 = vst.msk [vmem:[#allocation3 + $0x11] sm:$0x1] %vm4109_vm15, %v4247_v43 }
 0x4ed   :  { %v4214_v17 = vpop.permute.xlu0 %4213  ;;  %v4122_v45 = vpop.permute.xlu2 %4121 }
 0x4ee   :  { %4216 = vst.msk [vmem:[#allocation3 + $0xd] sm:$0x1] %vm4109_vm15, %v4214_v17 }
 0x4ef   :  { %4124 = vst.msk [vmem:[#allocation3 + $0x2] sm:$0x1] %vm4109_vm15, %v4122_v45 }
 0x4f2   :  { %v4280_v4 = vpop.permute.xlu1 %4279 }
 0x4f3   :  { %4282 = vst.msk [vmem:[#allocation3 + $0x15] sm:$0x1] %vm4109_vm15, %v4280_v4 }
 0x4f5   :  { %v4959_v48 = vpop.permute.xlu0 %4958  ;;  %v4354_v30 = vpop.permute.xlu2 %4353 }
 0x4f6   :  { %v4961_v40 = vunpack.i.h.bf16 %v4959_v48  ;;  %v4960_v63 = vunpack.i.l.bf16 %v4959_v48 }
 0x4f8   :  { %v4167_v7 = vsel %vm4166_vm5, %v4960_v63, %v4961_v40 }
 0x4f9   :  { %4169 = vst.msk [vmem:[#allocation3 + $0x7] sm:$0x1] %vm4109_vm15, %v4167_v7 }
 0x4fa   :  { %v4949_v16 = vpop.permute.xlu1 %4948  ;;  %v4372_v10 = vld [vmem:[#allocation3 + $0x10] sm:$0xff] }
 0x4fb   :  { %v4951_v0 = vunpack.i.h.bf16 %v4949_v16  ;;  %v4950_v44 = vunpack.i.l.bf16 %v4949_v16 }
 0x4fd   :  { %v4233_v38 = vsel %vm4232_vm6, %v4950_v44, %v4951_v0  ;;  %v4356_v49 = vpop.permute.xlu0 %4355  ;;  %v4155_v54 = vpop.permute.xlu2 %4154 }
 0x4fe   :  { %4235 = vst.msk [vmem:[#allocation3 + $0xf] sm:$0x1] %vm4109_vm15, %v4233_v38  ;;  %v4358_v29 = vsel %vm4357_vm7, %v4354_v30, %v4356_v49 }
 0x4ff   :  { %4360 = vst.msk [vmem:[#allocation3 + $0x1e] sm:$0x1] %vm4109_vm15, %v4358_v29 }
 0x500   :  { %4157 = vst.msk [vmem:[#allocation3 + $0x6] sm:$0x1] %vm4109_vm15, %v4155_v54 }
 0x502   :  { %v4188_v32 = vpop.permute.xlu1 %4187 }
 0x503   :  { %4190 = vst.msk [vmem:[#allocation3 + $0xa] sm:$0x1] %vm4109_vm15, %v4188_v32 }
 0x505   :  { %v4365_v2 = vpop.permute.xlu0 %4364 }
 0x506   :  { %4367 = vst.msk [vmem:[#allocation3 + $0x1f] sm:$0x1] %vm4109_vm15, %v4365_v2 }
 0x50a   :  { %v4221_v46 = vpop.permute.xlu1 %4220 }
 0x50b   :  { %4223 = vst.msk [vmem:[#allocation3 + $0xe] sm:$0x1] %vm4109_vm15, %v4221_v46 }
 0x50d   :  { %v4141_v9 = vpop.permute.xlu0 %4140  ;;  %v4373_v56 = vld [vmem:[#allocation3 + $0x18] sm:$0xff] }
 0x50e   :  { %4143 = vst.msk [vmem:[#allocation3 + $0x4] sm:$0x1] %vm4109_vm15, %v4141_v9  ;;  %4392 = vmatpush.msra.mxu3 %v4373_v56 }
 0x510   :  { %4393 = vmatpush.msra.mxu3 %v4372_v10 }
 0x512   :  { %v4115_v25 = vpop.permute.xlu1 %4114  ;;  %v4371_v1 = vld [vmem:[#allocation3 + $0x8] sm:$0xff] }
 0x513   :  { %4117 = vst.msk [vmem:[#allocation3 + $0x1] sm:$0x1] %vm4109_vm15, %v4115_v25  ;;  %4394 = vmatpush.msra.mxu3 %v4371_v1 }
 0x51a   :  { %v4148_v55 = vpop.permute.xlu1 %4147 }
 0x51b   :  { %4150 = vst.msk [vmem:[#allocation3 + $0x5] sm:$0x1] %vm4109_vm15, %v4148_v55 }
 0x522   :  { %v4370_v61 = vld [vmem:[#allocation3] sm:$0xff] }
 0x523   :  { %4395 = vmatpush.msra.mxu3 %v4370_v61 }
 0x524   :  { %4875 = vmatmul.msk.f32.vlgmr.msra.gmra.mxu3 %vm3569_vm10, %v4368_v5 }
 0x52c   :  { %4876 = vmatmul.msk.f32.gmra.mxu3 %vm3569_vm10, %v4369_v3 }
 0x5a7   :  { %v4397_v34 = vpop.f32.mrf.mxu3 }
 0x5a8   :  { %4877 = vmatmul.msk.f32.vlgmr.msra.gmra.mxu0 %vm3569_vm10, %v4397_v34 }
 0x5af   :  { %v4400_v8 = vpop.f32.mrf.mxu3 }
 0x5b0   :  { %4878 = vmatmul.msk.f32.gmra.mxu0 %vm3569_vm10, %v4400_v8 }
 0x625   :  { %v4430_v11 = vpop.f32.mrf.mxu0 }
 0x626   :  { %4437 = vst.msk [vmem:[%s7439_s7] sm:$0xff] %vm4436_vm8, %v4430_v11 }
 0x62d   :  { %v4433_v36 = vpop.f32.mrf.mxu0 }
 0x62e   :  { %4438 = vst.msk [vmem:[%s7439_s7 + $0x8] sm:$0xff] %vm4436_vm8, %v4433_v36 }

</bundles_post_ra>
